<compile_context>
chip_gen: v7x
topology: tpu7x:2x2x1
jax: 0.10.0
libtpu: 0.0.40
codegen_flags: <defaults>
</compile_context>

<pallas_src>
import jax
import jax.numpy as jnp
from jax.experimental import pallas as pl
from jax.experimental.pallas import tpu as pltpu


# (H_in, W_in, C_in, C_out, pool, groups) per conv layer, for 28x28x1 input.
_LAYERS = (
    (28, 28, 1, 16, 2, 1),
    (13, 13, 16, 32, 2, 2),
    (5, 5, 32, 64, 3, 2),
)


# ------------------------------ kernel body ---------------------------------

def _conv_selfmul_pool_relu(x, m_ref, brow_ref, s_ref, p_ref, cout, pool):
    """x: (R, W*Cin) slab -> conv3x3 + selfMul + maxpool(pool) + ReLU."""
    r = x.shape[0]
    # in-VMEM "im2col" over the 3 row shifts only (lane concat); the width /
    # channel structure of the conv lives inside the band matrix m_ref.
    patches = jnp.concatenate([x[0:r - 2, :], x[1:r - 1, :], x[2:r, :]], axis=1)
    f = jnp.dot(patches, m_ref[...], preferred_element_type=jnp.float32)
    f = f + brow_ref[...]
    # selfMul over each channel block of size cout (first half <- prod).
    half = cout // 2
    rot = jnp.concatenate([f[:, half:], f[:, :half]], axis=1)
    lane = jax.lax.broadcasted_iota(jnp.int32, f.shape, 1)
    f = jnp.where((lane & (cout - 1)) < half, f * rot, f)   # cout is 2^k
    # max-pool along width: max over `pool` channel-block lane rotations.
    u = f
    for b in range(1, pool):
        shift = b * cout
        u = jnp.maximum(u, jnp.concatenate([f[:, shift:], f[:, :shift]], axis=1))
    # max-pool along height: max over `pool` row shifts.
    rows = f.shape[0] - (pool - 1)
    v = u[0:rows, :]
    for a in range(1, pool):
        v = jnp.maximum(v, u[a:a + rows, :])
    # stride-`pool` subsample of rows (S) and width blocks (P): 0/1 selections.
    pooled = jnp.dot(jnp.dot(s_ref[...], v, preferred_element_type=jnp.float32),
                     p_ref[...], preferred_element_type=jnp.float32)
    return jnp.maximum(pooled, 0.0)                         # ReLU


def _cnn_kernel(x_ref,
                m1, b1, s1, p1,
                m2, b2, s2, p2,
                m3, b3, s3, p3,
                fw1, fb1, fw2, fb2,
                out_ref):
    x = x_ref[0]                                               # (TB*28, 28)
    x = _conv_selfmul_pool_relu(x, m1, b1, s1, p1, 16, 2)      # (TB*13, 13*16)
    x = _conv_selfmul_pool_relu(x, m2, b2, s2, p2, 32, 2)      # (TB*5,  5*32)
    x = _conv_selfmul_pool_relu(x, m3, b3, s3, p3, 64, 3)      # (TB,    64)

    # fc1 -> selfMul -> leaky_relu(0.1) -> fc2 (padded to 128) -> softmax
    h = jnp.dot(x, fw1[...], preferred_element_type=jnp.float32) + fb1[...]
    half = h.shape[1] // 2
    rot = jnp.concatenate([h[:, half:], h[:, :half]], axis=1)
    lane = jax.lax.broadcasted_iota(jnp.int32, h.shape, 1)
    h = jnp.where(lane < half, h * rot, h)
    h = jnp.where(h >= 0.0, h, 0.1 * h)
    logits = jnp.dot(h, fw2[...], preferred_element_type=jnp.float32) + fb2[...]
    m = jnp.max(logits, axis=1, keepdims=True)
    e = jnp.exp(logits - m)
    out_ref[0] = e * pl.reciprocal(jnp.sum(e, axis=1, keepdims=True), approx=True)


# --------------------------- wrapper-built matrices --------------------------

def _band_conv_matrix(w, w_in, groups):
    """Torch conv weight (Cout, Cin_g, 3, 3) -> (3*W_in*Cin, Wo*Cout) band
    matrix (groups folded in block-diagonally)."""
    cout, cin_g, kh, kw = w.shape
    cin = cin_g * groups
    cog = cout // groups
    wo = w_in - kw + 1
    wo_idx = jnp.arange(wo)
    m = jnp.zeros((kh, w_in, cin, wo, cout), jnp.float32)
    for dh in range(kh):
        for dw in range(kw):
            shift = jnp.zeros((w_in, wo), jnp.float32).at[wo_idx + dw, wo_idx].set(1.0)
            wfull = jnp.zeros((cin, cout), jnp.float32)
            for g in range(groups):
                blk = jnp.transpose(w[g * cog:(g + 1) * cog, :, dh, dw])  # (cin_g, cog)
                wfull = wfull.at[g * cin_g:(g + 1) * cin_g,
                                 g * cog:(g + 1) * cog].set(blk)
            m = m.at[dh].add(shift[:, None, :, None] * wfull[None, :, None, :])
    return m.reshape(kh * w_in * cin, wo * cout)


def _pool_col_select(wo, c, pool):
    """0/1 matrix selecting lane blocks w = pool*wp out of (Wo, C) lanes."""
    wp = wo // pool
    j = jnp.arange(c)
    k = jnp.arange(wp)
    rows = (pool * k[:, None] * c + j[None, :]).reshape(-1)
    cols = (k[:, None] * c + j[None, :]).reshape(-1)
    return jnp.zeros((wo * c, wp * c), jnp.float32).at[rows, cols].set(1.0)


def _pool_row_select(h_in, pool, tb):
    """0/1 matrix selecting rows i*H + pool*hp from the row-max slab (also
    drops cross-sample garbage rows when tb > 1)."""
    hp = (h_in - 2) // pool
    rv = tb * h_in - 2 - (pool - 1)
    i = jnp.arange(tb)
    k = jnp.arange(hp)
    rows = (i[:, None] * hp + k[None, :]).reshape(-1)
    cols = (i[:, None] * h_in + pool * k[None, :]).reshape(-1)
    return jnp.zeros((tb * hp, rv), jnp.float32).at[rows, cols].set(1.0)


# --------------------------------- forward ----------------------------------

def cnn_forward(x_nchw, params, *, tb=1):
    b = x_nchw.shape[0]
    assert x_nchw.shape[1:] == (1, 28, 28), x_nchw.shape
    bp = ((b + tb - 1) // tb) * tb
    x = x_nchw.astype(jnp.float32).reshape(b, 28, 28)
    if bp != b:
        x = jnp.concatenate([x, jnp.zeros((bp - b, 28, 28), jnp.float32)], axis=0)
    xg = x.reshape(bp // tb, tb * 28, 28)

    ops = []
    for (h_in, w_in, cin, cout, pool, groups), wk, bk in zip(
            _LAYERS, ("w1", "w2", "w3"), ("b1", "b2", "b3")):
        wo = w_in - 2
        ops += [
            _band_conv_matrix(params[wk], w_in, groups),
            jnp.tile(params[bk], wo).reshape(1, wo * cout),
            _pool_row_select(h_in, pool, tb),
            _pool_col_select(wo, cout, pool),
        ]
    fw1 = jnp.transpose(params["fw1"])                         # (64, 32)
    fb1 = params["fb1"].reshape(1, -1)
    ncls = params["fw2"].shape[0]                              # 11
    fw2 = jnp.zeros((fw1.shape[1], 128), jnp.float32).at[:, :ncls].set(
        jnp.transpose(params["fw2"]))
    fb2 = jnp.full((1, 128), -1e30, jnp.float32).at[0, :ncls].set(params["fb2"])
    ops += [fw1, fb1, fw2, fb2]

    in_specs = [pl.BlockSpec((1, tb * 28, 28), lambda i: (i, 0, 0))]
    in_specs += [pl.BlockSpec(a.shape, lambda i: (0, 0)) for a in ops]

    out = pl.pallas_call(
        _cnn_kernel,
        out_shape=jax.ShapeDtypeStruct((bp // tb, tb, 128), jnp.float32),
        grid=(bp // tb,),
        in_specs=in_specs,
        out_specs=pl.BlockSpec((1, tb, 128), lambda i: (i, 0, 0)),
        compiler_params=pltpu.CompilerParams(
            dimension_semantics=("parallel",)),
    )(xg, *ops)
    return out.reshape(bp, 128)[:b, :ncls]


# ------------------------------ reference model ------------------------------

def _reference_forward(x, params):
    """Pure-JAX (XLA) replica of the PyTorch Cnn.forward, for validation."""
    def conv(t, w, bias, groups):
        y = jax.lax.conv_general_dilated(
            t, w, window_strides=(1, 1), padding="VALID",
            dimension_numbers=("NCHW", "OIHW", "NCHW"),
            feature_group_count=groups)
        return y + bias.reshape(1, -1, 1, 1)

    def self_mul(t):                     # selfMul over dim=1
        half = t.shape[1] // 2
        return jnp.concatenate([t[:, :half] * t[:, half:], t[:, half:]], axis=1)

    def pool(t, p):
        return jax.lax.reduce_window(t, -jnp.inf, jax.lax.max,
                                     (1, 1, p, p), (1, 1, p, p), "VALID")

    t = x.astype(jnp.float32)
    t = jax.nn.relu(pool(self_mul(conv(t, params["w1"], params["b1"], 1)), 2))
    t = jax.nn.relu(pool(self_mul(conv(t, params["w2"], params["b2"], 2)), 2))
    t = jax.nn.relu(pool(self_mul(conv(t, params["w3"], params["b3"], 2)), 3))
    t = t.reshape(-1, 64)
    t = t @ params["fw1"].T + params["fb1"]
    t = jnp.concatenate([t[:, :16] * t[:, 16:], t[:, 16:]], axis=1)
    t = jnp.where(t >= 0.0, t, 0.1 * t)
    t = t @ params["fw2"].T + params["fb2"]
    return jax.nn.softmax(t, axis=1)


# --------------------------------- params -----------------------------------

def init_params(key):
    def u(k, shape, fan_in):
        bound = 1.0 / jnp.sqrt(jnp.float32(fan_in))
        return jax.random.uniform(k, shape, jnp.float32, -bound, bound)

    ks = jax.random.split(key, 10)
    return {
        "w1": u(ks[0], (16, 1, 3, 3), 9),    "b1": u(ks[1], (16,), 9),
        "w2": u(ks[2], (32, 8, 3, 3), 72),   "b2": u(ks[3], (32,), 72),
        "w3": u(ks[4], (64, 16, 3, 3), 144), "b3": u(ks[5], (64,), 144),
        "fw1": u(ks[6], (32, 64), 64),       "fb1": u(ks[7], (32,), 64),
        "fw2": u(ks[8], (11, 32), 32),       "fb2": u(ks[9], (11,), 32),
    }


if __name__ == "__main__":
    key = jax.random.PRNGKey(0)
    pkey, xkey = jax.random.split(key)
    params = init_params(pkey)
    # MNIST-style input: the forward geometry (view(-1, 64)) requires 28x28.
    x = jax.random.normal(xkey, (2, 1, 28, 28), dtype=jnp.float32)

    out = jax.jit(cnn_forward)(x, params)
    out = jax.block_until_ready(out)
    assert out.shape == (2, 11), out.shape

    ref = _reference_forward(x, params)
    # loose tolerance: approx reciprocal in the softmax + f32 summation-order
    # differences of the band-matrix conv vs XLA's conv.
    assert bool(jnp.all(jnp.abs(out - ref) < 2e-2)), (out, ref)
    assert bool(jnp.all(jnp.abs(jnp.sum(out, axis=1) - 1.0) < 2e-2))
    print("KERNEL_OK")
</pallas_src>

<mosaic_0001>
module attributes {stable_mosaic.version = 11 : i64} {
  func.func @_cnn_kernel(%arg0: i32, %arg1: memref<1x28x28xf32, #tpu.memory_space<vmem>>, %arg2: memref<84x416xf32, #tpu.memory_space<vmem>>, %arg3: memref<1x416xf32, #tpu.memory_space<vmem>>, %arg4: memref<13x25xf32, #tpu.memory_space<vmem>>, %arg5: memref<416x208xf32, #tpu.memory_space<vmem>>, %arg6: memref<624x352xf32, #tpu.memory_space<vmem>>, %arg7: memref<1x352xf32, #tpu.memory_space<vmem>>, %arg8: memref<5x10xf32, #tpu.memory_space<vmem>>, %arg9: memref<352x160xf32, #tpu.memory_space<vmem>>, %arg10: memref<480x192xf32, #tpu.memory_space<vmem>>, %arg11: memref<1x192xf32, #tpu.memory_space<vmem>>, %arg12: memref<1x1xf32, #tpu.memory_space<vmem>>, %arg13: memref<192x64xf32, #tpu.memory_space<vmem>>, %arg14: memref<64x32xf32, #tpu.memory_space<vmem>>, %arg15: memref<1x32xf32, #tpu.memory_space<vmem>>, %arg16: memref<32x128xf32, #tpu.memory_space<vmem>>, %arg17: memref<1x128xf32, #tpu.memory_space<vmem>>, %arg18: memref<1x1x128xf32, #tpu.memory_space<vmem>>) attributes {dimension_semantics = [#tpu.dimension_semantics<parallel>], iteration_bounds = array<i64: 2>, scalar_prefetch = 0 : i64, scratch_operands = 0 : i64, tpu.core_type = #tpu.core_type<tc>, window_params = [{transform_indices = @transform_0, window_bounds = array<i64: 1, 28, 28>}, {pipeline_mode = #tpu.pipeline_mode<synchronous>, transform_indices = @transform_1, window_bounds = array<i64: 84, 416>}, {pipeline_mode = #tpu.pipeline_mode<synchronous>, transform_indices = @transform_2, window_bounds = array<i64: 1, 416>}, {pipeline_mode = #tpu.pipeline_mode<synchronous>, transform_indices = @transform_3, window_bounds = array<i64: 13, 25>}, {pipeline_mode = #tpu.pipeline_mode<synchronous>, transform_indices = @transform_4, window_bounds = array<i64: 416, 208>}, {pipeline_mode = #tpu.pipeline_mode<synchronous>, transform_indices = @transform_5, window_bounds = array<i64: 624, 352>}, {pipeline_mode = #tpu.pipeline_mode<synchronous>, transform_indices = @transform_6, window_bounds = array<i64: 1, 352>}, {pipeline_mode = #tpu.pipeline_mode<synchronous>, transform_indices = @transform_7, window_bounds = array<i64: 5, 10>}, {pipeline_mode = #tpu.pipeline_mode<synchronous>, transform_indices = @transform_8, window_bounds = array<i64: 352, 160>}, {pipeline_mode = #tpu.pipeline_mode<synchronous>, transform_indices = @transform_9, window_bounds = array<i64: 480, 192>}, {pipeline_mode = #tpu.pipeline_mode<synchronous>, transform_indices = @transform_10, window_bounds = array<i64: 1, 192>}, {pipeline_mode = #tpu.pipeline_mode<synchronous>, transform_indices = @transform_11, window_bounds = array<i64: 1, 1>}, {pipeline_mode = #tpu.pipeline_mode<synchronous>, transform_indices = @transform_12, window_bounds = array<i64: 192, 64>}, {pipeline_mode = #tpu.pipeline_mode<synchronous>, transform_indices = @transform_13, window_bounds = array<i64: 64, 32>}, {pipeline_mode = #tpu.pipeline_mode<synchronous>, transform_indices = @transform_14, window_bounds = array<i64: 1, 32>}, {pipeline_mode = #tpu.pipeline_mode<synchronous>, transform_indices = @transform_15, window_bounds = array<i64: 32, 128>}, {pipeline_mode = #tpu.pipeline_mode<synchronous>, transform_indices = @transform_16, window_bounds = array<i64: 1, 128>}, {transform_indices = @transform_17, window_bounds = array<i64: 1, 1, 128>}]} {
    %c0 = arith.constant 0 : index
    %c0_0 = arith.constant 0 : index
    %c0_1 = arith.constant 0 : index
    %0 = vector.load %arg1[%c0, %c0_0, %c0_1] : memref<1x28x28xf32, #tpu.memory_space<vmem>>, vector<1x28x28xf32>
    %1 = vector.shape_cast %0 : vector<1x28x28xf32> to vector<28x28xf32>
    %2 = vector.extract_strided_slice %1 {offsets = [0, 0], sizes = [26, 28], strides = [1, 1]} : vector<28x28xf32> to vector<26x28xf32>
    %3 = vector.extract_strided_slice %1 {offsets = [1, 0], sizes = [26, 28], strides = [1, 1]} : vector<28x28xf32> to vector<26x28xf32>
    %4 = vector.extract_strided_slice %1 {offsets = [2, 0], sizes = [26, 28], strides = [1, 1]} : vector<28x28xf32> to vector<26x28xf32>
    %5 = tpu.concatenate %2, %3, %4 in 1 : vector<26x28xf32>, vector<26x28xf32>, vector<26x28xf32> -> vector<26x84xf32>
    %c0_2 = arith.constant 0 : index
    %c0_3 = arith.constant 0 : index
    %6 = vector.load %arg2[%c0_2, %c0_3] : memref<84x416xf32, #tpu.memory_space<vmem>>, vector<84x416xf32>
    %cst = arith.constant dense<0.000000e+00> : vector<26x416xf32>
    %7 = tpu.matmul %5, %6, %cst {dimension_numbers = #tpu.dot_dimension_numbers<[1], [0], [0], [1], [0, 0, 1, 1], [], []>} : vector<26x84xf32>, vector<84x416xf32>, vector<26x416xf32> -> vector<26x416xf32>
    %c0_4 = arith.constant 0 : index
    %c0_5 = arith.constant 0 : index
    %8 = vector.load %arg3[%c0_4, %c0_5] : memref<1x416xf32, #tpu.memory_space<vmem>>, vector<1x416xf32>
    %9 = vector.broadcast %8 : vector<1x416xf32> to vector<26x416xf32>
    %10 = arith.addf %7, %9 : vector<26x416xf32>
    %11 = vector.extract_strided_slice %10 {offsets = [0, 8], sizes = [26, 408], strides = [1, 1]} : vector<26x416xf32> to vector<26x408xf32>
    %12 = vector.extract_strided_slice %10 {offsets = [0, 0], sizes = [26, 8], strides = [1, 1]} : vector<26x416xf32> to vector<26x8xf32>
    %13 = tpu.concatenate %11, %12 in 1 : vector<26x408xf32>, vector<26x8xf32> -> vector<26x416xf32>
    %14 = tpu.iota {dimensions = array<i32: 1>} : vector<26x416xi32>
    %c15_i32 = arith.constant 15 : i32
    %15 = vector.broadcast %c15_i32 : i32 to vector<26x416xi32>
    %16 = arith.andi %14, %15 : vector<26x416xi32>
    %c8_i32 = arith.constant 8 : i32
    %17 = vector.broadcast %c8_i32 : i32 to vector<26x416xi32>
    %18 = arith.cmpi slt, %16, %17 : vector<26x416xi32>
    %19 = arith.mulf %10, %13 : vector<26x416xf32>
    %20 = arith.select %18, %19, %10 : vector<26x416xi1>, vector<26x416xf32>
    %21 = vector.extract_strided_slice %20 {offsets = [0, 16], sizes = [26, 400], strides = [1, 1]} : vector<26x416xf32> to vector<26x400xf32>
    %22 = vector.extract_strided_slice %20 {offsets = [0, 0], sizes = [26, 16], strides = [1, 1]} : vector<26x416xf32> to vector<26x16xf32>
    %23 = tpu.concatenate %21, %22 in 1 : vector<26x400xf32>, vector<26x16xf32> -> vector<26x416xf32>
    %24 = arith.maximumf %20, %23 : vector<26x416xf32>
    %25 = vector.extract_strided_slice %24 {offsets = [0, 0], sizes = [25, 416], strides = [1, 1]} : vector<26x416xf32> to vector<25x416xf32>
    %26 = vector.extract_strided_slice %24 {offsets = [1, 0], sizes = [25, 416], strides = [1, 1]} : vector<26x416xf32> to vector<25x416xf32>
    %27 = arith.maximumf %25, %26 : vector<25x416xf32>
    %c0_6 = arith.constant 0 : index
    %c0_7 = arith.constant 0 : index
    %28 = vector.load %arg4[%c0_6, %c0_7] : memref<13x25xf32, #tpu.memory_space<vmem>>, vector<13x25xf32>
    %cst_8 = arith.constant dense<0.000000e+00> : vector<13x416xf32>
    %29 = tpu.matmul %28, %27, %cst_8 {dimension_numbers = #tpu.dot_dimension_numbers<[1], [0], [0], [1], [0, 0, 1, 1], [], []>} : vector<13x25xf32>, vector<25x416xf32>, vector<13x416xf32> -> vector<13x416xf32>
    %c0_9 = arith.constant 0 : index
    %c0_10 = arith.constant 0 : index
    %30 = vector.load %arg5[%c0_9, %c0_10] : memref<416x208xf32, #tpu.memory_space<vmem>>, vector<416x208xf32>
    %cst_11 = arith.constant dense<0.000000e+00> : vector<13x208xf32>
    %31 = tpu.matmul %29, %30, %cst_11 {dimension_numbers = #tpu.dot_dimension_numbers<[1], [0], [0], [1], [0, 0, 1, 1], [], []>} : vector<13x416xf32>, vector<416x208xf32>, vector<13x208xf32> -> vector<13x208xf32>
    %cst_12 = arith.constant 0.000000e+00 : f32
    %32 = vector.broadcast %cst_12 : f32 to vector<13x208xf32>
    %33 = arith.maximumf %31, %32 : vector<13x208xf32>
    %34 = vector.extract_strided_slice %33 {offsets = [0, 0], sizes = [11, 208], strides = [1, 1]} : vector<13x208xf32> to vector<11x208xf32>
    %35 = vector.extract_strided_slice %33 {offsets = [1, 0], sizes = [11, 208], strides = [1, 1]} : vector<13x208xf32> to vector<11x208xf32>
    %36 = vector.extract_strided_slice %33 {offsets = [2, 0], sizes = [11, 208], strides = [1, 1]} : vector<13x208xf32> to vector<11x208xf32>
    %37 = tpu.concatenate %34, %35, %36 in 1 : vector<11x208xf32>, vector<11x208xf32>, vector<11x208xf32> -> vector<11x624xf32>
    %c0_13 = arith.constant 0 : index
    %c0_14 = arith.constant 0 : index
    %38 = vector.load %arg6[%c0_13, %c0_14] : memref<624x352xf32, #tpu.memory_space<vmem>>, vector<624x352xf32>
    %cst_15 = arith.constant dense<0.000000e+00> : vector<11x352xf32>
    %39 = tpu.matmul %37, %38, %cst_15 {dimension_numbers = #tpu.dot_dimension_numbers<[1], [0], [0], [1], [0, 0, 1, 1], [], []>} : vector<11x624xf32>, vector<624x352xf32>, vector<11x352xf32> -> vector<11x352xf32>
    %c0_16 = arith.constant 0 : index
    %c0_17 = arith.constant 0 : index
    %40 = vector.load %arg7[%c0_16, %c0_17] : memref<1x352xf32, #tpu.memory_space<vmem>>, vector<1x352xf32>
    %41 = vector.broadcast %40 : vector<1x352xf32> to vector<11x352xf32>
    %42 = arith.addf %39, %41 : vector<11x352xf32>
    %43 = vector.extract_strided_slice %42 {offsets = [0, 16], sizes = [11, 336], strides = [1, 1]} : vector<11x352xf32> to vector<11x336xf32>
    %44 = vector.extract_strided_slice %42 {offsets = [0, 0], sizes = [11, 16], strides = [1, 1]} : vector<11x352xf32> to vector<11x16xf32>
    %45 = tpu.concatenate %43, %44 in 1 : vector<11x336xf32>, vector<11x16xf32> -> vector<11x352xf32>
    %46 = tpu.iota {dimensions = array<i32: 1>} : vector<11x352xi32>
    %c31_i32 = arith.constant 31 : i32
    %47 = vector.broadcast %c31_i32 : i32 to vector<11x352xi32>
    %48 = arith.andi %46, %47 : vector<11x352xi32>
    %c16_i32 = arith.constant 16 : i32
    %49 = vector.broadcast %c16_i32 : i32 to vector<11x352xi32>
    %50 = arith.cmpi slt, %48, %49 : vector<11x352xi32>
    %51 = arith.mulf %42, %45 : vector<11x352xf32>
    %52 = arith.select %50, %51, %42 : vector<11x352xi1>, vector<11x352xf32>
    %53 = vector.extract_strided_slice %52 {offsets = [0, 32], sizes = [11, 320], strides = [1, 1]} : vector<11x352xf32> to vector<11x320xf32>
    %54 = vector.extract_strided_slice %52 {offsets = [0, 0], sizes = [11, 32], strides = [1, 1]} : vector<11x352xf32> to vector<11x32xf32>
    %55 = tpu.concatenate %53, %54 in 1 : vector<11x320xf32>, vector<11x32xf32> -> vector<11x352xf32>
    %56 = arith.maximumf %52, %55 : vector<11x352xf32>
    %57 = vector.extract_strided_slice %56 {offsets = [0, 0], sizes = [10, 352], strides = [1, 1]} : vector<11x352xf32> to vector<10x352xf32>
    %58 = vector.extract_strided_slice %56 {offsets = [1, 0], sizes = [10, 352], strides = [1, 1]} : vector<11x352xf32> to vector<10x352xf32>
    %59 = arith.maximumf %57, %58 : vector<10x352xf32>
    %c0_18 = arith.constant 0 : index
    %c0_19 = arith.constant 0 : index
    %60 = vector.load %arg8[%c0_18, %c0_19] : memref<5x10xf32, #tpu.memory_space<vmem>>, vector<5x10xf32>
    %cst_20 = arith.constant dense<0.000000e+00> : vector<5x352xf32>
    %61 = tpu.matmul %60, %59, %cst_20 {dimension_numbers = #tpu.dot_dimension_numbers<[1], [0], [0], [1], [0, 0, 1, 1], [], []>} : vector<5x10xf32>, vector<10x352xf32>, vector<5x352xf32> -> vector<5x352xf32>
    %c0_21 = arith.constant 0 : index
    %c0_22 = arith.constant 0 : index
    %62 = vector.load %arg9[%c0_21, %c0_22] : memref<352x160xf32, #tpu.memory_space<vmem>>, vector<352x160xf32>
    %cst_23 = arith.constant dense<0.000000e+00> : vector<5x160xf32>
    %63 = tpu.matmul %61, %62, %cst_23 {dimension_numbers = #tpu.dot_dimension_numbers<[1], [0], [0], [1], [0, 0, 1, 1], [], []>} : vector<5x352xf32>, vector<352x160xf32>, vector<5x160xf32> -> vector<5x160xf32>
    %cst_24 = arith.constant 0.000000e+00 : f32
    %64 = vector.broadcast %cst_24 : f32 to vector<5x160xf32>
    %65 = arith.maximumf %63, %64 : vector<5x160xf32>
    %66 = vector.extract_strided_slice %65 {offsets = [0, 0], sizes = [3, 160], strides = [1, 1]} : vector<5x160xf32> to vector<3x160xf32>
    %67 = vector.extract_strided_slice %65 {offsets = [1, 0], sizes = [3, 160], strides = [1, 1]} : vector<5x160xf32> to vector<3x160xf32>
    %68 = vector.extract_strided_slice %65 {offsets = [2, 0], sizes = [3, 160], strides = [1, 1]} : vector<5x160xf32> to vector<3x160xf32>
    %69 = tpu.concatenate %66, %67, %68 in 1 : vector<3x160xf32>, vector<3x160xf32>, vector<3x160xf32> -> vector<3x480xf32>
    %c0_25 = arith.constant 0 : index
    %c0_26 = arith.constant 0 : index
    %70 = vector.load %arg10[%c0_25, %c0_26] : memref<480x192xf32, #tpu.memory_space<vmem>>, vector<480x192xf32>
    %cst_27 = arith.constant dense<0.000000e+00> : vector<3x192xf32>
    %71 = tpu.matmul %69, %70, %cst_27 {dimension_numbers = #tpu.dot_dimension_numbers<[1], [0], [0], [1], [0, 0, 1, 1], [], []>} : vector<3x480xf32>, vector<480x192xf32>, vector<3x192xf32> -> vector<3x192xf32>
    %c0_28 = arith.constant 0 : index
    %c0_29 = arith.constant 0 : index
    %72 = vector.load %arg11[%c0_28, %c0_29] : memref<1x192xf32, #tpu.memory_space<vmem>>, vector<1x192xf32>
    %73 = vector.broadcast %72 : vector<1x192xf32> to vector<3x192xf32>
    %74 = arith.addf %71, %73 : vector<3x192xf32>
    %75 = vector.extract_strided_slice %74 {offsets = [0, 32], sizes = [3, 160], strides = [1, 1]} : vector<3x192xf32> to vector<3x160xf32>
    %76 = vector.extract_strided_slice %74 {offsets = [0, 0], sizes = [3, 32], strides = [1, 1]} : vector<3x192xf32> to vector<3x32xf32>
    %77 = tpu.concatenate %75, %76 in 1 : vector<3x160xf32>, vector<3x32xf32> -> vector<3x192xf32>
    %78 = tpu.iota {dimensions = array<i32: 1>} : vector<3x192xi32>
    %c63_i32 = arith.constant 63 : i32
    %79 = vector.broadcast %c63_i32 : i32 to vector<3x192xi32>
    %80 = arith.andi %78, %79 : vector<3x192xi32>
    %c32_i32 = arith.constant 32 : i32
    %81 = vector.broadcast %c32_i32 : i32 to vector<3x192xi32>
    %82 = arith.cmpi slt, %80, %81 : vector<3x192xi32>
    %83 = arith.mulf %74, %77 : vector<3x192xf32>
    %84 = arith.select %82, %83, %74 : vector<3x192xi1>, vector<3x192xf32>
    %85 = vector.extract_strided_slice %84 {offsets = [0, 64], sizes = [3, 128], strides = [1, 1]} : vector<3x192xf32> to vector<3x128xf32>
    %86 = vector.extract_strided_slice %84 {offsets = [0, 0], sizes = [3, 64], strides = [1, 1]} : vector<3x192xf32> to vector<3x64xf32>
    %87 = tpu.concatenate %85, %86 in 1 : vector<3x128xf32>, vector<3x64xf32> -> vector<3x192xf32>
    %88 = arith.maximumf %84, %87 : vector<3x192xf32>
    %89 = vector.extract_strided_slice %84 {offsets = [0, 128], sizes = [3, 64], strides = [1, 1]} : vector<3x192xf32> to vector<3x64xf32>
    %90 = vector.extract_strided_slice %84 {offsets = [0, 0], sizes = [3, 128], strides = [1, 1]} : vector<3x192xf32> to vector<3x128xf32>
    %91 = tpu.concatenate %89, %90 in 1 : vector<3x64xf32>, vector<3x128xf32> -> vector<3x192xf32>
    %92 = arith.maximumf %88, %91 : vector<3x192xf32>
    %93 = vector.extract_strided_slice %92 {offsets = [0, 0], sizes = [1, 192], strides = [1, 1]} : vector<3x192xf32> to vector<1x192xf32>
    %94 = vector.extract_strided_slice %92 {offsets = [1, 0], sizes = [1, 192], strides = [1, 1]} : vector<3x192xf32> to vector<1x192xf32>
    %95 = arith.maximumf %93, %94 : vector<1x192xf32>
    %96 = vector.extract_strided_slice %92 {offsets = [2, 0], sizes = [1, 192], strides = [1, 1]} : vector<3x192xf32> to vector<1x192xf32>
    %97 = arith.maximumf %95, %96 : vector<1x192xf32>
    %c0_30 = arith.constant 0 : index
    %c0_31 = arith.constant 0 : index
    %98 = vector.load %arg12[%c0_30, %c0_31] : memref<1x1xf32, #tpu.memory_space<vmem>>, vector<1x1xf32>
    %cst_32 = arith.constant dense<0.000000e+00> : vector<1x192xf32>
    %99 = tpu.matmul %98, %97, %cst_32 {dimension_numbers = #tpu.dot_dimension_numbers<[1], [0], [0], [1], [0, 0, 1, 1], [], []>} : vector<1x1xf32>, vector<1x192xf32>, vector<1x192xf32> -> vector<1x192xf32>
    %c0_33 = arith.constant 0 : index
    %c0_34 = arith.constant 0 : index
    %100 = vector.load %arg13[%c0_33, %c0_34] : memref<192x64xf32, #tpu.memory_space<vmem>>, vector<192x64xf32>
    %cst_35 = arith.constant dense<0.000000e+00> : vector<1x64xf32>
    %101 = tpu.matmul %99, %100, %cst_35 {dimension_numbers = #tpu.dot_dimension_numbers<[1], [0], [0], [1], [0, 0, 1, 1], [], []>} : vector<1x192xf32>, vector<192x64xf32>, vector<1x64xf32> -> vector<1x64xf32>
    %cst_36 = arith.constant 0.000000e+00 : f32
    %102 = vector.broadcast %cst_36 : f32 to vector<1x64xf32>
    %103 = arith.maximumf %101, %102 : vector<1x64xf32>
    %c0_37 = arith.constant 0 : index
    %c0_38 = arith.constant 0 : index
    %104 = vector.load %arg14[%c0_37, %c0_38] : memref<64x32xf32, #tpu.memory_space<vmem>>, vector<64x32xf32>
    %cst_39 = arith.constant dense<0.000000e+00> : vector<1x32xf32>
    %105 = tpu.matmul %103, %104, %cst_39 {dimension_numbers = #tpu.dot_dimension_numbers<[1], [0], [0], [1], [0, 0, 1, 1], [], []>} : vector<1x64xf32>, vector<64x32xf32>, vector<1x32xf32> -> vector<1x32xf32>
    %c0_40 = arith.constant 0 : index
    %c0_41 = arith.constant 0 : index
    %106 = vector.load %arg15[%c0_40, %c0_41] : memref<1x32xf32, #tpu.memory_space<vmem>>, vector<1x32xf32>
    %107 = arith.addf %105, %106 : vector<1x32xf32>
    %108 = vector.extract_strided_slice %107 {offsets = [0, 16], sizes = [1, 16], strides = [1, 1]} : vector<1x32xf32> to vector<1x16xf32>
    %109 = vector.extract_strided_slice %107 {offsets = [0, 0], sizes = [1, 16], strides = [1, 1]} : vector<1x32xf32> to vector<1x16xf32>
    %110 = tpu.concatenate %108, %109 in 1 : vector<1x16xf32>, vector<1x16xf32> -> vector<1x32xf32>
    %111 = tpu.iota {dimensions = array<i32: 1>} : vector<1x32xi32>
    %c16_i32_42 = arith.constant 16 : i32
    %112 = vector.broadcast %c16_i32_42 : i32 to vector<1x32xi32>
    %113 = arith.cmpi slt, %111, %112 : vector<1x32xi32>
    %114 = arith.mulf %107, %110 : vector<1x32xf32>
    %115 = arith.select %113, %114, %107 : vector<1x32xi1>, vector<1x32xf32>
    %cst_43 = arith.constant 0.000000e+00 : f32
    %116 = vector.broadcast %cst_43 : f32 to vector<1x32xf32>
    %117 = arith.cmpf oge, %115, %116 : vector<1x32xf32>
    %cst_44 = arith.constant 1.000000e-01 : f32
    %118 = vector.broadcast %cst_44 : f32 to vector<1x32xf32>
    %119 = arith.mulf %118, %115 : vector<1x32xf32>
    %120 = arith.select %117, %115, %119 : vector<1x32xi1>, vector<1x32xf32>
    %c0_45 = arith.constant 0 : index
    %c0_46 = arith.constant 0 : index
    %121 = vector.load %arg16[%c0_45, %c0_46] : memref<32x128xf32, #tpu.memory_space<vmem>>, vector<32x128xf32>
    %cst_47 = arith.constant dense<0.000000e+00> : vector<1x128xf32>
    %122 = tpu.matmul %120, %121, %cst_47 {dimension_numbers = #tpu.dot_dimension_numbers<[1], [0], [0], [1], [0, 0, 1, 1], [], []>} : vector<1x32xf32>, vector<32x128xf32>, vector<1x128xf32> -> vector<1x128xf32>
    %c0_48 = arith.constant 0 : index
    %c0_49 = arith.constant 0 : index
    %123 = vector.load %arg17[%c0_48, %c0_49] : memref<1x128xf32, #tpu.memory_space<vmem>>, vector<1x128xf32>
    %124 = arith.addf %122, %123 : vector<1x128xf32>
    %cst_50 = arith.constant dense<0xFF800000> : vector<1xf32>
    %125 = vector.multi_reduction <maximumf>, %124, %cst_50 [1] : vector<1x128xf32> to vector<1xf32>
    %126 = vector.shape_cast %125 : vector<1xf32> to vector<1x1xf32>
    %127 = vector.broadcast %126 : vector<1x1xf32> to vector<1x128xf32>
    %128 = arith.subf %124, %127 : vector<1x128xf32>
    %129 = math.exp %128 : vector<1x128xf32>
    %cst_51 = arith.constant dense<0.000000e+00> : vector<1xf32>
    %130 = vector.multi_reduction <add>, %129, %cst_51 [1] : vector<1x128xf32> to vector<1xf32>
    %131 = vector.shape_cast %130 : vector<1xf32> to vector<1x1xf32>
    %132 = tpu.reciprocal %131 {approx = true} : vector<1x1xf32> -> vector<1x1xf32>
    %133 = vector.broadcast %132 : vector<1x1xf32> to vector<1x128xf32>
    %134 = arith.mulf %129, %133 : vector<1x128xf32>
    %c0_52 = arith.constant 0 : index
    %c0_53 = arith.constant 0 : index
    %c0_54 = arith.constant 0 : index
    %135 = vector.load %arg18[%c0_52, %c0_53, %c0_54] : memref<1x1x128xf32, #tpu.memory_space<vmem>>, vector<1x1x128xf32>
    %136 = vector.shape_cast %135 : vector<1x1x128xf32> to vector<1x128xf32>
    %137 = vector.shape_cast %134 : vector<1x128xf32> to vector<1x1x128xf32>
    tpu.vector_store %arg18[%c0_52, %c0_53, %c0_54], %137 {strides = array<i32>} : memref<1x1x128xf32, #tpu.memory_space<vmem>>, vector<1x1x128xf32>,
    return
  }
  func.func @transform_0(%arg0: i32) -> (i32, i32, i32) {
    %c0_i32 = arith.constant 0 : i32
    %c0_i32_0 = arith.constant 0 : i32
    %c0_i32_1 = arith.constant 0 : i32
    return %arg0, %c0_i32, %c0_i32_0 : i32, i32, i32
  }
  func.func @transform_1(%arg0: i32) -> (i32, i32) {
    %c0_i32 = arith.constant 0 : i32
    %c0_i32_0 = arith.constant 0 : i32
    %c0_i32_1 = arith.constant 0 : i32
    return %c0_i32, %c0_i32_0 : i32, i32
  }
  func.func @transform_2(%arg0: i32) -> (i32, i32) {
    %c0_i32 = arith.constant 0 : i32
    %c0_i32_0 = arith.constant 0 : i32
    %c0_i32_1 = arith.constant 0 : i32
    return %c0_i32, %c0_i32_0 : i32, i32
  }
  func.func @transform_3(%arg0: i32) -> (i32, i32) {
    %c0_i32 = arith.constant 0 : i32
    %c0_i32_0 = arith.constant 0 : i32
    %c0_i32_1 = arith.constant 0 : i32
    return %c0_i32, %c0_i32_0 : i32, i32
  }
  func.func @transform_4(%arg0: i32) -> (i32, i32) {
    %c0_i32 = arith.constant 0 : i32
    %c0_i32_0 = arith.constant 0 : i32
    %c0_i32_1 = arith.constant 0 : i32
    return %c0_i32, %c0_i32_0 : i32, i32
  }
  func.func @transform_5(%arg0: i32) -> (i32, i32) {
    %c0_i32 = arith.constant 0 : i32
    %c0_i32_0 = arith.constant 0 : i32
    %c0_i32_1 = arith.constant 0 : i32
    return %c0_i32, %c0_i32_0 : i32, i32
  }
  func.func @transform_6(%arg0: i32) -> (i32, i32) {
    %c0_i32 = arith.constant 0 : i32
    %c0_i32_0 = arith.constant 0 : i32
    %c0_i32_1 = arith.constant 0 : i32
    return %c0_i32, %c0_i32_0 : i32, i32
  }
  func.func @transform_7(%arg0: i32) -> (i32, i32) {
    %c0_i32 = arith.constant 0 : i32
    %c0_i32_0 = arith.constant 0 : i32
    %c0_i32_1 = arith.constant 0 : i32
    return %c0_i32, %c0_i32_0 : i32, i32
  }
  func.func @transform_8(%arg0: i32) -> (i32, i32) {
    %c0_i32 = arith.constant 0 : i32
    %c0_i32_0 = arith.constant 0 : i32
    %c0_i32_1 = arith.constant 0 : i32
    return %c0_i32, %c0_i32_0 : i32, i32
  }
  func.func @transform_9(%arg0: i32) -> (i32, i32) {
    %c0_i32 = arith.constant 0 : i32
    %c0_i32_0 = arith.constant 0 : i32
    %c0_i32_1 = arith.constant 0 : i32
    return %c0_i32, %c0_i32_0 : i32, i32
  }
  func.func @transform_10(%arg0: i32) -> (i32, i32) {
    %c0_i32 = arith.constant 0 : i32
    %c0_i32_0 = arith.constant 0 : i32
    %c0_i32_1 = arith.constant 0 : i32
    return %c0_i32, %c0_i32_0 : i32, i32
  }
  func.func @transform_11(%arg0: i32) -> (i32, i32) {
    %c0_i32 = arith.constant 0 : i32
    %c0_i32_0 = arith.constant 0 : i32
    %c0_i32_1 = arith.constant 0 : i32
    return %c0_i32, %c0_i32_0 : i32, i32
  }
  func.func @transform_12(%arg0: i32) -> (i32, i32) {
    %c0_i32 = arith.constant 0 : i32
    %c0_i32_0 = arith.constant 0 : i32
    %c0_i32_1 = arith.constant 0 : i32
    return %c0_i32, %c0_i32_0 : i32, i32
  }
  func.func @transform_13(%arg0: i32) -> (i32, i32) {
    %c0_i32 = arith.constant 0 : i32
    %c0_i32_0 = arith.constant 0 : i32
    %c0_i32_1 = arith.constant 0 : i32
    return %c0_i32, %c0_i32_0 : i32, i32
  }
  func.func @transform_14(%arg0: i32) -> (i32, i32) {
    %c0_i32 = arith.constant 0 : i32
    %c0_i32_0 = arith.constant 0 : i32
    %c0_i32_1 = arith.constant 0 : i32
    return %c0_i32, %c0_i32_0 : i32, i32
  }
  func.func @transform_15(%arg0: i32) -> (i32, i32) {
    %c0_i32 = arith.constant 0 : i32
    %c0_i32_0 = arith.constant 0 : i32
    %c0_i32_1 = arith.constant 0 : i32
    return %c0_i32, %c0_i32_0 : i32, i32
  }
  func.func @transform_16(%arg0: i32) -> (i32, i32) {
    %c0_i32 = arith.constant 0 : i32
    %c0_i32_0 = arith.constant 0 : i32
    %c0_i32_1 = arith.constant 0 : i32
    return %c0_i32, %c0_i32_0 : i32, i32
  }
  func.func @transform_17(%arg0: i32) -> (i32, i32, i32) {
    %c0_i32 = arith.constant 0 : i32
    %c0_i32_0 = arith.constant 0 : i32
    %c0_i32_1 = arith.constant 0 : i32
    return %arg0, %c0_i32, %c0_i32_0 : i32, i32, i32
  }
}

</mosaic_0001>

<bundles_post_ra>
// kernel: tile.18
= control target key start
LH: loop header
LB: loop body
LE: loop exit
PB: predicated region body
PF: predicated region fallthrough
CT: control target
= control target key end

     0   :  { %s40_s0 = inlined_call_operand.vmem [shape: f32[16], index: 0, kind: input, shape index: {}]   ;;  %s41_s1 = inlined_call_operand.vmem [shape: f32[26,16], index: 1, kind: output, shape index: {}]  }
   0x1   :  { %v4_v0 = vld [vmem:[%s40_s0] ss:$0 sm:$0xff] }
   0x2   :  { %5 = vst [vmem:[%s41_s1] sm:$0xff] %v4_v0  ;;  %12 = vst [vmem:[%s41_s1 + $0x8] sm:$0xff] %v4_v0 }
   0x3   :  { %13 = vst [vmem:[%s41_s1 + $0x10] sm:$0xff] %v4_v0  ;;  %14 = vst [vmem:[%s41_s1 + $0x18] sm:$0xff] %v4_v0 }

// kernel: tile.19
= control target key start
LH: loop header
LB: loop body
LE: loop exit
PB: predicated region body
PF: predicated region fallthrough
CT: control target
= control target key end

     0   :  { %s89_s8 = smov 112   ;;  %s90_s11 = smov 80   ;;  %vm3_vm0 = vcmask 130048   ;;  %vm9_vm1 = vcmask 1048448   ;;  %vm15_vm2 = vcmask 917248   ;;  %vm21_vm3 = vcmask 786048   ;;  %s142_s0 = inlined_call_operand.vmem [shape: f32[26,16], index: 0, kind: input, shape index: {}]   ;;  %s143_s1 = inlined_call_operand.vmem [shape: f32[1,416], index: 1, kind: output, shape index: {}]  }
   0x1   :  { %v72_v0 = vld [vmem:[%s142_s0 + $0x7] ss:$8 sm:$0x7]   ;;  %v74_v1 = vld [vmem:[%s142_s0 + $0x5] ss:$8 sm:$0x7]  }
   0x2   :  { %7 = vrot.lane.b32.xlu0 %v72_v0, %s89_s8  ;;  %19 = vrot.lane.b32.xlu1 %v74_v1, %s90_s11  ;;  %v73_v2 = vld [vmem:[%s142_s0 + $0x6] ss:$8 sm:$0x7]   ;;  %v75_v3 = vld [vmem:[%s142_s0 + $0x4] ss:$8 sm:$0x7]  }
   0x3   :  { %s91_s16 = smov 96   ;;  %v2_v4 = vld [vmem:[%s142_s0] ss:$8 sm:$0xf]   ;;  %s92_s19 = smov 64   ;;  %vm27_vm4 = vcmask 654848  }
   0x4   :  { %v76_v5 = vld [vmem:[%s142_s0 + $0x3] ss:$8 sm:$0x7]   ;;  %4 = vst.msk [vmem:[#allocation0] ss:$8 sm:$0xf] %vm3_vm0, %v2_v4  }
   0x5   :  { %v77_v6 = vld [vmem:[%s142_s0 + $0x2] ss:$8 sm:$0x7]   ;;  %s93_s24 = smov 48   ;;  %s94_s25 = smov 32   ;;  %vm33_vm5 = vcmask 523648  }
   0x6   :  { %13 = vrot.lane.b32.xlu0 %v73_v2, %s91_s16  ;;  %25 = vrot.lane.b32.xlu1 %v75_v3, %s92_s19  ;;  %v78_v7 = vld [vmem:[%s142_s0 + $0x1] ss:$8 sm:$0xf]   ;;  %s95_s0 = smov 16   ;;  %vm39_vm6 = vcmask 392448   ;;  %vm45_vm7 = vcmask 261248  }
   0xa   :  { %31 = vrot.lane.b32.xlu0 %v76_v5, %s93_s24  ;;  %37 = vrot.lane.b32.xlu1 %v77_v6, %s94_s25 }
   0xe   :  { %43 = vrot.lane.b32.xlu0 %v78_v7, %s95_s0 }
  0x74   :  { %v8_v8 = vpop.permute.xlu0 %7   ;;  %v20_v9 = vpop.permute.xlu1 %19  }
  0x75   :  { %10 = vst.msk [vmem:[#allocation0] ss:$8 sm:$0x7] %vm9_vm1, %v8_v8  }
  0x78   :  { %v14_v10 = vpop.permute.xlu0 %13   ;;  %v26_v11 = vpop.permute.xlu1 %25  }
  0x79   :  { %16 = vst.msk [vmem:[#allocation0] ss:$8 sm:$0x7] %vm15_vm2, %v14_v10  }
  0x7a   :  { %22 = vst.msk [vmem:[#allocation0] ss:$8 sm:$0x7] %vm21_vm3, %v20_v9  }
  0x7b   :  { %28 = vst.msk [vmem:[#allocation0] ss:$8 sm:$0x7] %vm27_vm4, %v26_v11  }
  0x7c   :  { %v32_v12 = vpop.permute.xlu0 %31   ;;  %v38_v13 = vpop.permute.xlu1 %37  }
  0x7d   :  { %34 = vst.msk [vmem:[#allocation0] ss:$8 sm:$0x7] %vm33_vm5, %v32_v12  }
  0x7e   :  { %40 = vst.msk [vmem:[#allocation0] ss:$8 sm:$0x7] %vm39_vm6, %v38_v13  }
  0x80   :  { %v44_v14 = vpop.permute.xlu0 %43  }
  0x81   :  { %46 = vst.msk [vmem:[#allocation0] ss:$8 sm:$0xf] %vm45_vm7, %v44_v14  }
  0x88   :  { %v50_v15 = vld [vmem:[#allocation0] sm:$0x1]  ;;  %v54_v16 = vld [vmem:[#allocation0 + $0x8] sm:$0x1]  ;;  %v59_v17 = vld [vmem:[#allocation0 + $0x10] sm:$0x1] }
  0x89   :  { %52 = vst [vmem:[%s143_s1] sm:$0x1] %v50_v15  ;;  %79 = vst [vmem:[%s143_s1 + $0x1] sm:$0x1] %v54_v16  ;;  %v65_v18 = vld [vmem:[#allocation0 + $0x18] sm:$0x1] }
  0x8a   :  { %80 = vst [vmem:[%s143_s1 + $0x2] sm:$0x1] %v59_v17  ;;  %81 = vst [vmem:[%s143_s1 + $0x3] sm:$0x1] %v65_v18 }

// kernel: tile.23
= control target key start
LH: loop header
LB: loop body
LE: loop exit
PB: predicated region body
PF: predicated region fallthrough
CT: control target
= control target key end

     0   :  { %s28_s0 = inlined_call_operand.vmem [shape: f32[32], index: 0, kind: input, shape index: {}]   ;;  %s29_s1 = inlined_call_operand.vmem [shape: f32[11,32], index: 1, kind: output, shape index: {}]  }
   0x1   :  { %v4_v0 = vld [vmem:[%s28_s0] ss:$0 sm:$0xff] }
   0x2   :  { %5 = vst [vmem:[%s29_s1] sm:$0xff] %v4_v0  ;;  %8 = vst [vmem:[%s29_s1 + $0x8] sm:$0xff] %v4_v0 }

// kernel: tile.24
= control target key start
LH: loop header
LB: loop body
LE: loop exit
PB: predicated region body
PF: predicated region fallthrough
CT: control target
= control target key end

     0   :  { %s6_s6 = smov 3  ;;  %s50_s11 = smov 96   ;;  %vm3_vm0 = vcmask 261120   ;;  %vm10_vm1 = vcmask 1048320   ;;  %vm16_vm2 = vcmask 785920   ;;  %vm22_vm3 = vcmask 523520   ;;  %s84_s0 = inlined_call_operand.vmem [shape: f32[11,32], index: 0, kind: input, shape index: {}]   ;;  %s85_s1 = inlined_call_operand.vmem [shape: f32[1,352], index: 1, kind: output, shape index: {}]  }
   0x1   :  { %v42_v0 = vld [vmem:[%s84_s0 + $0x3] ss:$4 sm:%s6_s6]   ;;  %v44_v1 = vld [vmem:[%s84_s0 + $0x1] ss:$4 sm:$0x7]   ;;  %s52_s16 = smov 64  }
   0x2   :  { %8 = vrot.lane.b32.xlu0 %v42_v0, %s50_s11  ;;  %v2_v2 = vld [vmem:[%s84_s0] ss:$4 sm:$0x7]   ;;  %v43_v3 = vld [vmem:[%s84_s0 + $0x2] ss:$4 sm:$0x7]  }
   0x3   :  { %s51_s0 = smov 32   ;;  %4 = vst.msk [vmem:[#allocation0] ss:$8 sm:$0x7] %vm3_vm0, %v2_v2  }
   0x4   :  { %20 = vrot.lane.b32.xlu1 %v44_v1, %s51_s0 }
   0x6   :  { %14 = vrot.lane.b32.xlu0 %v43_v3, %s52_s16 }
  0x74   :  { %v9_v4 = vpop.permute.xlu0 %8  }
  0x75   :  { %11 = vst.msk [vmem:[#allocation0] ss:$8 sm:$0x3] %vm10_vm1, %v9_v4  }
  0x76   :  { %v21_v5 = vpop.permute.xlu1 %20  }
  0x78   :  { %v15_v6 = vpop.permute.xlu0 %14  }
  0x79   :  { %17 = vst.msk [vmem:[#allocation0] ss:$8 sm:$0x7] %vm16_vm2, %v15_v6  }
  0x7a   :  { %23 = vst.msk [vmem:[#allocation0] ss:$8 sm:$0x7] %vm22_vm3, %v21_v5  }
  0x81   :  { %v27_v7 = vld [vmem:[#allocation0] sm:$0x1]  ;;  %v31_v8 = vld [vmem:[#allocation0 + $0x8] sm:$0x1]  ;;  %v36_v9 = vld [vmem:[#allocation0 + $0x10] sm:$0x1] }
  0x82   :  { %29 = vst [vmem:[%s85_s1] sm:$0x1] %v27_v7  ;;  %45 = vst [vmem:[%s85_s1 + $0x1] sm:$0x1] %v31_v8 }
  0x83   :  { %46 = vst [vmem:[%s85_s1 + $0x2] sm:$0x1] %v36_v9 }

// kernel: tile.28
= control target key start
LH: loop header
LB: loop body
LE: loop exit
PB: predicated region body
PF: predicated region fallthrough
CT: control target
= control target key end

     0   :  { %s22_s0 = inlined_call_operand.vmem [shape: f32[64], index: 0, kind: input, shape index: {}]   ;;  %s23_s1 = inlined_call_operand.vmem [shape: f32[3,64], index: 1, kind: output, shape index: {}]  }
   0x1   :  { %v4_v0 = vld [vmem:[%s22_s0] ss:$0 sm:$0xff] }
   0x2   :  { %5 = vst [vmem:[%s23_s1] sm:$0xf] %v4_v0 }

// kernel: tile.29
= control target key start
LH: loop header
LB: loop body
LE: loop exit
PB: predicated region body
PF: predicated region fallthrough
CT: control target
= control target key end

     0   :  { %vm8_vm0 = vcmask 523264   ;;  %s29_s8 = smov 64   ;;  %vm14_vm1 = vcmask 1048064   ;;  %s49_s0 = inlined_call_operand.vmem [shape: f32[3,64], index: 0, kind: input, shape index: {}]   ;;  %s50_s1 = inlined_call_operand.vmem [shape: f32[1,192], index: 1, kind: output, shape index: {}]  }
   0x1   :  { %v4_v0 = vld [vmem:[%s49_s0] sm:$0xf]  ;;  %s6_s0 = smov 3 }
   0x2   :  { %5 = vst [vmem:[#allocation1] sm:$0xf] %v4_v0 }
   0x9   :  { %v11_v1 = vld [vmem:[#allocation1 + $0x1] sm:$0x1]   ;;  %v7_v2 = vld [vmem:[#allocation1] ss:$2 sm:%s6_s0]  }
   0xa   :  { %12 = vrot.lane.b32.xlu0 %v11_v1, %s29_s8  ;;  %9 = vst.msk [vmem:[#allocation0] ss:$8 sm:$0x3] %vm8_vm0, %v7_v2  }
  0x11   :  { %v23_v3 = vld [vmem:[#allocation0 + $0x8] sm:$0x1] }
  0x12   :  { %27 = vst [vmem:[%s50_s1 + $0x1] sm:$0x1] %v23_v3 }
  0x7c   :  { %v13_v4 = vpop.permute.xlu0 %12  }
  0x7d   :  { %15 = vst.msk [vmem:[#allocation0] sm:$0x1] %vm14_vm1, %v13_v4  }
  0x84   :  { %v19_v5 = vld [vmem:[#allocation0] sm:$0x1] }
  0x85   :  { %21 = vst [vmem:[%s50_s1] sm:$0x1] %v19_v5 }

// kernel: cnn_forward.1
= control target key start
LH: loop header
LB: loop body
LE: loop exit
PB: predicated region body
PF: predicated region fallthrough
CT: control target
= control target key end

     0   :  { %s7528_s0 = inlined_call_operand.vmem [shape: f32[2,28,28], index: 0, kind: input, shape index: {}]   ;;  %s7529_s1 = inlined_call_operand.vmem [shape: f32[84,416], index: 1, kind: input, shape index: {}]   ;;  %s7530_s2 = inlined_call_operand.vmem [shape: f32[1,416], index: 2, kind: input, shape index: {}]   ;;  %s7531_s3 = inlined_call_operand.vmem [shape: f32[13,25], index: 3, kind: input, shape index: {}]   ;;  %s7532_s4 = inlined_call_operand.vmem [shape: f32[416,208], index: 4, kind: input, shape index: {}]   ;;  %s7533_s5 = inlined_call_operand.vmem [shape: f32[624,352], index: 5, kind: input, shape index: {}]   ;;  %s7534_s6 = inlined_call_operand.vmem [shape: f32[1,352], index: 6, kind: input, shape index: {}]   ;;  %s7535_s7 = inlined_call_operand.vmem [shape: f32[5,10], index: 7, kind: input, shape index: {}]   ;;  %s7536_s8 = inlined_call_operand.vmem [shape: f32[352,160], index: 8, kind: input, shape index: {}]   ;;  %s7537_s9 = inlined_call_operand.vmem [shape: f32[480,192], index: 9, kind: input, shape index: {}]   ;;  %s7538_s10 = inlined_call_operand.vmem [shape: f32[1,192], index: 10, kind: input, shape index: {}]   ;;  %s7539_s11 = inlined_call_operand.<no memory space> [shape: f32[1,1], index: 11, kind: input, shape index: {}]   ;;  %s7540_s12 = inlined_call_operand.vmem [shape: f32[192,64], index: 12, kind: input, shape index: {}]   ;;  %s7541_s13 = inlined_call_operand.vmem [shape: f32[64,32], index: 13, kind: input, shape index: {}]   ;;  %s7542_s14 = inlined_call_operand.vmem [shape: f32[1,32], index: 14, kind: input, shape index: {}]   ;;  %s7543_s15 = inlined_call_operand.vmem [shape: f32[32,128], index: 15, kind: input, shape index: {}]   ;;  %s7544_s16 = inlined_call_operand.vmem [shape: f32[1,128], index: 16, kind: input, shape index: {}]   ;;  %s7545_s17 = inlined_call_operand.hbm [shape: f32[2,1,128], index: 17, kind: output, shape index: {}]  }
   0x1   :  { %7565 = sst [smem:[#allocation11_spill]] %s7528_s0  ;;  %v22_v0 = vstv %s7539_s11 }
   0x2   :  { %7566 = sst [smem:[#allocation12_spill]] %s7529_s1  ;;  %23 = vst [vmem:[#allocation2] sm:$0x1] %v22_v0 }
   0x3   :  { %7567 = sst [smem:[#allocation13_spill]] %s7530_s2 }
   0x4   :  { %7568 = sst [smem:[#allocation14_spill]] %s7531_s3 }
   0x5   :  { %24 = vsyncpa [#allocation4], 0 }
   0x6   :  { %26 = vsyncpa [#allocation4 + $0x1], 0  ;;  %s4923_s26 = smov 0   ;;  %s4925_s27 = smov 0  }
   0x7   :  { %s4927_s28 = smov 0   ;;  %s4929_s29 = smov 0  }
   0x8 LB: > { %7569 = sst [smem:[#allocation6_spill]] %s4801_s26  ;;  %s4944_s11 = sadd.s32 4294967295, %s4813_s29   ;;  %s4813_s29 = sphi %s4929_s29, %s7605_s29   ;;  %s4809_s28 = sphi %s4927_s28, %s7607_s28   ;;  %s4805_s27 = sphi %s4925_s27, %s7609_s27   ;;  %s4801_s26 = sphi %s4923_s26, %s7608_s26  }
   0x9   : > { %7570 = sst [smem:[#allocation7_spill]] %s4809_s28  ;;  %s3702_s0 = sadd.s32 4294967294, %s4813_s29  }
   0xa   : > { %s4948_s30 = sadd.s32 1, %s4813_s29   ;;  %s401_s18 = sadd.s32 1, %s4809_s28 }
   0xb   : > { %7571 = sst [smem:[#allocation8_spill]] %s4948_s30  ;;  %s398_s19 = ssub.s32 %s4813_s29, %s4948_s30 }
   0xc   : > { %p411_p0 = scmp.ne.s32.totalorder %s4809_s28, %s4805_s27  ;;  %p399_p1 = scmp.eq.s32.totalorder %s398_s19, 0 }
   0xd   : > { %p412_p2 = scmp.eq.s32.totalorder %s4944_s11, 1  ;;  %p417_p3 = scmp.ne.s32.totalorder %s4805_s27, %s4801_s26 }
   0xe   : > { %p418_p4 = scmp.eq.s32.totalorder %s3702_s0, 1  ;;  %p3705_p7 = scmp.ge.s32.totalorder %s4813_s29, 1 }
   0xf   : > { %s4959_s1 = scalar_select %p399_p1, %s4809_s28, %s401_s18  }
  0x10   : > { %p4961_p5 = por %p412_p2, %p411_p0  ;;  %p4965_p6 = por %p418_p4, %p417_p3 }
  0x11   : > { %7572 = sst [smem:[#allocation9_spill]] %s4959_s1  ;;  %p492_p8 = scmp.lt.s32.totalorder %s4813_s29, 3 }
  0x12   : > { %s7574_s21 = scalar_select %p4965_p6, 1, 0 }
  0x13   : > { %p493_p9 = pnand %p3705_p7, %p492_p8 }
  0x14   : > { %7575 = sst [smem:[#allocation10_spill]] %s7574_s21  ;;  %p543_p10 = scmp.lt.s32.totalorder (!%p493_p9), %s4944_s11, 1  ;;  %v4815_v16 = vmov (!%p493_p9), 0.0   ;;  %vm556_vm0 = vcmask (!%p493_p9), 1046528   ;;  %vm576_vm1 = vcmask (!%p493_p9), 1045504   ;;  %vm685_vm2 = vcmask (!%p493_p9), 1043456  }
  0x15   : > { %496 = sbr.rel (%p493_p9) target bundleno = 4238 (0x108e), region = 88  ;;  %s7576_s24 = sld [smem:[#allocation12_spill]] (!%p493_p9)  ;;  %762 = vmatprep.mubr.f32.mxu0 (!%p493_p9), %v4815_v16  ;;  %851 = vmatprep.mubr.f32.mxu1 (!%p493_p9), %v4815_v16  ;;  %vm596_vm3 = vcmask (!%p493_p9), 228352   ;;  %vm601_vm4 = vcmask (!%p493_p9), 457728   ;;  %vm672_vm5 = vcmask (!%p493_p9), 687104   ;;  %vm924_vm6 = vcmask (!%p493_p9), 982016  }
  0x16   : > { %s7577_s23 = sld [smem:[#allocation11_spill]] (!%p493_p9)  ;;  %s7552_s1 = smov (!%p493_p9), 28   ;;  %vm965_vm10 = vcmask (!%p493_p9), 195584   ;;  %vm1063_vm12 = vcmask (!%p493_p9), 916480   ;;  %vm1104_vm13 = vcmask (!%p493_p9), 130048   ;;  %vm1210_vm14 = vcmask (!%p493_p9), 1040384  }
  0x17   : > { %s4817_s21 = smov (!%p493_p9), 56   ;;  %s7578_s0 = smov (!%p493_p9), 28   ;;  %vm4822_vm15 = vmmov (!%p493_p9), 1  }
  0x18   : > { %s7579_s2 = sld [smem:[#allocation13_spill]] (!%p493_p9)  ;;  %s4819_s18 = smov (!%p493_p9), 24  }
  0x19   : > { %s7555_s19 = smov (!%p493_p9), 112   ;;  %s7554_s28 = smov (!%p493_p9), 16  }
  0x1a   : > { %s7590_s3 = sld [smem:[#allocation14_spill]] (!%p493_p9)  ;;  %s7591_s22 = smov (!%p493_p9), 80  }
  0x1b   : > { %v607_v1 = vld [vmem:[%s7576_s24 + $0x8] sm:$0xff] (!%p493_p9)  ;;  %v609_v4 = vld [vmem:[%s7576_s24 + $0x18] sm:$0xff] (!%p493_p9)  ;;  %v606_v6 = vld [vmem:[%s7576_s24] sm:$0xff] (!%p493_p9) }
  0x1c   : > { %v611_v2 = vld [vmem:[%s7576_s24 + $0x28] sm:$0xff]  ;;  %v613_v5 = vld [vmem:[%s7576_s24 + $0x38] sm:$0xff]  ;;  %s544_s26 = scalar_select %p543_p10, %s4944_s11, 1  ;;  %v610_v8 = vld [vmem:[%s7576_s24 + $0x20] sm:$0xff] }
  0x1d   : > { %v3928_v3 = vpack.c.bf16 %v611_v2, %v607_v1  ;;  %v3948_v7 = vpack.c.bf16 %v613_v5, %v609_v4  ;;  %v608_v9 = vld [vmem:[%s7576_s24 + $0x10] sm:$0xff]  ;;  %v3930_v11 = vpack.c.bf16 %v610_v8, %v606_v6  ;;  %v615_v13 = vld [vmem:[%s7576_s24 + $0x48] sm:$0xff]  ;;  %v617_v15 = vld [vmem:[%s7576_s24 + $0x58] sm:$0xff] }
  0x1e   : > { %v612_v10 = vld [vmem:[%s7576_s24 + $0x30] sm:$0xff]  ;;  %v619_v14 = vld [vmem:[%s7576_s24 + $0x68] sm:$0xff]  ;;  %s3750_s25 = sshll.u32 %s544_s26, 5  ;;  %v621_v18 = vld [vmem:[%s7576_s24 + $0x78] sm:$0xff] }
  0x1f   : > { %3929 = vmatprep.subr.bf16.mxu0 %v3928_v3  ;;  %v3950_v12 = vpack.c.bf16 %v612_v10, %v608_v9  ;;  %3949 = vmatprep.subr.bf16.mxu1 %v3948_v7  ;;  %v3932_v17 = vpack.c.bf16 %v619_v14, %v615_v13  ;;  %v614_v19 = vld [vmem:[%s7576_s24 + $0x40] sm:$0xff]  ;;  %s547_s26 = scalar_lea.vmem %s7577_s23, %s3750_s25  ;;  %v3952_v21 = vpack.c.bf16 %v621_v18, %v617_v15  ;;  %v616_v23 = vld [vmem:[%s7576_s24 + $0x50] sm:$0xff]  ;;  %v623_v25 = vld [vmem:[%s7576_s24 + $0x88] sm:$0xff]  ;;  %s7592_s23 = smov 112  }
  0x20   : > { %v618_v20 = vld [vmem:[%s7576_s24 + $0x60] sm:$0xff]  ;;  %3931 = vmatpush1.bf16.msra.mxu0 %v3930_v11  ;;  %v620_v24 = vld [vmem:[%s7576_s24 + $0x70] sm:$0xff]  ;;  %v5031_v27 = vld [vmem:[%s547_s26 + $0x8] sm:$0xff] }
  0x21   : > { %3951 = vmatpush1.bf16.msra.mxu1 %v3950_v12  ;;  %v3934_v22 = vpack.c.bf16 %v618_v20, %v614_v19  ;;  %v5029_v26 = vld [vmem:[%s547_s26] sm:$0xff]  ;;  %v5033_v28 = vld [vmem:[%s547_s26 + $0x10] sm:$0xff]  ;;  %3933 = vmatprep.subr.bf16.mxu0 %v3932_v17  ;;  %v3954_v29 = vpack.c.bf16 %v620_v24, %v616_v23  ;;  %v558_v31 = vrot.slane %v5031_v27, 1  ;;  %v5039_v34 = vld [vmem:[%s547_s26 + $0x18] sm:$0xf]  ;;  %v578_v35 = vrot.slane %v5031_v27, 2 }
  0x22   : > { %v557_v30 = vrot.slane %v5029_v26, 1  ;;  %v560_v32 = vrot.slane %v5033_v28, 1  ;;  %v577_v33 = vrot.slane %v5029_v26, 2  ;;  %3953 = vmatprep.subr.bf16.mxu1 %v3952_v21  ;;  %v580_v36 = vrot.slane %v5033_v28, 2  ;;  %v627_v37 = vld [vmem:[%s7576_s24 + $0xa8] sm:$0xff]  ;;  %v625_v38 = vld [vmem:[%s7576_s24 + $0x98] sm:$0xff] }
  0x23   : > { %v3936_v41 = vpack.c.bf16 %v627_v37, %v623_v25  ;;  %v629_v42 = vld [vmem:[%s7576_s24 + $0xb8] sm:$0xff]  ;;  %v622_v43 = vld [vmem:[%s7576_s24 + $0x80] sm:$0xff]  ;;  %v562_v46 = vrot.slane %v5039_v34, 1  ;;  %v582_v47 = vrot.slane %v5039_v34, 2  ;;  %v624_v48 = vld [vmem:[%s7576_s24 + $0x90] sm:$0xff]  ;;  %s7559_s26 = smov 80  }
  0x24   : > { %v559_v39 = vsel %vm556_vm0, %v557_v30, %v558_v31  ;;  %v561_v40 = vsel %vm556_vm0, %v558_v31, %v560_v32  ;;  %3935 = vmatpush1.bf16.msra.mxu0 %v3934_v22  ;;  %v626_v44 = vld [vmem:[%s7576_s24 + $0xa0] sm:$0xff]  ;;  %v579_v45 = vsel %vm576_vm1, %v577_v33, %v578_v35  ;;  %v628_v49 = vld [vmem:[%s7576_s24 + $0xb0] sm:$0xff]  ;;  %v581_v50 = vsel %vm576_vm1, %v578_v35, %v580_v36  ;;  %v631_v54 = vld [vmem:[%s7576_s24 + $0xc8] sm:$0xff] }
  0x25   : > { %3955 = vmatpush1.bf16.msra.mxu1 %v3954_v29  ;;  %564 = vrot.lane.b32.xlu0 %v559_v39, %s7552_s1  ;;  %v3956_v51 = vpack.c.bf16 %v629_v42, %v625_v38  ;;  %v3938_v52 = vpack.c.bf16 %v626_v44, %v622_v43  ;;  %v3958_v53 = vpack.c.bf16 %v628_v49, %v624_v48  ;;  %v635_v55 = vld [vmem:[%s7576_s24 + $0xe8] sm:$0xff]  ;;  %v633_v56 = vld [vmem:[%s7576_s24 + $0xd8] sm:$0xff]  ;;  %v630_v59 = vld [vmem:[%s7576_s24 + $0xc0] sm:$0xff]  ;;  %v652_v38 = vlaneseq }
  0x26   : > { %566 = vrot.lane.b32.xlu1 %v561_v40, %s7552_s1  ;;  %3937 = vmatprep.subr.bf16.mxu0 %v3936_v41  ;;  %v3940_v57 = vpack.c.bf16 %v635_v55, %v631_v54  ;;  %v637_v58 = vld [vmem:[%s7576_s24 + $0xf8] sm:$0xff]  ;;  %v634_v60 = vld [vmem:[%s7576_s24 + $0xe0] sm:$0xff]  ;;  %v632_v63 = vld [vmem:[%s7576_s24 + $0xd0] sm:$0xff]  ;;  %v563_v2 = vsel %vm556_vm0, %v560_v32, %v562_v46  ;;  %v583_v5 = vsel %vm576_vm1, %v580_v36, %v582_v47  ;;  %s3747_s1 = sshll.u32 %s4944_s11, 4  ;;  %s4829_s11 = smov [#allocation3]  }
  0x27   : > { %3957 = vmatprep.subr.bf16.mxu1 %v3956_v51  ;;  %v3960_v61 = vpack.c.bf16 %v637_v58, %v633_v56  ;;  %v3942_v62 = vpack.c.bf16 %v634_v60, %v630_v59  ;;  %v636_v0 = vld [vmem:[%s7576_s24 + $0xf0] sm:$0xff]  ;;  %v639_v1 = vld [vmem:[%s7576_s24 + $0x108] sm:$0xff]  ;;  %v641_v4 = vld [vmem:[%s7576_s24 + $0x118] sm:$0xff]  ;;  %s7486_s25 = scalar_lea.hbm %s7545_s17, %s3747_s1 }
  0x28   : > { %3939 = vmatpush1.bf16.msra.mxu0 %v3938_v52  ;;  %v643_v3 = vld [vmem:[%s7576_s24 + $0x128] sm:$0xff]  ;;  %v3962_v6 = vpack.c.bf16 %v636_v0, %v632_v63  ;;  %v645_v8 = vld [vmem:[%s7576_s24 + $0x138] sm:$0xff]  ;;  %v638_v9 = vld [vmem:[%s7576_s24 + $0x100] sm:$0xff] }
  0x29   : > { %584 = vrot.lane.b32.xlu0 %v579_v45, %s4817_s21  ;;  %3959 = vmatpush1.bf16.msra.mxu1 %v3958_v53  ;;  %v3944_v7 = vpack.c.bf16 %v643_v3, %v639_v1  ;;  %v642_v10 = vld [vmem:[%s7576_s24 + $0x120] sm:$0xff]  ;;  %v3964_v11 = vpack.c.bf16 %v645_v8, %v641_v4  ;;  %v640_v12 = vld [vmem:[%s7576_s24 + $0x110] sm:$0xff]  ;;  %v647_v17 = vld [vmem:[%s7576_s24 + $0x148] sm:$0xf] }
  0x2a   : > { %586 = vrot.lane.b32.xlu1 %v581_v50, %s4817_s21  ;;  %3941 = vmatprep.subr.bf16.mxu0 %v3940_v57  ;;  %v644_v13 = vld [vmem:[%s7576_s24 + $0x130] sm:$0xff]  ;;  %v3946_v14 = vpack.c.bf16 %v642_v10, %v638_v9  ;;  %v649_v18 = vld [vmem:[%s7576_s24 + $0x158] sm:$0xf]  ;;  %v646_v19 = vld [vmem:[%s7576_s24 + $0x140] sm:$0xf] }
  0x2b   : > { %3961 = vmatprep.subr.bf16.mxu1 %v3960_v61  ;;  %v3966_v15 = vpack.c.bf16 %v644_v13, %v640_v12  ;;  %v648_v20 = vld [vmem:[%s7576_s24 + $0x150] sm:$0xf]  ;;  %v650_v40 = vld [vmem:[%s7579_s2] sm:$0xf] }
  0x2c   : > { %3943 = vmatpush1.bf16.msra.mxu0 %v3942_v62 }
  0x2d   : > { %568 = vrot.lane.b32.xlu0 %v563_v2, %s7578_s0  ;;  %3963 = vmatpush1.bf16.msra.mxu1 %v3962_v6 }
  0x2e   : > { %588 = vrot.lane.b32.xlu1 %v583_v5, %s4817_s21  ;;  %3945 = vmatprep.subr.bf16.mxu0 %v3944_v7 }
  0x2f   : > { %3965 = vmatprep.subr.bf16.mxu1 %v3964_v11 }
  0x30   : > { %3947 = vmatpush1.bf16.msra.mxu0 %v3946_v14 }
  0x31   : > { %570 = vrot.lane.b32.xlu0 %v562_v46, %s7578_s0  ;;  %3967 = vmatpush1.bf16.msra.mxu1 %v3966_v15  ;;  %s4818_s0 = smov 120  }
  0x32   : > { %590 = vrot.lane.b32.xlu1 %v582_v47, %s4817_s21  ;;  %3708 = vmatprep.subr.msk.mxu0 %vm685_vm2, %v647_v17  ;;  %v5255_v17 = vand.u32 127, %v652_v38  ;;  %s7561_s21 = smov 96  }
  0x33   : > { %3714 = vmatprep.subr.msk.mxu1 %vm685_vm2, %v649_v18 }
  0x34   : > { %3709 = vmatpush1.msk.msra.mxu0 %vm685_vm2, %v646_v19  ;;  %v5258_v18 = vadd.s32 128, %v5255_v17  ;;  %v5261_v19 = vadd.s32 256, %v5255_v17 }
  0x35   : > { %3715 = vmatpush1.msk.msra.mxu1 %vm685_vm2, %v648_v20  ;;  %vm5490_vm2 = vmpackc.low %vm1210_vm14, %vm4822_vm15 }
  0x97   : > { %v565_v21 = vpop.permute.xlu0 %564 }
  0x98   : > { %v567_v22 = vpop.permute.xlu1 %566  ;;  %v597_v23 = vsel %vm596_vm3, %v5029_v26, %v565_v21 }
  0x99   : > { %v598_v24 = vsel %vm596_vm3, %v5031_v27, %v567_v22 }
  0x9b   : > { %v585_v25 = vpop.permute.xlu0 %584 }
  0x9c   : > { %v587_v29 = vpop.permute.xlu1 %586  ;;  %v602_v30 = vsel %vm601_vm4, %v597_v23, %v585_v25  ;;  %v976_v23 = vand.u32 15, %v5258_v18 }
  0x9d   : > { %3710 = vmatmul.mubr.msk.f32.vlgmr.msra.gmra.mrb[0].mxu0 %vm672_vm5, %v602_v30  ;;  %3716 = vmatmul.mubr.msk.f32.vlgmr.msra.gmra.mrb[0].mxu1 %vm672_vm5, %v602_v30  ;;  %v603_v31 = vsel %vm601_vm4, %v598_v24, %v587_v29  ;;  %v977_v24 = vand.u32 15, %v5261_v19 }
  0x9e   : > { %768 = vmatprep.mubr.f32.mxu0 %v4815_v16  ;;  %857 = vmatprep.mubr.f32.mxu1 %v4815_v16  ;;  %vm5271_vm7 = vcmp.lt.s32.totalorder %v976_v23, 8  ;;  %v974_v23 = vadd.s32 384, %v5255_v17 }
  0x9f   : > { %v569_v32 = vpop.permute.xlu0 %568  ;;  %vm5275_vm8 = vcmp.lt.s32.totalorder %v977_v24, 8 }
  0xa0   : > { %v589_v33 = vpop.permute.xlu1 %588  ;;  %v599_v26 = vsel %vm596_vm3, %v5033_v28, %v569_v32 }
  0xa1   : > { %3711 = vmatmul.mubr.msk.f32.gmra.mrb[2].mxu0 %vm672_vm5, %v603_v31  ;;  %3717 = vmatmul.mubr.msk.f32.gmra.mrb[2].mxu1 %vm672_vm5, %v603_v31  ;;  %v604_v27 = vsel %vm601_vm4, %v599_v26, %v589_v33 }
  0xa2   : > { %774 = vmatprep.mubr.f32.mxu0 %v4815_v16  ;;  %863 = vmatprep.mubr.f32.mxu1 %v4815_v16 }
  0xa3   : > { %v571_v35 = vpop.permute.xlu0 %570 }
  0xa4   : > { %v591_v36 = vpop.permute.xlu1 %590  ;;  %v600_v37 = vsel %vm596_vm3, %v5039_v34, %v571_v35  ;;  %v5169_v34 = vshrl.u32 %v652_v38, 7  ;;  %vm1203_vm3 = vcmask 203776  }
  0xa5   : > { %3712 = vmatmul.mubr.msk.f32.gmra.mrb[4].mxu0 %vm672_vm5, %v604_v27  ;;  %3718 = vmatmul.mubr.msk.f32.gmra.mrb[4].mxu1 %vm672_vm5, %v604_v27  ;;  %v605_v28 = vsel %vm601_vm4, %v600_v37, %v591_v36  ;;  %vm1481_vm4 = vcmask 261120  }
  0xa6   : > { %780 = vmatprep.mubr.f32.mxu0 %v4815_v16  ;;  %869 = vmatprep.mubr.f32.mxu1 %v4815_v16  ;;  %v662_v39 = vsub.s32 2, %v5169_v34  ;;  %v5176_v41 = vsub.s32 1, %v5169_v34  ;;  %v5179_v42 = vsub.s32 0, %v5169_v34  ;;  %v666_v45 = vsub.s32 3, %v5169_v34 }
  0xa8   : > { %v663_v43 = vrot.slane %v650_v40, %v662_v39  ;;  %v659_v44 = vrot.slane %v650_v40, %v5176_v41  ;;  %v655_v48 = vrot.slane %v650_v40, %v5179_v42  ;;  %v667_v53 = vrot.slane %v650_v40, %v666_v45 }
  0xa9   : > { %3713 = vmatmul.mubr.msk.f32.gmra.mrb[6].mxu0 %vm672_vm5, %v605_v28  ;;  %3719 = vmatmul.mubr.msk.f32.gmra.mrb[6].mxu1 %vm672_vm5, %v605_v28  ;;  %vm1664_vm5 = vcmask 654336  }
  0xaa   : > { %1287 = vmatprep.mubr.f32.mxu0 %v4815_v16  ;;  %1364 = vmatprep.mubr.f32.mxu1 %v4815_v16 }
 0x170   : > { %v764_v46 = vpop.f32.mrb[0].mxu0  ;;  %v853_v47 = vpop.f32.mrb[0].mxu1 }
 0x171   : > { %v5186_v49 = vadd.f32 %v853_v47, %v663_v43  ;;  %v766_v50 = vpop.f32.mrb[1].mxu0  ;;  %v855_v51 = vpop.f32.mrb[1].mxu1  ;;  %v5194_v56 = vadd.f32 %v764_v46, %v655_v48  ;;  %v975_v47 = vand.u32 15, %v5255_v17 }
 0x172   : > { %v5188_v52 = vadd.f32 %v766_v50, %v659_v44  ;;  %v5196_v59 = vadd.f32 %v855_v51, %v667_v53 }
 0x173   : > { %896 = vrot.lane.b32.xlu1 %v5186_v49, %s4818_s0  ;;  %vm5314_vm9 = vcmp.lt.s32.totalorder %v975_v47, 8 }
 0x174   : > { %v770_v54 = vpop.f32.mrb[2].mxu0  ;;  %v859_v55 = vpop.f32.mrb[2].mxu1  ;;  %894 = vrot.lane.b32.xlu0 %v5188_v52, %s4818_s0 }
 0x175   : > { %v772_v57 = vpop.f32.mrb[3].mxu0  ;;  %v861_v58 = vpop.f32.mrb[3].mxu1  ;;  %v5204_v1 = vadd.f32 %v859_v55, %v663_v43  ;;  %v5212_v7 = vadd.f32 %v770_v54, %v655_v48 }
 0x176   : > { %v5202_v62 = vadd.f32 %v772_v57, %v659_v44  ;;  %v5210_v4 = vadd.f32 %v861_v58, %v667_v53 }
 0x177   : > { %892 = vrot.lane.b32.xlu1 %v5194_v56, %s4818_s0 }
 0x178   : > { %898 = vrot.lane.b32.xlu0 %v5196_v59, %s4818_s0  ;;  %v776_v60 = vpop.f32.mrb[4].mxu0  ;;  %v865_v61 = vpop.f32.mrb[4].mxu1 }
 0x179   : > { %v778_v63 = vpop.f32.mrb[5].mxu0  ;;  %v867_v0 = vpop.f32.mrb[5].mxu1  ;;  %v5216_v8 = vadd.f32 %v865_v61, %v663_v43  ;;  %v5226_v10 = vadd.f32 %v776_v60, %v655_v48 }
 0x17a   : > { %v5220_v9 = vadd.f32 %v778_v63, %v659_v44  ;;  %v5228_v11 = vadd.f32 %v867_v0, %v667_v53 }
 0x17b   : > { %902 = vrot.lane.b32.xlu1 %v5202_v62, %s4818_s0 }
 0x17c   : > { %904 = vrot.lane.b32.xlu0 %v5204_v1, %s4818_s0  ;;  %v782_v2 = vpop.f32.mrb[6].mxu0  ;;  %v871_v3 = vpop.f32.mrb[6].mxu1 }
 0x17d   : > { %v784_v5 = vpop.f32.mrb[7].mxu0  ;;  %v873_v6 = vpop.f32.mrb[7].mxu1  ;;  %v5232_v12 = vadd.f32 %v871_v3, %v663_v43  ;;  %v5242_v14 = vadd.f32 %v782_v2, %v655_v48 }
 0x17e   : > { %v5236_v13 = vadd.f32 %v784_v5, %v659_v44  ;;  %v5244_v15 = vadd.f32 %v873_v6, %v667_v53 }
 0x17f   : > { %906 = vrot.lane.b32.xlu1 %v5210_v4, %s4818_s0 }
 0x180   : > { %900 = vrot.lane.b32.xlu0 %v5212_v7, %s4818_s0 }
 0x183   : > { %912 = vrot.lane.b32.xlu1 %v5216_v8, %s4818_s0 }
 0x184   : > { %910 = vrot.lane.b32.xlu0 %v5220_v9, %s4818_s0 }
 0x187   : > { %908 = vrot.lane.b32.xlu1 %v5226_v10, %s4818_s0 }
 0x188   : > { %914 = vrot.lane.b32.xlu0 %v5228_v11, %s4818_s0 }
 0x18b   : > { %920 = vrot.lane.b32.xlu1 %v5232_v12, %s4818_s0 }
 0x18c   : > { %918 = vrot.lane.b32.xlu0 %v5236_v13, %s4818_s0 }
 0x18f   : > { %916 = vrot.lane.b32.xlu1 %v5242_v14, %s4818_s0 }
 0x190   : > { %922 = vrot.lane.b32.xlu0 %v5244_v15, %s4818_s0  ;;  %s7557_s0 = smov 32  }
 0x193   : > { %955 = vrot.lane.b32.xlu1 %v5212_v7, %s4819_s18 }
 0x194   : > { %953 = vrot.lane.b32.xlu0 %v5194_v56, %s4819_s18 }
 0x197   : > { %959 = vrot.lane.b32.xlu1 %v5242_v14, %s4819_s18 }
 0x198   : > { %957 = vrot.lane.b32.xlu0 %v5226_v10, %s4819_s18  ;;  %s7600_s18 = smov 64  }
 0x1e5   : > { %v897_v20 = vpop.permute.xlu1 %896 }
 0x1e6   : > { %v895_v21 = vpop.permute.xlu0 %894 }
 0x1e7   : > { %v926_v22 = vsel %vm924_vm6, %v895_v21, %v897_v20 }
 0x1e8   : > { %v984_v29 = vmul.f32 %v926_v22, %v5188_v52 }
 0x1e9   : > { %v893_v25 = vpop.permute.xlu1 %892 }
 0x1ea   : > { %v5267_v30 = vpop.permute.xlu0 %898  ;;  %v5283_v36 = vsel %vm5271_vm7, %v984_v29, %v5188_v52  ;;  %v925_v44 = vsel %vm924_vm6, %v893_v25, %v895_v21 }
 0x1eb   : > { %v927_v31 = vsel %vm924_vm6, %v897_v20, %v5267_v30  ;;  %v983_v51 = vmul.f32 %v925_v44, %v5194_v56 }
 0x1ec   : > { %v985_v26 = vmul.f32 %v927_v31, %v5186_v49 }
 0x1ed   : > { %v903_v27 = vpop.permute.xlu1 %902  ;;  %v5328_v63 = vsel %vm5314_vm9, %v983_v51, %v5194_v56 }
 0x1ee   : > { %v905_v35 = vpop.permute.xlu0 %904  ;;  %v5288_v37 = vsel %vm5275_vm8, %v985_v26, %v5186_v49 }
 0x1ef   : > { %v929_v28 = vsel %vm924_vm6, %v903_v27, %v905_v35  ;;  %v4687_v38 = vpack.i.bf16 %v5288_v37, %v5283_v36 }
 0x1f0   : > { %v988_v40 = vmul.f32 %v929_v28, %v5202_v62 }
 0x1f1   : > { %v907_v43 = vpop.permute.xlu1 %906  ;;  %4688 = vrot.lane.b32.xlu0 %v4687_v38, %s7555_s19 }
 0x1f2   : > { %v930_v45 = vsel %vm924_vm6, %v905_v35, %v907_v43  ;;  %v901_v46 = vpop.permute.xlu0 %900  ;;  %v5305_v53 = vsel %vm5271_vm7, %v988_v40, %v5202_v62  ;;  %v978_v35 = vand.u32 15, %v974_v23 }
 0x1f3   : > { %v989_v48 = vmul.f32 %v930_v45, %v5204_v1  ;;  %v928_v49 = vsel %vm924_vm6, %v901_v46, %v903_v27 }
 0x1f4   : > { %v987_v50 = vmul.f32 %v928_v49, %v5212_v7  ;;  %vm5382_vm11 = vcmp.lt.s32.totalorder %v978_v35, 8 }
 0x1f5   : > { %v913_v52 = vpop.permute.xlu1 %912  ;;  %v5310_v54 = vsel %vm5275_vm8, %v989_v48, %v5204_v1 }
 0x1f6   : > { %v911_v55 = vpop.permute.xlu0 %910  ;;  %v4692_v57 = vpack.i.bf16 %v5310_v54, %v5305_v53  ;;  %v5322_v61 = vsel %vm5314_vm9, %v987_v50, %v5212_v7 }
 0x1f7   : > { %v932_v60 = vsel %vm924_vm6, %v911_v55, %v913_v52  ;;  %v4697_v2 = vpack.i.bf16 %v5322_v61, %v5328_v63 }
 0x1f8   : > { %4693 = vrot.lane.b32.xlu1 %v4692_v57, %s7555_s19  ;;  %v992_v0 = vmul.f32 %v932_v60, %v5220_v9 }
 0x1f9   : > { %v909_v62 = vpop.permute.xlu1 %908 }
 0x1fa   : > { %v915_v1 = vpop.permute.xlu0 %914  ;;  %v931_v3 = vsel %vm924_vm6, %v909_v62, %v911_v55  ;;  %v5341_v56 = vsel %vm5271_vm7, %v992_v0, %v5220_v9 }
 0x1fb   : > { %v933_v5 = vsel %vm924_vm6, %v913_v52, %v915_v1  ;;  %v991_v20 = vmul.f32 %v931_v3, %v5226_v10 }
 0x1fc   : > { %v993_v6 = vmul.f32 %v933_v5, %v5216_v8  ;;  %4698 = vrot.lane.b32.xlu1 %v4697_v2, %s7555_s19 }
 0x1fd   : > { %v921_v7 = vpop.permute.xlu1 %920 }
 0x1fe   : > { %v919_v21 = vpop.permute.xlu0 %918  ;;  %v5346_v22 = vsel %vm5275_vm8, %v993_v6, %v5216_v8  ;;  %v5358_v8 = vsel %vm5314_vm9, %v991_v20, %v5226_v10 }
 0x1ff   : > { %v935_v24 = vsel %vm924_vm6, %v919_v21, %v921_v7  ;;  %v4702_v25 = vpack.i.bf16 %v5346_v22, %v5341_v56 }
 0x200   : > { %v996_v29 = vmul.f32 %v935_v24, %v5236_v13 }
 0x201   : > { %v917_v31 = vpop.permute.xlu1 %916  ;;  %4703 = vrot.lane.b32.xlu0 %v4702_v25, %s7555_s19 }
 0x202   : > { %v934_v9 = vsel %vm924_vm6, %v917_v31, %v919_v21  ;;  %v923_v26 = vpop.permute.xlu0 %922  ;;  %v5363_v27 = vsel %vm5271_vm7, %v996_v29, %v5236_v13 }
 0x203   : > { %v995_v28 = vmul.f32 %v934_v9, %v5242_v14  ;;  %v936_v38 = vsel %vm924_vm6, %v921_v7, %v923_v26  ;;  %v4707_v40 = vpack.i.bf16 %v5363_v27, %v5358_v8 }
 0x204   : > { %v997_v44 = vmul.f32 %v936_v38, %v5232_v12 }
 0x205   : > { %v956_v45 = vpop.permute.xlu1 %955  ;;  %4708 = vrot.lane.b32.xlu0 %v4707_v40, %s7555_s19  ;;  %v5374_v10 = vsel %vm5314_vm9, %v995_v28, %v5242_v14  ;;  %vm2478_vm9 = vcmask 785408  }
 0x206   : > { %v967_v13 = vsel %vm965_vm10, %v907_v43, %v956_v45  ;;  %v954_v32 = vpop.permute.xlu0 %953  ;;  %v5380_v46 = vsel %vm5275_vm8, %v997_v44, %v5232_v12  ;;  %vm4828_vm8 = vmmov 0  }
 0x207   : > { %v990_v48 = vmul.f32 %v967_v13, %v5210_v4  ;;  %v966_v49 = vsel %vm965_vm10, %v5267_v30, %v954_v32  ;;  %v4712_v14 = vpack.i.bf16 %v5374_v10, %v5380_v46 }
 0x208   : > { %v986_v43 = vmul.f32 %v966_v49, %v5196_v59 }
 0x209   : > { %4713 = vrot.lane.b32.xlu1 %v4712_v14, %s7555_s19  ;;  %v5396_v12 = vsel %vm5382_vm11, %v990_v48, %v5210_v4  ;;  %v960_v33 = vpop.permute.xlu1 %959 }
 0x20a   : > { %v958_v50 = vpop.permute.xlu0 %957  ;;  %v5401_v51 = vsel %vm5382_vm11, %v986_v43, %v5196_v59  ;;  %v969_v57 = vsel %vm965_vm10, %v923_v26, %v960_v33 }
 0x20b   : > { %v968_v30 = vsel %vm965_vm10, %v915_v1, %v958_v50  ;;  %v4717_v52 = vpack.i.bf16 %v5396_v12, %v5401_v51  ;;  %v998_v59 = vmul.f32 %v969_v57, %v5244_v15  ;;  %vm2495_vm10 = vcmask 523264  }
 0x20c   : > { %v994_v55 = vmul.f32 %v968_v30, %v5228_v11 }
 0x20d   : > { %4718 = vrot.lane.b32.xlu0 %v4717_v52, %s7555_s19  ;;  %v5423_v58 = vsel %vm5382_vm11, %v998_v59, %v5244_v15 }
 0x20e   : > { %v5412_v4 = vsel %vm5382_vm11, %v994_v55, %v5228_v11  ;;  %vm2536_vm11 = vcmask 1041408  }
 0x20f   : > { %1053 = vrot.lane.b32.xlu1 %v5412_v4, %s7555_s19 }
 0x211   : > { %4723 = vrot.lane.b32.xlu0 %v4697_v2, %s7554_s28 }
 0x213   : > { %1096 = vrot.lane.b32.xlu1 %v5358_v8, %s7554_s28 }
 0x215   : > { %1061 = vrot.lane.b32.xlu0 %v5423_v58, %s7555_s19  ;;  %s7563_s19 = smov 64  }
 0x217   : > { %1098 = vrot.lane.b32.xlu1 %v5374_v10, %s7554_s28 }
 0x263   : > { %v4689_v11 = vpop.permute.xlu0 %4688 }
 0x264   : > { %v4691_v62 = vunpack.i.h.bf16 %v4689_v11  ;;  %v4690_v0 = vunpack.i.l.bf16 %v4689_v11 }
 0x266   : > { %v1065_v6 = vsel %vm1063_vm12, %v4690_v0, %v4691_v62 }
 0x267   : > { %v1110_v21 = vmax.f32 %v5283_v36, %v1065_v6 }
 0x269   : > { %v1144_v28 = vrot.slane %v1110_v21, 1 }
 0x26a   : > { %v4694_v60 = vpop.permute.xlu1 %4693 }
 0x26b   : > { %v4696_v1 = vunpack.i.h.bf16 %v4694_v60  ;;  %v4695_v2 = vunpack.i.l.bf16 %v4694_v60 }
 0x26d   : > { %v1068_v3 = vsel %vm1063_vm12, %v4695_v2, %v4696_v1 }
 0x26e   : > { %v4699_v5 = vpop.permute.xlu1 %4698  ;;  %v1114_v20 = vmax.f32 %v5305_v53, %v1068_v3 }
 0x26f   : > { %v4701_v15 = vunpack.i.h.bf16 %v4699_v5  ;;  %v4700_v7 = vunpack.i.l.bf16 %v4699_v5 }
 0x270   : > { %v1145_v29 = vrot.slane %v1114_v20, 1 }
 0x271   : > { %v1067_v23 = vsel %vm1063_vm12, %v4701_v15, %v4695_v2  ;;  %v1064_v24 = vsel %vm1063_vm12, %v4700_v7, %v4690_v0 }
 0x272   : > { %v1113_v26 = vmax.f32 %v5322_v61, %v1067_v23  ;;  %v1109_v35 = vmax.f32 %v5328_v63, %v1064_v24  ;;  %v1146_v44 = vsel %vm556_vm0, %v1144_v28, %v1145_v29 }
 0x273   : > { %v4704_v25 = vpop.permute.xlu0 %4703  ;;  %v1186_v49 = vmax.f32 %v1110_v21, %v1146_v44 }
 0x274   : > { %v4706_v31 = vunpack.i.h.bf16 %v4704_v25  ;;  %v4705_v9 = vunpack.i.l.bf16 %v4704_v25  ;;  %v1142_v45 = vrot.slane %v1113_v26, 1  ;;  %v1141_v13 = vrot.slane %v1109_v35, 1 }
 0x276   : > { %v1071_v38 = vsel %vm1063_vm12, %v4705_v9, %v4706_v31  ;;  %v1143_v50 = vsel %vm556_vm0, %v1141_v13, %v1142_v45 }
 0x277   : > { %v5439_v40 = vmax.f32 %v5341_v56, %v1071_v38  ;;  %v4709_v53 = vpop.permute.xlu0 %4708  ;;  %v1185_v0 = vmax.f32 %v1109_v35, %v1143_v50 }
 0x278   : > { %v4710_v36 = vunpack.i.l.bf16 %v4709_v53  ;;  %v4711_v14 = vunpack.i.h.bf16 %v4709_v53 }
 0x279   : > { %v1155_v32 = vrot.slane %v5439_v40, 1 }
 0x27a   : > { %v1070_v47 = vsel %vm1063_vm12, %v4710_v36, %v4705_v9 }
 0x27b   : > { %v1117_v61 = vmax.f32 %v5358_v8, %v1070_v47  ;;  %v5445_v48 = vpop.permute.xlu1 %4713  ;;  %v1156_v63 = vsel %vm556_vm0, %v1145_v29, %v1155_v32 }
 0x27c   : > { %v4716_v56 = vunpack.i.h.bf16 %v5445_v48  ;;  %v4715_v43 = vunpack.i.l.bf16 %v5445_v48  ;;  %v1190_v33 = vmax.f32 %v1114_v20, %v1156_v63 }
 0x27d   : > { %v1153_v30 = vrot.slane %v1117_v61, 1 }
 0x27e   : > { %v1073_v52 = vsel %vm1063_vm12, %v4716_v56, %v4711_v14  ;;  %v1074_v55 = vsel %vm1063_vm12, %v4711_v14, %v4715_v43  ;;  %v3968_v57 = vpack.c.bf16 %v1190_v33, %v1186_v49  ;;  %v1395_v33 = vld [vmem:[%s7532_s4 + $0x90] sm:$0xff] }
 0x27f   : > { %v1121_v8 = vmax.f32 %v5374_v10, %v1073_v52  ;;  %v1122_v59 = vmax.f32 %v5363_v27, %v1074_v55  ;;  %v4719_v11 = vpop.permute.xlu0 %4718  ;;  %v1154_v60 = vsel %vm556_vm0, %v1142_v45, %v1153_v30  ;;  %v1380_v45 = vld [vmem:[%s7532_s4 + $0x18] sm:$0xff]  ;;  %v1377_v55 = vld [vmem:[%s7532_s4] sm:$0xff] }
 0x280   : > { %v4721_v2 = vunpack.i.h.bf16 %v4719_v11  ;;  %v4720_v3 = vunpack.i.l.bf16 %v4719_v11  ;;  %3969 = vmatprep.subr.bf16.mxu0 %v3968_v57  ;;  %v1189_v5 = vmax.f32 %v1113_v26, %v1154_v60  ;;  %v1384_v11 = vld [vmem:[%s7532_s4 + $0x38] sm:$0xff] }
 0x281   : > { %v1161_v6 = vrot.slane %v1121_v8, 1  ;;  %v1163_v15 = vrot.slane %v1122_v59, 1  ;;  %v1054_v7 = vpop.permute.xlu1 %1053 }
 0x282   : > { %v1069_v20 = vsel %vm1063_vm12, %v4696_v1, %v4721_v2  ;;  %v1066_v21 = vsel %vm1063_vm12, %v4691_v62, %v4720_v3  ;;  %v1072_v10 = vsel %vm1063_vm12, %v4706_v31, %v1054_v7  ;;  %v3970_v27 = vpack.c.bf16 %v1189_v5, %v1185_v0 }
 0x283   : > { %v1162_v23 = vsel %vm556_vm0, %v1153_v30, %v1161_v6  ;;  %v1197_v24 = vmax.f32 %v1121_v8, %v1161_v6  ;;  %v5461_v25 = vmax.f32 %v5310_v54, %v1069_v20  ;;  %v4724_v29 = vpop.permute.xlu0 %4723  ;;  %v5464_v26 = vmax.f32 %v5288_v37, %v1066_v21  ;;  %v1201_v6 = vld [vmem:[%s7590_s3] sm:$0xff] }
 0x284   : > { %v1193_v9 = vmax.f32 %v1117_v61, %v1162_v23  ;;  %v5467_v35 = vmax.f32 %v5346_v22, %v1072_v10  ;;  %v4726_v1 = vunpack.i.h.bf16 %v4724_v29  ;;  %3971 = vmatpush1.bf16.msra.mxu0 %v3970_v27  ;;  %v1198_v62 = vmax.f32 %v1122_v59, %v1163_v15  ;;  %v1378_v22 = vld [vmem:[%s7532_s4 + $0x8] sm:$0xff] }
 0x285   : > { %v1148_v31 = vrot.slane %v5461_v25, 1  ;;  %v4725_v28 = vunpack.i.l.bf16 %v4724_v29  ;;  %v1097_v38 = vpop.permute.xlu1 %1096  ;;  %v1164_v53 = vsel %vm556_vm0, %v1155_v32, %v1163_v15  ;;  %v1147_v54 = vrot.slane %v5464_v26, 1  ;;  %v1388_v29 = vld [vmem:[%s7532_s4 + $0x58] sm:$0xff] }
 0x286   : > { %v3975_v36 = vpack.c.bf16 %v1197_v24, %v1193_v9  ;;  %v1157_v44 = vrot.slane %v5467_v35, 1  ;;  %v1106_v37 = vsel %vm1104_vm13, %v4721_v2, %v4726_v1  ;;  %v1107_v32 = vsel %vm1104_vm13, %v1054_v7, %v1097_v38  ;;  %v1381_v2 = vld [vmem:[%s7532_s4 + $0x20] sm:$0xff] }
 0x287   : > { %v1105_v13 = vsel %vm1104_vm13, %v4720_v3, %v4725_v28  ;;  %v1116_v47 = vmax.f32 %v5396_v12, %v1106_v37  ;;  %v1062_v61 = vpop.permute.xlu0 %1061  ;;  %v1194_v48 = vmax.f32 %v5439_v40, %v1164_v53  ;;  %v1149_v63 = vsel %vm556_vm0, %v1147_v54, %v1148_v31  ;;  %v1383_v3 = vld [vmem:[%s7532_s4 + $0x30] sm:$0xff]  ;;  %v1202_v53 = vld [vmem:[%s7590_s3 + $0x8] sm:$0x1f]  ;;  %v1385_v54 = vld [vmem:[%s7532_s4 + $0x40] sm:$0xff] }
 0x288   : > { %v1158_v49 = vsel %vm556_vm0, %v1148_v31, %v1157_v44  ;;  %v1112_v14 = vmax.f32 %v5401_v51, %v1105_v13  ;;  %v1120_v56 = vmax.f32 %v5412_v4, %v1107_v32  ;;  %v1075_v50 = vsel %vm1063_vm12, %v4715_v43, %v1062_v61  ;;  %v1379_v51 = vld [vmem:[%s7532_s4 + $0x10] sm:$0xff]  ;;  %v1382_v43 = vld [vmem:[%s7532_s4 + $0x28] sm:$0xff]  ;;  %v1389_v32 = vld [vmem:[%s7532_s4 + $0x60] sm:$0xff] }
 0x289   : > { %v1151_v12 = vrot.slane %v1116_v47, 1  ;;  %v3972_v30 = vpack.c.bf16 %v1198_v62, %v1194_v48  ;;  %v1099_v40 = vpop.permute.xlu1 %1098  ;;  %v3988_v52 = vpack.c.bf16 %v1380_v45, %v1378_v22  ;;  %v1123_v8 = vmax.f32 %v5380_v46, %v1075_v50  ;;  %v1390_v37 = vld [vmem:[%s7532_s4 + $0x68] sm:$0xff]  ;;  %v1392_v22 = vld [vmem:[%s7532_s4 + $0x78] sm:$0xff] }
 0x28a   : > { %v1150_v4 = vrot.slane %v1112_v14, 1  ;;  %v1159_v57 = vrot.slane %v1120_v56, 1  ;;  %v1108_v59 = vsel %vm1104_vm13, %v1062_v61, %v1099_v40  ;;  %v1187_v60 = vmax.f32 %v5464_v26, %v1149_v63  ;;  %v1391_v61 = vld [vmem:[%s7532_s4 + $0x70] sm:$0xff]  ;;  %v1394_v48 = vld [vmem:[%s7532_s4 + $0x88] sm:$0xff]  ;;  %v1396_v63 = vld [vmem:[%s7532_s4 + $0x98] sm:$0xff] }
 0x28b   : > { %3974 = vmatprep.subr.msk.bf16.mxu0 %vm5490_vm2, %v3972_v30  ;;  %v1124_v0 = vmax.f32 %v5423_v58, %v1108_v59  ;;  %v1191_v46 = vmax.f32 %v5461_v25, %v1158_v49  ;;  %v1165_v5 = vrot.slane %v1123_v8, 1  ;;  %v3990_v7 = vpack.c.bf16 %v1379_v51, %v1377_v55  ;;  %v1386_v25 = vld [vmem:[%s7532_s4 + $0x48] sm:$0xff]  ;;  %v1400_v50 = vld [vmem:[%s7532_s4 + $0xb8] sm:$0xff]  ;;  %v1399_v55 = vld [vmem:[%s7532_s4 + $0xb0] sm:$0xff] }
 0x28c   : > { %3977 = vmatpush1.bf16.msk.msra.mxu0 %vm5490_vm2, %v3975_v36  ;;  %v1152_v58 = vsel %vm556_vm0, %v1150_v4, %v1151_v12  ;;  %v1160_v15 = vsel %vm556_vm0, %v1151_v12, %v1159_v57  ;;  %v3992_v27 = vpack.c.bf16 %v1384_v11, %v1382_v43  ;;  %v3994_v24 = vpack.c.bf16 %v1383_v3, %v1381_v2  ;;  %v1398_v12 = vld [vmem:[%s7532_s4 + $0xa8] sm:$0xff]  ;;  %v1404_v4 = vld [vmem:[%s7532_s4 + $0xd8] sm:$0xff]  ;;  %v1401_v59 = vld [vmem:[%s7532_s4 + $0xc0] sm:$0xff] }
 0x28d   : > { %v1167_v20 = vrot.slane %v1124_v0, 1  ;;  %v1188_v21 = vmax.f32 %v1112_v14, %v1152_v58  ;;  %v1192_v10 = vmax.f32 %v1116_v47, %v1160_v15  ;;  %3989 = vmatprep.subr.bf16.mxu0 %v3988_v52  ;;  %v1166_v23 = vsel %vm556_vm0, %v1157_v44, %v1165_v5  ;;  %v1397_v52 = vld [vmem:[%s7532_s4 + $0xa0] sm:$0xff]  ;;  %v1402_v51 = vld [vmem:[%s7532_s4 + $0xc8] sm:$0xff]  ;;  %v1403_v43 = vld [vmem:[%s7532_s4 + $0xd0] sm:$0xff] }
 0x28e   : > { %v3980_v62 = vpack.c.bf16 %v1191_v46, %v1187_v60  ;;  %v1195_v31 = vmax.f32 %v5467_v35, %v1166_v23  ;;  %v1199_v28 = vmax.f32 %v1123_v8, %v1165_v5  ;;  %v3996_v36 = vpack.c.bf16 %v1388_v29, %v1386_v25  ;;  %v1387_v35 = vld [vmem:[%s7532_s4 + $0x50] sm:$0xff]  ;;  %v1406_v11 = vld [vmem:[%s7532_s4 + $0xe8] sm:$0xff]  ;;  %v1408_v60 = vld [vmem:[%s7532_s4 + $0xf8] sm:$0xff] }
 0x28f   : > { %v1168_v9 = vsel %vm556_vm0, %v1159_v57, %v1167_v20  ;;  %v1200_v26 = vmax.f32 %v1124_v0, %v1167_v20  ;;  %3722 = vmatmul.mubr.msk.f32.vlgmr.msra.gmra.mrb[8].mxu0 %vm1203_vm3, %v1201_v6  ;;  %v3978_v1 = vpack.c.bf16 %v1192_v10, %v1188_v21  ;;  %v3998_v13 = vpack.c.bf16 %v1387_v35, %v1385_v54  ;;  %v1405_v2 = vld [vmem:[%s7532_s4 + $0xe0] sm:$0xff]  ;;  %v1407_v3 = vld [vmem:[%s7532_s4 + $0xf0] sm:$0xff]  ;;  %v1410_v5 = vld [vmem:[%s7532_s4 + $0x108] sm:$0xff] }
 0x290   : > { %v1196_v38 = vmax.f32 %v1120_v56, %v1168_v9  ;;  %1293 = vmatprep.mubr.f32.mxu0 %v4815_v16  ;;  %3991 = vmatpush1.bf16.msra.mxu0 %v3990_v7  ;;  %v3985_v45 = vpack.c.bf16 %v1199_v28, %v1195_v31  ;;  %v4000_v47 = vpack.c.bf16 %v1392_v22, %v1390_v37  ;;  %v1393_v56 = vld [vmem:[%s7532_s4 + $0x80] sm:$0xff]  ;;  %v1411_v20 = vld [vmem:[%s7532_s4 + $0x110] sm:$0xff]  ;;  %v1414_v21 = vld [vmem:[%s7532_s4 + $0x128] sm:$0xff] }
 0x291   : > { %3979 = vmatprep.subr.bf16.mxu1 %v3978_v1  ;;  %3993 = vmatprep.subr.bf16.mxu0 %v3992_v27  ;;  %v4002_v49 = vpack.c.bf16 %v1391_v61, %v1389_v32  ;;  %v4004_v14 = vpack.c.bf16 %v1396_v63, %v1394_v48  ;;  %v4006_v30 = vpack.c.bf16 %v1395_v33, %v1393_v56  ;;  %v1409_v7 = vld [vmem:[%s7532_s4 + $0x100] sm:$0xff]  ;;  %v1416_v10 = vld [vmem:[%s7532_s4 + $0x138] sm:$0xff]  ;;  %v1415_v25 = vld [vmem:[%s7532_s4 + $0x130] sm:$0xff] }
 0x292   : > { %v3982_v44 = vpack.c.bf16 %v1200_v26, %v1196_v38  ;;  %3981 = vmatpush1.bf16.msra.mxu1 %v3980_v62  ;;  %v4008_v40 = vpack.c.bf16 %v1400_v50, %v1398_v12  ;;  %v4010_v57 = vpack.c.bf16 %v1399_v55, %v1397_v52  ;;  %v4012_v8 = vpack.c.bf16 %v1404_v4, %v1402_v51  ;;  %v1418_v29 = vld [vmem:[%s7532_s4 + $0x148] sm:$0xff]  ;;  %v1420_v9 = vld [vmem:[%s7532_s4 + $0x158] sm:$0xff]  ;;  %v1417_v62 = vld [vmem:[%s7532_s4 + $0x140] sm:$0xff] }
 0x293   : > { %3723 = vmatmul.mubr.msk.f32.gmra.mrb[10].mxu0 %vm1203_vm3, %v1202_v53  ;;  %v4014_v0 = vpack.c.bf16 %v1403_v43, %v1401_v59  ;;  %v4016_v46 = vpack.c.bf16 %v1408_v60, %v1406_v11  ;;  %v4018_v58 = vpack.c.bf16 %v1407_v3, %v1405_v2  ;;  %v4022_v27 = vpack.c.bf16 %v1411_v20, %v1409_v7  ;;  %v1419_v31 = vld [vmem:[%s7532_s4 + $0x150] sm:$0xff]  ;;  %v1422_v28 = vld [vmem:[%s7532_s4 + $0x168] sm:$0xff]  ;;  %v1424_v38 = vld [vmem:[%s7532_s4 + $0x178] sm:$0xff] }
 0x294   : > { %3984 = vmatprep.subr.msk.bf16.mxu1 %vm5490_vm2, %v3982_v44  ;;  %3995 = vmatpush1.bf16.msra.mxu0 %v3994_v24  ;;  %v4024_v23 = vpack.c.bf16 %v1416_v10, %v1414_v21  ;;  %v1413_v24 = vld [vmem:[%s7532_s4 + $0x120] sm:$0xff]  ;;  %v4028_v1 = vpack.c.bf16 %v1420_v9, %v1418_v29  ;;  %v1423_v35 = vld [vmem:[%s7532_s4 + $0x170] sm:$0xff]  ;;  %v1426_v44 = vld [vmem:[%s7532_s4 + $0x188] sm:$0xff] }
 0x295   : > { %3997 = vmatprep.subr.bf16.mxu0 %v3996_v36  ;;  %v4026_v26 = vpack.c.bf16 %v1415_v25, %v1413_v24  ;;  %v4032_v36 = vpack.c.bf16 %v1424_v38, %v1422_v28  ;;  %v1421_v54 = vld [vmem:[%s7532_s4 + $0x160] sm:$0xff]  ;;  %v1428_v37 = vld [vmem:[%s7532_s4 + $0x198] sm:$0xff]  ;;  %v1430_v32 = vld [vmem:[%s7532_s4 + $0x1a8] sm:$0xff] }
 0x296   : > { %3987 = vmatpush1.bf16.msk.msra.mxu1 %vm5490_vm2, %v3985_v45  ;;  %v4034_v22 = vpack.c.bf16 %v1423_v35, %v1421_v54  ;;  %v4036_v45 = vpack.c.bf16 %v1428_v37, %v1426_v44  ;;  %v1432_v61 = vld [vmem:[%s7532_s4 + $0x1b8] sm:$0xff]  ;;  %v1434_v56 = vld [vmem:[%s7532_s4 + $0x1c8] sm:$0xff]  ;;  %v1445_v7 = vld [vmem:[%s7532_s4 + $0x220] sm:$0xff] }
 0x297   : > { %v4040_v63 = vpack.c.bf16 %v1432_v61, %v1430_v32  ;;  %v1436_v33 = vld [vmem:[%s7532_s4 + $0x1d8] sm:$0xff]  ;;  %v1438_v52 = vld [vmem:[%s7532_s4 + $0x1e8] sm:$0xff]  ;;  %v1447_v20 = vld [vmem:[%s7532_s4 + $0x230] sm:$0xff] }
 0x298   : > { %3999 = vmatpush1.bf16.msra.mxu0 %v3998_v13  ;;  %v1425_v13 = vld [vmem:[%s7532_s4 + $0x180] sm:$0xff]  ;;  %v4044_v50 = vpack.c.bf16 %v1436_v33, %v1434_v56  ;;  %v1440_v55 = vld [vmem:[%s7532_s4 + $0x1f8] sm:$0xff]  ;;  %v1442_v43 = vld [vmem:[%s7532_s4 + $0x208] sm:$0xff] }
 0x299   : > { %3726 = vmatmul.mubr.msk.f32.vlgmr.msra.gmra.mrb[8].mxu1 %vm1203_vm3, %v1201_v6  ;;  %4001 = vmatprep.subr.bf16.mxu0 %v4000_v47  ;;  %v1412_v6 = vld [vmem:[%s7532_s4 + $0x118] sm:$0xff]  ;;  %v1427_v47 = vld [vmem:[%s7532_s4 + $0x190] sm:$0xff]  ;;  %v4048_v4 = vpack.c.bf16 %v1440_v55, %v1438_v52  ;;  %v1446_v2 = vld [vmem:[%s7532_s4 + $0x228] sm:$0xff] }
 0x29a   : > { %1370 = vmatprep.mubr.f32.mxu1 %v4815_v16  ;;  %v4020_v15 = vpack.c.bf16 %v1412_v6, %v1410_v5  ;;  %v4038_v48 = vpack.c.bf16 %v1427_v47, %v1425_v13  ;;  %v1444_v11 = vld [vmem:[%s7532_s4 + $0x218] sm:$0xff]  ;;  %v1450_v21 = vld [vmem:[%s7532_s4 + $0x248] sm:$0xff]  ;;  %v1449_v25 = vld [vmem:[%s7532_s4 + $0x240] sm:$0xff] }
 0x29b   : > { %v4052_v60 = vpack.c.bf16 %v1444_v11, %v1442_v43  ;;  %v1448_v3 = vld [vmem:[%s7532_s4 + $0x238] sm:$0xff]  ;;  %v1451_v29 = vld [vmem:[%s7532_s4 + $0x250] sm:$0xff]  ;;  %v1453_v28 = vld [vmem:[%s7532_s4 + $0x260] sm:$0xff] }
 0x29c   : > { %4003 = vmatpush1.bf16.msra.mxu0 %v4002_v49  ;;  %v1429_v49 = vld [vmem:[%s7532_s4 + $0x1a0] sm:$0xff]  ;;  %v1452_v10 = vld [vmem:[%s7532_s4 + $0x258] sm:$0xff]  ;;  %v1455_v38 = vld [vmem:[%s7532_s4 + $0x270] sm:$0xff] }
 0x29d   : > { %3727 = vmatmul.mubr.msk.f32.gmra.mrb[10].mxu1 %vm1203_vm3, %v1202_v53  ;;  %4005 = vmatprep.subr.bf16.mxu0 %v4004_v14  ;;  %v4030_v53 = vpack.c.bf16 %v1419_v31, %v1417_v62  ;;  %v1431_v14 = vld [vmem:[%s7532_s4 + $0x1b0] sm:$0xff]  ;;  %v4060_v24 = vpack.c.bf16 %v1452_v10, %v1450_v21  ;;  %v4062_v62 = vpack.c.bf16 %v1451_v29, %v1449_v25  ;;  %v1462_v13 = vld [vmem:[%s7532_s4 + $0x2a8] sm:$0xff]  ;;  %v1464_v47 = vld [vmem:[%s7532_s4 + $0x2b8] sm:$0xff]  ;;  %vm3269_vm3 = vcmask 7168  }
 0x29e   : > { %v4042_v12 = vpack.c.bf16 %v1431_v14, %v1429_v49  ;;  %v4066_v44 = vpack.c.bf16 %v1455_v38, %v1453_v28  ;;  %v1461_v49 = vld [vmem:[%s7532_s4 + $0x2a0] sm:$0xff]  ;;  %v1463_v14 = vld [vmem:[%s7532_s4 + $0x2b0] sm:$0xff]  ;;  %v1466_v56 = vld [vmem:[%s7532_s4 + $0x2c8] sm:$0xff] }
 0x29f   : > { %v1468_v33 = vld [vmem:[%s7532_s4 + $0x2d8] sm:$0xff]  ;;  %v1470_v52 = vld [vmem:[%s7532_s4 + $0x2e8] sm:$0xff]  ;;  %v1699_v21 = vld [vmem:[%s7533_s5 + $0x20] sm:$0xff] }
 0x2a0   : > { %4007 = vmatpush1.bf16.msra.mxu0 %v4006_v30  ;;  %v1433_v30 = vld [vmem:[%s7532_s4 + $0x1c0] sm:$0xff]  ;;  %v1472_v55 = vld [vmem:[%s7532_s4 + $0x2f8] sm:$0xff]  ;;  %v1705_v25 = vld [vmem:[%s7533_s5 + $0x50] sm:$0xff] }
 0x2a1   : > { %4009 = vmatprep.subr.bf16.mxu0 %v4008_v40  ;;  %v1435_v40 = vld [vmem:[%s7532_s4 + $0x1d0] sm:$0xff]  ;;  %v1476_v43 = vld [vmem:[%s7532_s4 + $0x318] sm:$0xff]  ;;  %v1695_v10 = vld [vmem:[%s7533_s5] sm:$0xff] }
 0x2a2   : > { %v4046_v51 = vpack.c.bf16 %v1435_v40, %v1433_v30  ;;  %v1465_v30 = vld [vmem:[%s7532_s4 + $0x2c0] sm:$0xff]  ;;  %v1467_v40 = vld [vmem:[%s7532_s4 + $0x2d0] sm:$0xff] }
 0x2a4   : > { %4011 = vmatpush1.bf16.msra.mxu0 %v4010_v57  ;;  %v1437_v57 = vld [vmem:[%s7532_s4 + $0x1e0] sm:$0xff] }
 0x2a5   : > { %4013 = vmatprep.subr.bf16.mxu0 %v4012_v8  ;;  %v1439_v8 = vld [vmem:[%s7532_s4 + $0x1f0] sm:$0xff] }
 0x2a6   : > { %v4050_v59 = vpack.c.bf16 %v1439_v8, %v1437_v57  ;;  %v1469_v57 = vld [vmem:[%s7532_s4 + $0x2e0] sm:$0xff]  ;;  %v1471_v8 = vld [vmem:[%s7532_s4 + $0x2f0] sm:$0xff] }
 0x2a7   : > { %v4082_v11 = vpack.c.bf16 %v1471_v8, %v1469_v57  ;;  %v1706_v57 = vld [vmem:[%s7533_s5 + $0x58] sm:$0xff] }
 0x2a8   : > { %4015 = vmatpush1.bf16.msra.mxu0 %v4014_v0  ;;  %v1441_v0 = vld [vmem:[%s7532_s4 + $0x200] sm:$0xff] }
 0x2a9   : > { %4017 = vmatprep.subr.bf16.mxu0 %v4016_v46  ;;  %v1443_v46 = vld [vmem:[%s7532_s4 + $0x210] sm:$0xff] }
 0x2aa   : > { %v4054_v6 = vpack.c.bf16 %v1443_v46, %v1441_v0  ;;  %v1473_v0 = vld [vmem:[%s7532_s4 + $0x300] sm:$0xff]  ;;  %v1475_v46 = vld [vmem:[%s7532_s4 + $0x310] sm:$0xff] }
 0x2ac   : > { %4019 = vmatpush1.bf16.msra.mxu0 %v4018_v58 }
 0x2ad   : > { %4021 = vmatprep.subr.bf16.mxu0 %v4020_v15  ;;  %v4056_v15 = vpack.c.bf16 %v1448_v3, %v1446_v2  ;;  %v1478_v2 = vld [vmem:[%s7532_s4 + $0x328] sm:$0xff]  ;;  %v1480_v3 = vld [vmem:[%s7532_s4 + $0x338] sm:$0xff] }
 0x2b0   : > { %4023 = vmatpush1.bf16.msra.mxu0 %v4022_v27  ;;  %v4058_v27 = vpack.c.bf16 %v1447_v20, %v1445_v7  ;;  %v1696_v20 = vld [vmem:[%s7533_s5 + $0x8] sm:$0xff] }
 0x2b1   : > { %4025 = vmatprep.subr.bf16.mxu0 %v4024_v23 }
 0x2b4   : > { %4027 = vmatpush1.bf16.msra.mxu0 %v4026_v26  ;;  %v1454_v26 = vld [vmem:[%s7532_s4 + $0x268] sm:$0xff] }
 0x2b5   : > { %4029 = vmatprep.subr.bf16.mxu0 %v4028_v1  ;;  %v1456_v1 = vld [vmem:[%s7532_s4 + $0x278] sm:$0xff] }
 0x2b6   : > { %v4064_v31 = vpack.c.bf16 %v1456_v1, %v1454_v26  ;;  %v1701_v26 = vld [vmem:[%s7533_s5 + $0x30] sm:$0xff]  ;;  %v1704_v1 = vld [vmem:[%s7533_s5 + $0x48] sm:$0xff] }
 0x2b7   : > { %v4098_v28 = vpack.c.bf16 %v1704_v1, %v1701_v26  ;;  %v1741_v26 = vld [vmem:[%s7533_s5 + $0x170] sm:$0xff] }
 0x2b8   : > { %4031 = vmatpush1.bf16.msra.mxu0 %v4030_v53  ;;  %v1458_v53 = vld [vmem:[%s7532_s4 + $0x288] sm:$0xff]  ;;  %v1769_v1 = vld [vmem:[%s7533_s5 + $0x250] sm:$0xff] }
 0x2b9   : > { %4033 = vmatprep.subr.bf16.mxu0 %v4032_v36  ;;  %v1460_v36 = vld [vmem:[%s7532_s4 + $0x298] sm:$0xff] }
 0x2ba   : > { %v4068_v37 = vpack.c.bf16 %v1460_v36, %v1458_v53  ;;  %v1707_v53 = vld [vmem:[%s7533_s5 + $0x60] sm:$0xff]  ;;  %v1710_v36 = vld [vmem:[%s7533_s5 + $0x78] sm:$0xff] }
 0x2bc   : > { %4035 = vmatpush1.bf16.msra.mxu0 %v4034_v22  ;;  %v1457_v22 = vld [vmem:[%s7532_s4 + $0x280] sm:$0xff] }
 0x2bd   : > { %4037 = vmatprep.subr.bf16.mxu0 %v4036_v45  ;;  %v1459_v45 = vld [vmem:[%s7532_s4 + $0x290] sm:$0xff] }
 0x2c0   : > { %4039 = vmatpush1.bf16.msra.mxu0 %v4038_v48  ;;  %v4070_v48 = vpack.c.bf16 %v1459_v45, %v1457_v22  ;;  %v1713_v22 = vld [vmem:[%s7533_s5 + $0x90] sm:$0xff]  ;;  %v1716_v45 = vld [vmem:[%s7533_s5 + $0xa8] sm:$0xff] }
 0x2c1   : > { %4041 = vmatprep.subr.bf16.mxu0 %v4040_v63  ;;  %v4072_v63 = vpack.c.bf16 %v1464_v47, %v1462_v13  ;;  %v1720_v13 = vld [vmem:[%s7533_s5 + $0xc8] sm:$0xff]  ;;  %v1723_v47 = vld [vmem:[%s7533_s5 + $0xe0] sm:$0xff] }
 0x2c4   : > { %4043 = vmatpush1.bf16.msra.mxu0 %v4042_v12  ;;  %v4074_v12 = vpack.c.bf16 %v1463_v14, %v1461_v49  ;;  %v1697_v14 = vld [vmem:[%s7533_s5 + $0x10] sm:$0xff] }
 0x2c5   : > { %4045 = vmatprep.subr.bf16.mxu0 %v4044_v50  ;;  %v4076_v50 = vpack.c.bf16 %v1468_v33, %v1466_v56  ;;  %v4108_v56 = vpack.c.bf16 %v1723_v47, %v1720_v13  ;;  %v1722_v33 = vld [vmem:[%s7533_s5 + $0xd8] sm:$0xff] }
 0x2c6   : > { %v1778_v13 = vld [vmem:[%s7533_s5 + $0x298] sm:$0xff] }
 0x2c8   : > { %4047 = vmatpush1.bf16.msra.mxu0 %v4046_v51  ;;  %v4078_v51 = vpack.c.bf16 %v1467_v40, %v1465_v30  ;;  %v1729_v30 = vld [vmem:[%s7533_s5 + $0x110] sm:$0xff] }
 0x2c9   : > { %4049 = vmatprep.subr.bf16.mxu0 %v4048_v4  ;;  %v4080_v4 = vpack.c.bf16 %v1472_v55, %v1470_v52  ;;  %v1751_v52 = vld [vmem:[%s7533_s5 + $0x1c0] sm:$0xff]  ;;  %v1754_v55 = vld [vmem:[%s7533_s5 + $0x1d8] sm:$0xff] }
 0x2cc   : > { %4051 = vmatpush1.bf16.msra.mxu0 %v4050_v59  ;;  %v1474_v59 = vld [vmem:[%s7532_s4 + $0x308] sm:$0xff] }
 0x2cd   : > { %4053 = vmatprep.subr.bf16.mxu0 %v4052_v60  ;;  %v4084_v60 = vpack.c.bf16 %v1476_v43, %v1474_v59  ;;  %v1725_v59 = vld [vmem:[%s7533_s5 + $0xf0] sm:$0xff] }
 0x362   : > { %v1289_v5 = vpop.f32.mrb[8].mxu0 }
 0x363   : > { %v1291_v58 = vpop.f32.mrb[9].mxu0 }
 0x364   : > { %1552 = vmatprep.mubr.f32.mxu0 %v1291_v58  ;;  %v1477_v58 = vld [vmem:[%s7532_s4 + $0x320] sm:$0xff] }
 0x365   : > { %1553 = vmatmul.mubr.f32.vlgmr.msra.gmra.mrb[12].mxu0 %v1289_v5  ;;  %v4086_v5 = vpack.c.bf16 %v1475_v46, %v1473_v0  ;;  %v1728_v0 = vld [vmem:[%s7533_s5 + $0x108] sm:$0xff] }
 0x366   : > { %4055 = vmatpush1.bf16.msra.mxu0 %v4054_v6  ;;  %v1295_v23 = vpop.f32.mrb[10].mxu0  ;;  %v4088_v6 = vpack.c.bf16 %v1480_v3, %v1478_v2  ;;  %v1732_v46 = vld [vmem:[%s7533_s5 + $0x128] sm:$0xff]  ;;  %v1735_v3 = vld [vmem:[%s7533_s5 + $0x140] sm:$0xff] }
 0x367   : > { %4057 = vmatprep.subr.bf16.mxu0 %v4056_v15  ;;  %v1297_v9 = vpop.f32.mrb[11].mxu0  ;;  %v1479_v15 = vld [vmem:[%s7532_s4 + $0x330] sm:$0xff]  ;;  %v1760_v2 = vld [vmem:[%s7533_s5 + $0x208] sm:$0xff] }
 0x368   : > { %1558 = vmatprep.mubr.f32.mxu0 %v1297_v9  ;;  %v4090_v7 = vpack.c.bf16 %v1479_v15, %v1477_v58  ;;  %v1712_v58 = vld [vmem:[%s7533_s5 + $0x88] sm:$0xff]  ;;  %v1763_v15 = vld [vmem:[%s7533_s5 + $0x220] sm:$0xff] }
 0x369   : > { %1559 = vmatmul.mubr.f32.gmra.mrb[14].mxu0 %v1295_v23  ;;  %v1698_v23 = vld [vmem:[%s7533_s5 + $0x18] sm:$0xff] }
 0x36a   : > { %4059 = vmatpush1.bf16.msra.mxu0 %v4058_v27  ;;  %v4092_v27 = vpack.c.bf16 %v1699_v21, %v1696_v20  ;;  %v4094_v29 = vpack.c.bf16 %v1698_v23, %v1695_v10  ;;  %v4114_v20 = vpack.c.bf16 %v1728_v0, %v1725_v59  ;;  %v1731_v21 = vld [vmem:[%s7533_s5 + $0x120] sm:$0xff]  ;;  %v1734_v10 = vld [vmem:[%s7533_s5 + $0x138] sm:$0xff]  ;;  %v4116_v23 = vpack.c.bf16 %v1735_v3, %v1732_v46  ;;  %v1733_v59 = vld [vmem:[%s7533_s5 + $0x130] sm:$0xff] }
 0x36b   : > { %4061 = vmatprep.subr.bf16.mxu0 %v4060_v24  ;;  %v1702_v24 = vld [vmem:[%s7533_s5 + $0x38] sm:$0xff] }
 0x36c   : > { %v1366_v54 = vpop.f32.mrb[8].mxu1  ;;  %v4096_v9 = vpack.c.bf16 %v1705_v25, %v1702_v24  ;;  %4093 = vmatprep.subr.bf16.mxu1 %v4092_v27  ;;  %v1738_v24 = vld [vmem:[%s7533_s5 + $0x158] sm:$0xff] }
 0x36d   : > { %v1368_v35 = vpop.f32.mrb[9].mxu1  ;;  %4095 = vmatpush1.bf16.msra.mxu1 %v4094_v29  ;;  %v1715_v29 = vld [vmem:[%s7533_s5 + $0xa0] sm:$0xff]  ;;  %v1790_v0 = vld [vmem:[%s7533_s5 + $0x2f8] sm:$0xff] }
 0x36e   : > { %4063 = vmatpush1.bf16.msra.mxu0 %v4062_v62  ;;  %3728 = vmatprep.mubr.msk.f32.mxu0 %vm1481_vm4, %v1368_v35  ;;  %v1708_v62 = vld [vmem:[%s7533_s5 + $0x68] sm:$0xff]  ;;  %v1717_v35 = vld [vmem:[%s7533_s5 + $0xb0] sm:$0xff] }
 0x36f   : > { %4065 = vmatprep.subr.bf16.mxu0 %v4064_v31  ;;  %v1711_v31 = vld [vmem:[%s7533_s5 + $0x80] sm:$0xff]  ;;  %4097 = vmatprep.subr.bf16.mxu1 %v4096_v9  ;;  %v1718_v9 = vld [vmem:[%s7533_s5 + $0xb8] sm:$0xff] }
 0x370   : > { %v1372_v32 = vpop.f32.mrb[10].mxu1  ;;  %v4100_v38 = vpack.c.bf16 %v1711_v31, %v1708_v62  ;;  %v1772_v62 = vld [vmem:[%s7533_s5 + $0x268] sm:$0xff]  ;;  %v4118_v31 = vpack.c.bf16 %v1734_v10, %v1731_v21  ;;  %v1765_v21 = vld [vmem:[%s7533_s5 + $0x230] sm:$0xff] }
 0x371   : > { %v1374_v61 = vpop.f32.mrb[11].mxu1  ;;  %4099 = vmatpush1.bf16.msra.mxu1 %v4098_v28  ;;  %v1737_v28 = vld [vmem:[%s7533_s5 + $0x150] sm:$0xff] }
 0x372   : > { %4067 = vmatpush1.bf16.msra.mxu0 %v4066_v44  ;;  %v4102_v44 = vpack.c.bf16 %v1710_v36, %v1707_v53  ;;  %4101 = vmatprep.subr.bf16.mxu1 %v4100_v38  ;;  %v1740_v38 = vld [vmem:[%s7533_s5 + $0x168] sm:$0xff]  ;;  %v4262_v53 = vpack.c.bf16 %v1718_v9, %v1715_v29  ;;  %v4120_v36 = vpack.c.bf16 %v1741_v26, %v1738_v24  ;;  %v1761_v24 = vld [vmem:[%s7533_s5 + $0x210] sm:$0xff]  ;;  %v1771_v9 = vld [vmem:[%s7533_s5 + $0x260] sm:$0xff] }
 0x373   : > { %4069 = vmatprep.subr.bf16.mxu0 %v4068_v37  ;;  %v4122_v47 = vpack.c.bf16 %v1740_v38, %v1737_v28  ;;  %v1768_v29 = vld [vmem:[%s7533_s5 + $0x248] sm:$0xff]  ;;  %v1774_v28 = vld [vmem:[%s7533_s5 + $0x278] sm:$0xff]  ;;  %v1777_v38 = vld [vmem:[%s7533_s5 + $0x290] sm:$0xff] }
 0x375   : > { %4103 = vmatpush1.bf16.msra.mxu1 %v4102_v44  ;;  %v1721_v44 = vld [vmem:[%s7533_s5 + $0xd0] sm:$0xff] }
 0x376   : > { %4071 = vmatpush1.bf16.msra.mxu0 %v4070_v48  ;;  %v4106_v48 = vpack.c.bf16 %v1716_v45, %v1713_v22  ;;  %v1747_v22 = vld [vmem:[%s7533_s5 + $0x1a0] sm:$0xff] }
 0x377   : > { %4073 = vmatprep.subr.bf16.mxu0 %v4072_v63  ;;  %v1719_v63 = vld [vmem:[%s7533_s5 + $0xc0] sm:$0xff] }
 0x378   : > { %v4110_v8 = vpack.c.bf16 %v1722_v33, %v1719_v63  ;;  %v1775_v45 = vld [vmem:[%s7533_s5 + $0x280] sm:$0xff]  ;;  %v1730_v33 = vld [vmem:[%s7533_s5 + $0x118] sm:$0xff] }
 0x37a   : > { %4075 = vmatpush1.bf16.msra.mxu0 %v4074_v12  ;;  %v1726_v12 = vld [vmem:[%s7533_s5 + $0xf8] sm:$0xff] }
 0x37b   : > { %4077 = vmatprep.subr.bf16.mxu0 %v4076_v50  ;;  %v1700_v50 = vld [vmem:[%s7533_s5 + $0x28] sm:$0xff] }
 0x37c   : > { %v4250_v40 = vpack.c.bf16 %v1700_v50, %v1697_v14  ;;  %v4268_v14 = vpack.c.bf16 %v1778_v13, %v1775_v45  ;;  %v1781_v50 = vld [vmem:[%s7533_s5 + $0x2b0] sm:$0xff]  ;;  %v1779_v13 = vld [vmem:[%s7533_s5 + $0x2a0] sm:$0xff] }
 0x37e   : > { %4079 = vmatpush1.bf16.msra.mxu0 %v4078_v51  ;;  %v4252_v51 = vpack.c.bf16 %v1754_v55, %v1751_v52  ;;  %v1749_v52 = vld [vmem:[%s7533_s5 + $0x1b0] sm:$0xff]  ;;  %v1752_v55 = vld [vmem:[%s7533_s5 + $0x1c8] sm:$0xff] }
 0x37f   : > { %4081 = vmatprep.subr.bf16.mxu0 %v4080_v4  ;;  %v1703_v4 = vld [vmem:[%s7533_s5 + $0x40] sm:$0xff]  ;;  %v4130_v46 = vpack.c.bf16 %v1752_v55, %v1749_v52 }
 0x380   : > { %v4254_v43 = vpack.c.bf16 %v1706_v57, %v1703_v4  ;;  %v1756_v57 = vld [vmem:[%s7533_s5 + $0x1e8] sm:$0xff] }
 0x382   : > { %4083 = vmatpush1.bf16.msra.mxu0 %v4082_v11  ;;  %v1757_v11 = vld [vmem:[%s7533_s5 + $0x1f0] sm:$0xff] }
 0x383   : > { %4085 = vmatprep.subr.bf16.mxu0 %v4084_v60  ;;  %v4112_v60 = vpack.c.bf16 %v1729_v30, %v1726_v12  ;;  %v1753_v12 = vld [vmem:[%s7533_s5 + $0x1d0] sm:$0xff]  ;;  %v1784_v30 = vld [vmem:[%s7533_s5 + $0x2c8] sm:$0xff] }
 0x386   : > { %4087 = vmatpush1.bf16.msra.mxu0 %v4086_v5  ;;  %v4256_v5 = vpack.c.bf16 %v1760_v2, %v1757_v11  ;;  %v1759_v11 = vld [vmem:[%s7533_s5 + $0x200] sm:$0xff] }
 0x387   : > { %4089 = vmatprep.subr.bf16.mxu0 %v4088_v6  ;;  %v1709_v6 = vld [vmem:[%s7533_s5 + $0x70] sm:$0xff]  ;;  %v1755_v2 = vld [vmem:[%s7533_s5 + $0x1e0] sm:$0xff] }
 0x388   : > { %v4258_v27 = vpack.c.bf16 %v1712_v58, %v1709_v6  ;;  %v1758_v6 = vld [vmem:[%s7533_s5 + $0x1f8] sm:$0xff] }
 0x389   : > { %v4134_v10 = vpack.c.bf16 %v1758_v6, %v1755_v2 }
 0x38a   : > { %4091 = vmatpush1.bf16.msra.mxu0 %v4090_v7  ;;  %v1766_v7 = vld [vmem:[%s7533_s5 + $0x238] sm:$0xff] }
 0x38b   : > { %v4260_v25 = vpack.c.bf16 %v1766_v7, %v1763_v15  ;;  %v1739_v15 = vld [vmem:[%s7533_s5 + $0x160] sm:$0xff]  ;;  %v1742_v7 = vld [vmem:[%s7533_s5 + $0x178] sm:$0xff] }
 0x38d   : > { %1630 = vmatmul.mubr.f32.vlgmr.msra.gmra.mrb[12].mxu0 %v1366_v54  ;;  %v1714_v54 = vld [vmem:[%s7533_s5 + $0x98] sm:$0xff] }
 0x38e   : > { %3729 = vmatprep.mubr.msk.f32.mxu0 %vm1481_vm4, %v1374_v61  ;;  %v4104_v37 = vpack.c.bf16 %v1717_v35, %v1714_v54  ;;  %v1748_v61 = vld [vmem:[%s7533_s5 + $0x1a8] sm:$0xff]  ;;  %v4264_v35 = vpack.c.bf16 %v1772_v62, %v1769_v1  ;;  %v4140_v1 = vpack.c.bf16 %v1771_v9, %v1768_v29  ;;  %v1767_v62 = vld [vmem:[%s7533_s5 + $0x240] sm:$0xff]  ;;  %v1801_v9 = vld [vmem:[%s7533_s5 + $0x350] sm:$0xff] }
 0x38f   : > { %v1744_v54 = vld [vmem:[%s7533_s5 + $0x188] sm:$0xff] }
 0x390   : > { %4105 = vmatprep.subr.bf16.mxu1 %v4104_v37  ;;  %v1724_v37 = vld [vmem:[%s7533_s5 + $0xe8] sm:$0xff]  ;;  %v4124_v63 = vpack.c.bf16 %v1747_v22, %v1744_v54  ;;  %v1773_v54 = vld [vmem:[%s7533_s5 + $0x270] sm:$0xff] }
 0x391   : > { %1636 = vmatmul.mubr.f32.gmra.mrb[14].mxu0 %v1372_v32  ;;  %v1745_v32 = vld [vmem:[%s7533_s5 + $0x190] sm:$0xff]  ;;  %4107 = vmatpush1.bf16.msra.mxu1 %v4106_v48  ;;  %v4266_v48 = vpack.c.bf16 %v1724_v37, %v1721_v44  ;;  %v1780_v44 = vld [vmem:[%s7533_s5 + $0x2a8] sm:$0xff]  ;;  %v1783_v37 = vld [vmem:[%s7533_s5 + $0x2c0] sm:$0xff] }
 0x392   : > { %v4248_v49 = vpack.c.bf16 %v1748_v61, %v1745_v32  ;;  %4109 = vmatprep.subr.bf16.mxu1 %v4108_v56  ;;  %v1743_v32 = vld [vmem:[%s7533_s5 + $0x180] sm:$0xff]  ;;  %v1746_v61 = vld [vmem:[%s7533_s5 + $0x198] sm:$0xff]  ;;  %v4148_v45 = vpack.c.bf16 %v1783_v37, %v1780_v44 }
 0x393   : > { %v1727_v56 = vld [vmem:[%s7533_s5 + $0x100] sm:$0xff] }
 0x394   : > { %4249 = vmatprep.subr.bf16.mxu0 %v4248_v49  ;;  %v1750_v49 = vld [vmem:[%s7533_s5 + $0x1b8] sm:$0xff] }
 0x395   : > { %4251 = vmatpush3.bf16.msra.mxu0 %v4250_v40  ;;  %4111 = vmatpush1.bf16.msra.mxu1 %v4110_v8  ;;  %v4126_v40 = vpack.c.bf16 %v1746_v61, %v1743_v32  ;;  %v4128_v4 = vpack.c.bf16 %v1753_v12, %v1750_v49  ;;  %v4272_v8 = vpack.c.bf16 %v1784_v30, %v1781_v50  ;;  %v1786_v32 = vld [vmem:[%s7533_s5 + $0x2d8] sm:$0xff]  ;;  %v1789_v61 = vld [vmem:[%s7533_s5 + $0x2f0] sm:$0xff]  ;;  %v1795_v12 = vld [vmem:[%s7533_s5 + $0x320] sm:$0xff] }
 0x396   : > { %4253 = vmatprep.subr.bf16.mxu0 %v4252_v51  ;;  %4113 = vmatprep.subr.bf16.mxu1 %v4112_v60  ;;  %v4270_v51 = vpack.c.bf16 %v1730_v33, %v1727_v56  ;;  %v1787_v60 = vld [vmem:[%s7533_s5 + $0x2e0] sm:$0xff]  ;;  %v1785_v49 = vld [vmem:[%s7533_s5 + $0x2d0] sm:$0xff]  ;;  %v1792_v33 = vld [vmem:[%s7533_s5 + $0x308] sm:$0xff] }
 0x397   : > { %v4276_v58 = vpack.c.bf16 %v1790_v0, %v1787_v60  ;;  %v1841_v50 = vld [vmem:[%s7533_s5 + $0x490] sm:$0xff]  ;;  %v4156_v30 = vpack.c.bf16 %v1795_v12, %v1792_v33  ;;  %v1808_v12 = vld [vmem:[%s7533_s5 + $0x388] sm:$0xff] }
 0x398   : > { %v1805_v33 = vld [vmem:[%s7533_s5 + $0x370] sm:$0xff] }
 0x399   : > { %4255 = vmatpush3.bf16.msra.mxu0 %v4254_v43  ;;  %4115 = vmatpush1.bf16.msra.mxu1 %v4114_v20  ;;  %v1736_v43 = vld [vmem:[%s7533_s5 + $0x148] sm:$0xff]  ;;  %v1762_v20 = vld [vmem:[%s7533_s5 + $0x218] sm:$0xff] }
 0x39a   : > { %4257 = vmatprep.subr.bf16.mxu0 %v4256_v5  ;;  %4117 = vmatprep.subr.bf16.mxu1 %v4116_v23  ;;  %v4274_v3 = vpack.c.bf16 %v1736_v43, %v1733_v59  ;;  %v4132_v5 = vpack.c.bf16 %v1759_v11, %v1756_v57  ;;  %v4136_v23 = vpack.c.bf16 %v1765_v21, %v1762_v20 }
 0x39d   : > { %4259 = vmatpush3.bf16.msra.mxu0 %v4258_v27  ;;  %4119 = vmatpush1.bf16.msra.mxu1 %v4118_v31  ;;  %v4278_v27 = vpack.c.bf16 %v1742_v7, %v1739_v15  ;;  %v1770_v31 = vld [vmem:[%s7533_s5 + $0x258] sm:$0xff] }
 0x39e   : > { %4261 = vmatprep.subr.bf16.mxu0 %v4260_v25  ;;  %4121 = vmatprep.subr.bf16.mxu1 %v4120_v36  ;;  %v1764_v25 = vld [vmem:[%s7533_s5 + $0x228] sm:$0xff]  ;;  %v4144_v36 = vpack.c.bf16 %v1777_v38, %v1774_v28  ;;  %v1797_v38 = vld [vmem:[%s7533_s5 + $0x330] sm:$0xff] }
 0x39f   : > { %v4138_v26 = vpack.c.bf16 %v1764_v25, %v1761_v24  ;;  %v1796_v24 = vld [vmem:[%s7533_s5 + $0x328] sm:$0xff]  ;;  %v1798_v25 = vld [vmem:[%s7533_s5 + $0x338] sm:$0xff] }
 0x3a0   : > { %v4160_v44 = vpack.c.bf16 %v1801_v9, %v1798_v25  ;;  %v1825_v25 = vld [vmem:[%s7533_s5 + $0x410] sm:$0xff]  ;;  %v1871_v9 = vld [vmem:[%s7533_s5 + $0x580] sm:$0xff] }
 0x3a1   : > { %4263 = vmatpush3.bf16.msra.mxu0 %v4262_v53  ;;  %4123 = vmatpush1.bf16.msra.mxu1 %v4122_v47  ;;  %v4142_v53 = vpack.c.bf16 %v1770_v31, %v1767_v62  ;;  %v1782_v47 = vld [vmem:[%s7533_s5 + $0x2b8] sm:$0xff] }
 0x3a2   : > { %4265 = vmatprep.subr.bf16.mxu0 %v4264_v35  ;;  %4125 = vmatprep.subr.bf16.mxu1 %v4124_v63  ;;  %v1776_v35 = vld [vmem:[%s7533_s5 + $0x288] sm:$0xff]  ;;  %v4152_v63 = vpack.c.bf16 %v1789_v61, %v1786_v32 }
 0x3a3   : > { %v4146_v22 = vpack.c.bf16 %v1776_v35, %v1773_v54  ;;  %v1799_v54 = vld [vmem:[%s7533_s5 + $0x340] sm:$0xff]  ;;  %v1802_v35 = vld [vmem:[%s7533_s5 + $0x358] sm:$0xff] }
 0x3a5   : > { %4267 = vmatpush3.bf16.msra.mxu0 %v4266_v48  ;;  %4127 = vmatpush1.bf16.msra.mxu1 %v4126_v40  ;;  %v4150_v48 = vpack.c.bf16 %v1782_v47, %v1779_v13  ;;  %v1844_v40 = vld [vmem:[%s7533_s5 + $0x4a8] sm:$0xff]  ;;  %v1853_v13 = vld [vmem:[%s7533_s5 + $0x4f0] sm:$0xff] }
 0x3a6   : > { %4269 = vmatprep.subr.bf16.mxu0 %v4268_v14  ;;  %4129 = vmatprep.subr.bf16.mxu1 %v4128_v4  ;;  %v1788_v14 = vld [vmem:[%s7533_s5 + $0x2e8] sm:$0xff]  ;;  %v4280_v52 = vpack.c.bf16 %v1844_v40, %v1841_v50  ;;  %v1810_v50 = vld [vmem:[%s7533_s5 + $0x398] sm:$0xff] }
 0x3a7   : > { %v4154_v56 = vpack.c.bf16 %v1788_v14, %v1785_v49  ;;  %v1856_v47 = vld [vmem:[%s7533_s5 + $0x508] sm:$0xff]  ;;  %v1806_v49 = vld [vmem:[%s7533_s5 + $0x378] sm:$0xff] }
 0x3a8   : > { %v4288_v40 = vpack.c.bf16 %v1856_v47, %v1853_v13 }
 0x3a9   : > { %4271 = vmatpush3.bf16.msra.mxu0 %v4270_v51  ;;  %4131 = vmatpush1.bf16.msra.mxu1 %v4130_v46 }
 0x3aa   : > { %4273 = vmatprep.subr.bf16.mxu0 %v4272_v8  ;;  %4133 = vmatprep.subr.bf16.mxu1 %v4132_v5 }
 0x3ad   : > { %4275 = vmatpush3.bf16.msra.mxu0 %v4274_v3  ;;  %4135 = vmatpush1.bf16.msra.mxu1 %v4134_v10  ;;  %v1791_v10 = vld [vmem:[%s7533_s5 + $0x300] sm:$0xff] }
 0x3ae   : > { %4277 = vmatprep.subr.bf16.mxu0 %v4276_v58  ;;  %4137 = vmatprep.subr.bf16.mxu1 %v4136_v23  ;;  %v1793_v23 = vld [vmem:[%s7533_s5 + $0x310] sm:$0xff] }
 0x3af   : > { %v4282_v28 = vpack.c.bf16 %v1796_v24, %v1793_v23  ;;  %v1820_v23 = vld [vmem:[%s7533_s5 + $0x3e8] sm:$0xff]  ;;  %v1822_v24 = vld [vmem:[%s7533_s5 + $0x3f8] sm:$0xff] }
 0x3b1   : > { %4279 = vmatpush3.bf16.msra.mxu0 %v4278_v27  ;;  %4139 = vmatpush1.bf16.msra.mxu1 %v4138_v26  ;;  %v1794_v27 = vld [vmem:[%s7533_s5 + $0x318] sm:$0xff]  ;;  %v1847_v26 = vld [vmem:[%s7533_s5 + $0x4c0] sm:$0xff] }
 0x3b2   : > { %4141 = vmatprep.subr.bf16.mxu1 %v4140_v1  ;;  %4281 = vmatprep.subr.bf16.mxu0 %v4280_v52  ;;  %v1850_v1 = vld [vmem:[%s7533_s5 + $0x4d8] sm:$0xff]  ;;  %v4158_v31 = vpack.c.bf16 %v1794_v27, %v1791_v10  ;;  %v1813_v52 = vld [vmem:[%s7533_s5 + $0x3b0] sm:$0xff] }
 0x3b3   : > { %v4284_v37 = vpack.c.bf16 %v1850_v1, %v1847_v26  ;;  %v1817_v27 = vld [vmem:[%s7533_s5 + $0x3d0] sm:$0xff]  ;;  %v1874_v26 = vld [vmem:[%s7533_s5 + $0x598] sm:$0xff] }
 0x3b5   : > { %4143 = vmatpush1.bf16.msra.mxu1 %v4142_v53 }
 0x3b6   : > { %4145 = vmatprep.subr.bf16.mxu1 %v4144_v36  ;;  %v1800_v36 = vld [vmem:[%s7533_s5 + $0x348] sm:$0xff] }
 0x3b7   : > { %v4162_v61 = vpack.c.bf16 %v1800_v36, %v1797_v38  ;;  %v1824_v38 = vld [vmem:[%s7533_s5 + $0x408] sm:$0xff]  ;;  %v4300_v36 = vpack.c.bf16 %v1874_v26, %v1871_v9 }
 0x3b9   : > { %4147 = vmatpush1.bf16.msra.mxu1 %v4146_v22  ;;  %v1804_v22 = vld [vmem:[%s7533_s5 + $0x368] sm:$0xff] }
 0x3ba   : > { %4149 = vmatprep.subr.bf16.mxu1 %v4148_v45  ;;  %v1807_v45 = vld [vmem:[%s7533_s5 + $0x380] sm:$0xff] }
 0x3bd   : > { %4151 = vmatpush1.bf16.msra.mxu1 %v4150_v48  ;;  %v4286_v48 = vpack.c.bf16 %v1802_v35, %v1799_v54  ;;  %v1823_v54 = vld [vmem:[%s7533_s5 + $0x400] sm:$0xff]  ;;  %v1826_v35 = vld [vmem:[%s7533_s5 + $0x418] sm:$0xff] }
 0x3be   : > { %4153 = vmatprep.subr.bf16.mxu1 %v4152_v63  ;;  %v1803_v63 = vld [vmem:[%s7533_s5 + $0x360] sm:$0xff]  ;;  %v4302_v47 = vpack.c.bf16 %v1826_v35, %v1823_v54  ;;  %v1857_v54 = vld [vmem:[%s7533_s5 + $0x510] sm:$0xff]  ;;  %v1864_v35 = vld [vmem:[%s7533_s5 + $0x548] sm:$0xff] }
 0x3c1   : > { %4155 = vmatpush1.bf16.msra.mxu1 %v4154_v56 }
 0x3c2   : > { %4157 = vmatprep.subr.bf16.mxu1 %v4156_v30  ;;  %v4164_v30 = vpack.c.bf16 %v1807_v45, %v1804_v22  ;;  %v1877_v22 = vld [vmem:[%s7533_s5 + $0x5b0] sm:$0xff]  ;;  %v1880_v45 = vld [vmem:[%s7533_s5 + $0x5c8] sm:$0xff] }
 0x460   : > { %v1631_v55 = vpop.f32.mrb[12].mxu0 }
 0x461   : > { %v1633_v51 = vpop.f32.mrb[13].mxu0  ;;  %v1642_v4 = vmax.f32 %v1631_v55, 0.0  ;;  %v1859_v55 = vld [vmem:[%s7533_s5 + $0x520] sm:$0xff] }
 0x462   : > { %v1643_v11 = vmax.f32 %v1633_v51, 0.0  ;;  %v1862_v51 = vld [vmem:[%s7533_s5 + $0x538] sm:$0xff] }
 0x463   : > { %v1650_v0 = vrot.slane %v1642_v4, 1  ;;  %v1673_v5 = vrot.slane %v1642_v4, 2 }
 0x464   : > { %v1637_v57 = vpop.f32.mrb[14].mxu0  ;;  %v1653_v6 = vrot.slane %v1643_v11, 1  ;;  %v1676_v20 = vrot.slane %v1643_v11, 2 }
 0x465   : > { %v6133_v8 = vmax.f32 %v1637_v57, 0.0  ;;  %v1639_v59 = vpop.f32.mrb[15].mxu0  ;;  %v4166_v57 = vpack.c.bf16 %v1806_v49, %v1803_v63  ;;  %v4304_v63 = vpack.c.bf16 %v1880_v45, %v1877_v22  ;;  %v1829_v49 = vld [vmem:[%s7533_s5 + $0x430] sm:$0xff]  ;;  %v1863_v45 = vld [vmem:[%s7533_s5 + $0x540] sm:$0xff] }
 0x466   : > { %v1645_v43 = vmax.f32 %v1639_v59, 0.0  ;;  %v4290_v59 = vpack.c.bf16 %v1808_v12, %v1805_v33  ;;  %v1832_v33 = vld [vmem:[%s7533_s5 + $0x448] sm:$0xff]  ;;  %v1834_v12 = vld [vmem:[%s7533_s5 + $0x458] sm:$0xff] }
 0x467   : > { %v1651_v60 = vrot.slane %v6133_v8, 1  ;;  %v1674_v46 = vrot.slane %v6133_v8, 2 }
 0x468   : > { %v1654_v2 = vrot.slane %v1645_v43, 1  ;;  %v1677_v7 = vrot.slane %v1645_v43, 2 }
 0x469   : > { %1660 = vrot.lane.b32.xlu1 %v1651_v60, %s7559_s26  ;;  %v1652_v3 = vsel %vm556_vm0, %v1650_v0, %v1651_v60  ;;  %v1675_v58 = vsel %vm576_vm1, %v1673_v5, %v1674_v46  ;;  %v4168_v60 = vpack.c.bf16 %v1813_v52, %v1810_v50  ;;  %v1811_v0 = vld [vmem:[%s7533_s5 + $0x3a0] sm:$0xff]  ;;  %v1865_v5 = vld [vmem:[%s7533_s5 + $0x550] sm:$0xff] }
 0x46a   : > { %1656 = vrot.lane.b32.xlu0 %v1652_v3, %s7559_s26  ;;  %v1655_v15 = vsel %vm556_vm0, %v1653_v6, %v1654_v2  ;;  %v1678_v21 = vsel %vm576_vm1, %v1676_v20, %v1677_v7  ;;  %v1819_v3 = vld [vmem:[%s7533_s5 + $0x3e0] sm:$0xff]  ;;  %v1868_v6 = vld [vmem:[%s7533_s5 + $0x568] sm:$0xff]  ;;  %v1818_v20 = vld [vmem:[%s7533_s5 + $0x3d8] sm:$0xff] }
 0x46b   : > { %v4296_v10 = vpack.c.bf16 %v1868_v6, %v1865_v5  ;;  %v1837_v50 = vld [vmem:[%s7533_s5 + $0x470] sm:$0xff]  ;;  %v1842_v5 = vld [vmem:[%s7533_s5 + $0x498] sm:$0xff] }
 0x46c   : > { %v1846_v6 = vld [vmem:[%s7533_s5 + $0x4b8] sm:$0xff] }
 0x46d   : > { %1679 = vrot.lane.b32.xlu1 %v1675_v58, %s7557_s0 }
 0x46e   : > { %1658 = vrot.lane.b32.xlu0 %v1655_v15, %s7559_s26 }
 0x471   : > { %1683 = vrot.lane.b32.xlu1 %v1674_v46, %s7557_s0  ;;  %v1814_v46 = vld [vmem:[%s7533_s5 + $0x3b8] sm:$0xff] }
 0x472   : > { %1662 = vrot.lane.b32.xlu0 %v1654_v2, %s7559_s26  ;;  %v1816_v2 = vld [vmem:[%s7533_s5 + $0x3c8] sm:$0xff]  ;;  %v4294_v15 = vpack.c.bf16 %v1814_v46, %v1811_v0  ;;  %s7601_s26 = smov 96  }
 0x475   : > { %1685 = vrot.lane.b32.xlu1 %v1677_v7, %s7557_s0  ;;  %v1815_v7 = vld [vmem:[%s7533_s5 + $0x3c0] sm:$0xff] }
 0x476   : > { %1681 = vrot.lane.b32.xlu0 %v1678_v21, %s7557_s0  ;;  %v4172_v21 = vpack.c.bf16 %v1819_v3, %v1816_v2  ;;  %v4174_v1 = vpack.c.bf16 %v1818_v20, %v1815_v7  ;;  %v1839_v3 = vld [vmem:[%s7533_s5 + $0x480] sm:$0xff]  ;;  %s4755_s0 = sshll.u32 %s4829_s11, 4  ;;  %s4756_s0 = int_to_ptr.vmem [resolvable:$false] %s4755_s0 }
 0x477   : > { %v4190_v20 = vpack.c.bf16 %v1842_v5, %v1839_v3  ;;  %v1894_v3 = vld [vmem:[%s7533_s5 + $0x638] sm:$0xff]  ;;  %v1897_v5 = vld [vmem:[%s7533_s5 + $0x650] sm:$0xff] }
 0x4db   : > { %v6164_v29 = vpop.permute.xlu1 %1660 }
 0x4dc   : > { %v6175_v62 = vpop.permute.xlu0 %1656  ;;  %v1692_v32 = vsel %vm1664_vm5, %v1645_v43, %v6164_v29  ;;  %v1809_v43 = vld [vmem:[%s7533_s5 + $0x390] sm:$0xff] }
 0x4dd   : > { %v1691_v53 = vsel %vm1664_vm5, %v1643_v11, %v6175_v62  ;;  %v1812_v11 = vld [vmem:[%s7533_s5 + $0x3a8] sm:$0xff] }
 0x4de   : > { %2014 = vmatprep.mubr.f32.mxu1 %v1691_v53  ;;  %2245 = vmatprep.mubr.f32.mxu0 %v1691_v53  ;;  %v4170_v58 = vpack.c.bf16 %v1812_v11, %v1809_v43  ;;  %v4176_v53 = vpack.c.bf16 %v1825_v25, %v1822_v24  ;;  %v1835_v43 = vld [vmem:[%s7533_s5 + $0x460] sm:$0xff]  ;;  %v1838_v11 = vld [vmem:[%s7533_s5 + $0x478] sm:$0xff]  ;;  %v1852_v24 = vld [vmem:[%s7533_s5 + $0x4e8] sm:$0xff] }
 0x4df   : > { %2015 = vmatmul.mubr.f32.vlgmr.msra.gmra.mrb[12].mxu1 %v1642_v4  ;;  %2246 = vmatmul.mubr.f32.vlgmr.msra.gmra.mrb[16].mxu0 %v1642_v4  ;;  %v6211_v14 = vpop.permute.xlu1 %1679  ;;  %v4310_v46 = vpack.c.bf16 %v1838_v11, %v1835_v43  ;;  %v1855_v25 = vld [vmem:[%s7533_s5 + $0x500] sm:$0xff]  ;;  %v1884_v43 = vld [vmem:[%s7533_s5 + $0x5e8] sm:$0xff] }
 0x4e0   : > { %4159 = vmatpush1.bf16.msra.mxu1 %v4158_v31  ;;  %4283 = vmatpush3.bf16.msra.mxu0 %v4282_v28  ;;  %v6213_v56 = vpop.permute.xlu0 %1658  ;;  %v4298_v31 = vpack.c.bf16 %v1820_v23, %v1817_v27  ;;  %v1821_v28 = vld [vmem:[%s7533_s5 + $0x3f0] sm:$0xff]  ;;  %v1848_v27 = vld [vmem:[%s7533_s5 + $0x4c8] sm:$0xff] }
 0x4e1   : > { %2020 = vmatprep.mubr.f32.mxu1 %v1692_v32  ;;  %2250 = vmatprep.mubr.f32.mxu0 %v1692_v32  ;;  %v1693_v4 = vsel %vm1481_vm4, %v6213_v56, %v6211_v14  ;;  %v4178_v13 = vpack.c.bf16 %v1824_v38, %v1821_v28  ;;  %v1827_v32 = vld [vmem:[%s7533_s5 + $0x420] sm:$0xff]  ;;  %v6375_v23 = vsel %vm1664_vm5, %v6175_v62, %v6213_v56  ;;  %v1858_v28 = vld [vmem:[%s7533_s5 + $0x518] sm:$0xff]  ;;  %v1861_v38 = vld [vmem:[%s7533_s5 + $0x530] sm:$0xff] }
 0x4e2   : > { %4161 = vmatprep.subr.bf16.mxu1 %v4160_v44  ;;  %4285 = vmatprep.subr.bf16.mxu0 %v4284_v37  ;;  %v1828_v44 = vld [vmem:[%s7533_s5 + $0x428] sm:$0xff]  ;;  %v1831_v37 = vld [vmem:[%s7533_s5 + $0x440] sm:$0xff]  ;;  %v4196_v62 = vpack.c.bf16 %v1855_v25, %v1852_v24 }
 0x4e3   : > { %2021 = vmatmul.mubr.f32.gmra.mrb[14].mxu1 %v6133_v8  ;;  %2251 = vmatmul.mubr.f32.gmra.mrb[18].mxu0 %v6133_v8  ;;  %v4292_v8 = vpack.c.bf16 %v1862_v51, %v1859_v55  ;;  %v4306_v55 = vpack.c.bf16 %v1832_v33, %v1829_v49  ;;  %v1833_v51 = vld [vmem:[%s7533_s5 + $0x450] sm:$0xff]  ;;  %v1851_v56 = vld [vmem:[%s7533_s5 + $0x4e0] sm:$0xff]  ;;  %v1872_v49 = vld [vmem:[%s7533_s5 + $0x588] sm:$0xff] }
 0x4e4   : > { %4163 = vmatpush1.bf16.msra.mxu1 %v4162_v61  ;;  %4287 = vmatpush3.bf16.msra.mxu0 %v4286_v48  ;;  %v1830_v61 = vld [vmem:[%s7533_s5 + $0x438] sm:$0xff]  ;;  %v4180_v48 = vpack.c.bf16 %v1831_v37, %v1828_v44  ;;  %v1663_v7 = vpop.permute.xlu0 %1662  ;;  %v1867_v44 = vld [vmem:[%s7533_s5 + $0x560] sm:$0xff]  ;;  %v1876_v33 = vld [vmem:[%s7533_s5 + $0x5a8] sm:$0xff] }
 0x4e5   : > { %2091 = vmatprep.mubr.f32.mxu1 %v1693_v4  ;;  %2320 = vmatprep.mubr.f32.mxu0 %v1693_v4  ;;  %v4182_v52 = vpack.c.bf16 %v1830_v61, %v1827_v32  ;;  %v4184_v4 = vpack.c.bf16 %v1837_v50, %v1834_v12  ;;  %v4204_v22 = vpack.c.bf16 %v1867_v44, %v1864_v35  ;;  %v1873_v32 = vld [vmem:[%s7533_s5 + $0x590] sm:$0xff]  ;;  %v1879_v12 = vld [vmem:[%s7533_s5 + $0x5c0] sm:$0xff]  ;;  %v1888_v11 = vld [vmem:[%s7533_s5 + $0x608] sm:$0xff] }
 0x4e6   : > { %4165 = vmatprep.subr.bf16.mxu1 %v4164_v30  ;;  %4289 = vmatprep.subr.bf16.mxu0 %v4288_v40  ;;  %v1883_v30 = vld [vmem:[%s7533_s5 + $0x5e0] sm:$0xff]  ;;  %v1886_v40 = vld [vmem:[%s7533_s5 + $0x5f8] sm:$0xff]  ;;  %v1921_v44 = vld [vmem:[%s7533_s5 + $0x710] sm:$0xff] }
 0x4e7   : > { %v1899_v25 = vld [vmem:[%s7533_s5 + $0x660] sm:$0xff]  ;;  %v1918_v35 = vld [vmem:[%s7533_s5 + $0x6f8] sm:$0xff] }
 0x4e8   : > { %4167 = vmatpush1.bf16.msra.mxu1 %v4166_v57  ;;  %4291 = vmatpush3.bf16.msra.mxu0 %v4290_v59  ;;  %v4308_v57 = vpack.c.bf16 %v1886_v40, %v1883_v30  ;;  %v1836_v59 = vld [vmem:[%s7533_s5 + $0x468] sm:$0xff]  ;;  %v4212_v30 = vpack.c.bf16 %v1879_v12, %v1876_v33  ;;  %v1875_v40 = vld [vmem:[%s7533_s5 + $0x5a0] sm:$0xff]  ;;  %v1889_v33 = vld [vmem:[%s7533_s5 + $0x610] sm:$0xff] }
 0x4e9   : > { %4169 = vmatprep.subr.bf16.mxu1 %v4168_v60  ;;  %4293 = vmatprep.subr.bf16.mxu0 %v4292_v8  ;;  %v1840_v60 = vld [vmem:[%s7533_s5 + $0x488] sm:$0xff]  ;;  %v1843_v8 = vld [vmem:[%s7533_s5 + $0x4a0] sm:$0xff]  ;;  %v4186_v0 = vpack.c.bf16 %v1836_v59, %v1833_v51  ;;  %v1885_v51 = vld [vmem:[%s7533_s5 + $0x5f0] sm:$0xff] }
 0x4ea   : > { %v4188_v2 = vpack.c.bf16 %v1843_v8, %v1840_v60  ;;  %v1881_v59 = vld [vmem:[%s7533_s5 + $0x5d0] sm:$0xff]  ;;  %v1891_v60 = vld [vmem:[%s7533_s5 + $0x620] sm:$0xff]  ;;  %v1892_v12 = vld [vmem:[%s7533_s5 + $0x628] sm:$0xff] }
 0x4eb   : > { %v4218_v8 = vpack.c.bf16 %v1884_v43, %v1881_v59  ;;  %v1904_v59 = vld [vmem:[%s7533_s5 + $0x688] sm:$0xff] }
 0x4ec   : > { %4171 = vmatpush1.bf16.msra.mxu1 %v4170_v58  ;;  %4295 = vmatpush3.bf16.msra.mxu0 %v4294_v15  ;;  %v1849_v58 = vld [vmem:[%s7533_s5 + $0x4d0] sm:$0xff]  ;;  %v6364_v15 = vpop.permute.xlu1 %1683 }
 0x4ed   : > { %4173 = vmatprep.subr.bf16.mxu1 %v4172_v21  ;;  %4297 = vmatprep.subr.bf16.mxu0 %v4296_v10  ;;  %v4192_v21 = vpack.c.bf16 %v1849_v58, %v1846_v6  ;;  %v1845_v10 = vld [vmem:[%s7533_s5 + $0x4b0] sm:$0xff]  ;;  %v6386_v9 = vsel %vm1481_vm4, %v1663_v7, %v6364_v15  ;;  %v4224_v58 = vpack.c.bf16 %v1897_v5, %v1894_v3  ;;  %v1919_v3 = vld [vmem:[%s7533_s5 + $0x700] sm:$0xff]  ;;  %v1922_v5 = vld [vmem:[%s7533_s5 + $0x718] sm:$0xff] }
 0x4ee   : > { %v4194_v26 = vpack.c.bf16 %v1848_v27, %v1845_v10  ;;  %v1903_v10 = vld [vmem:[%s7533_s5 + $0x680] sm:$0xff] }
 0x4f0   : > { %4175 = vmatpush1.bf16.msra.mxu1 %v4174_v1  ;;  %4299 = vmatpush3.bf16.msra.mxu0 %v4298_v31  ;;  %v1854_v1 = vld [vmem:[%s7533_s5 + $0x4f8] sm:$0xff]  ;;  %v6397_v31 = vsel %vm1664_vm5, %v6164_v29, %v1663_v7  ;;  %v1860_v29 = vld [vmem:[%s7533_s5 + $0x528] sm:$0xff]  ;;  %v1893_v7 = vld [vmem:[%s7533_s5 + $0x630] sm:$0xff]  ;;  %v1686_v43 = vpop.permute.xlu1 %1685 }
 0x4f1   : > { %4177 = vmatprep.subr.bf16.mxu1 %v4176_v53  ;;  %4301 = vmatprep.subr.bf16.mxu0 %v4300_v36  ;;  %v4198_v53 = vpack.c.bf16 %v1854_v1, %v1851_v56  ;;  %v4200_v36 = vpack.c.bf16 %v1861_v38, %v1858_v28  ;;  %v4202_v37 = vpack.c.bf16 %v1860_v29, %v1857_v54  ;;  %v1905_v1 = vld [vmem:[%s7533_s5 + $0x690] sm:$0xff]  ;;  %v1908_v28 = vld [vmem:[%s7533_s5 + $0x6a8] sm:$0xff]  ;;  %v1911_v54 = vld [vmem:[%s7533_s5 + $0x6c0] sm:$0xff] }
 0x4f2   : > { %v1912_v38 = vld [vmem:[%s7533_s5 + $0x6c8] sm:$0xff]  ;;  %v1914_v29 = vld [vmem:[%s7533_s5 + $0x6d8] sm:$0xff] }
 0x4f4   : > { %4179 = vmatpush1.bf16.msra.mxu1 %v4178_v13  ;;  %4303 = vmatpush3.bf16.msra.mxu0 %v4302_v47  ;;  %v1866_v13 = vld [vmem:[%s7533_s5 + $0x558] sm:$0xff] }
 0x4f5   : > { %4181 = vmatprep.subr.bf16.mxu1 %v4180_v48  ;;  %4305 = vmatprep.subr.bf16.mxu0 %v4304_v63  ;;  %v1870_v47 = vld [vmem:[%s7533_s5 + $0x578] sm:$0xff]  ;;  %v4206_v61 = vpack.c.bf16 %v1866_v13, %v1863_v45  ;;  %v1869_v63 = vld [vmem:[%s7533_s5 + $0x570] sm:$0xff]  ;;  %v1920_v13 = vld [vmem:[%s7533_s5 + $0x708] sm:$0xff] }
 0x4f6   : > { %v4208_v48 = vpack.c.bf16 %v1873_v32, %v1870_v47  ;;  %v4210_v50 = vpack.c.bf16 %v1872_v49, %v1869_v63  ;;  %v1917_v45 = vld [vmem:[%s7533_s5 + $0x6f0] sm:$0xff]  ;;  %v1924_v47 = vld [vmem:[%s7533_s5 + $0x728] sm:$0xff]  ;;  %v1927_v32 = vld [vmem:[%s7533_s5 + $0x740] sm:$0xff] }
 0x4f7   : > { %v1923_v63 = vld [vmem:[%s7533_s5 + $0x720] sm:$0xff]  ;;  %v1926_v49 = vld [vmem:[%s7533_s5 + $0x738] sm:$0xff] }
 0x4f8   : > { %4183 = vmatpush1.bf16.msra.mxu1 %v4182_v52  ;;  %4307 = vmatpush3.bf16.msra.mxu0 %v4306_v55  ;;  %v1878_v52 = vld [vmem:[%s7533_s5 + $0x5b8] sm:$0xff] }
 0x4f9   : > { %4185 = vmatprep.subr.bf16.mxu1 %v4184_v4  ;;  %4309 = vmatprep.subr.bf16.mxu0 %v4308_v57  ;;  %v1882_v55 = vld [vmem:[%s7533_s5 + $0x5d8] sm:$0xff]  ;;  %v4214_v4 = vpack.c.bf16 %v1878_v52, %v1875_v40  ;;  %v1895_v40 = vld [vmem:[%s7533_s5 + $0x640] sm:$0xff] }
 0x4fa   : > { %v4216_v57 = vpack.c.bf16 %v1885_v51, %v1882_v55  ;;  %v1898_v52 = vld [vmem:[%s7533_s5 + $0x658] sm:$0xff]  ;;  %v1682_v55 = vpop.permute.xlu0 %1681 }
 0x4fb   : > { %v4316_v51 = vpack.c.bf16 %v1898_v52, %v1895_v40  ;;  %v2443_v40 = vand.u32 31, %v5258_v18  ;;  %v2444_v52 = vand.u32 31, %v5261_v19 }
 0x4fc   : > { %4187 = vmatpush1.bf16.msra.mxu1 %v4186_v0  ;;  %4311 = vmatpush3.bf16.msra.mxu0 %v4310_v46  ;;  %v4220_v0 = vpack.c.bf16 %v1891_v60, %v1888_v11  ;;  %v1887_v46 = vld [vmem:[%s7533_s5 + $0x600] sm:$0xff]  ;;  %v1688_v60 = vsel %vm1481_vm4, %v6364_v15, %v1686_v43  ;;  %v1916_v15 = vld [vmem:[%s7533_s5 + $0x6e8] sm:$0xff] }
 0x4fd   : > { %4189 = vmatprep.subr.bf16.mxu1 %v4188_v2  ;;  %v1890_v2 = vld [vmem:[%s7533_s5 + $0x618] sm:$0xff]  ;;  %vm6619_vm1 = vcmp.lt.s32.totalorder %v2443_v40, 16  ;;  %vm6623_vm6 = vcmp.lt.s32.totalorder %v2444_v52, 16 }
 0x4fe   : > { %v4222_v6 = vpack.c.bf16 %v1890_v2, %v1887_v46  ;;  %v1913_v46 = vld [vmem:[%s7533_s5 + $0x6d0] sm:$0xff] }
 0x4ff   : > { %2321 = vmatmul.mubr.f32.vlgmr.msra.gmra.mrb[20].mxu0 %v6375_v23  ;;  %v4328_v2 = vpack.c.bf16 %v1916_v15, %v1913_v46 }
 0x500   : > { %4191 = vmatpush1.bf16.msra.mxu1 %v4190_v20  ;;  %2325 = vmatprep.mubr.f32.mxu0 %v6386_v9  ;;  %v1896_v20 = vld [vmem:[%s7533_s5 + $0x648] sm:$0xff] }
 0x501   : > { %4193 = vmatprep.subr.bf16.mxu1 %v4192_v21  ;;  %v1900_v21 = vld [vmem:[%s7533_s5 + $0x668] sm:$0xff]  ;;  %v4226_v27 = vpack.c.bf16 %v1896_v20, %v1893_v7 }
 0x502   : > { %v4228_v24 = vpack.c.bf16 %v1903_v10, %v1900_v21  ;;  %v1928_v7 = vld [vmem:[%s7533_s5 + $0x748] sm:$0xff] }
 0x503   : > { %2326 = vmatmul.mubr.f32.gmra.mrb[22].mxu0 %v6397_v31 }
 0x504   : > { %4195 = vmatpush1.bf16.msra.mxu1 %v4194_v26  ;;  %v1902_v26 = vld [vmem:[%s7533_s5 + $0x678] sm:$0xff]  ;;  %3895 = vmatprep.mubr.msk.f32.mxu0 %vm4828_vm8, %v4815_v16 }
 0x505   : > { %4197 = vmatprep.subr.bf16.mxu1 %v4196_v62  ;;  %v1906_v62 = vld [vmem:[%s7533_s5 + $0x698] sm:$0xff] }
 0x508   : > { %4199 = vmatpush1.bf16.msra.mxu1 %v4198_v53  ;;  %v4234_v53 = vpack.c.bf16 %v1908_v28, %v1905_v1 }
 0x509   : > { %4201 = vmatprep.subr.bf16.mxu1 %v4200_v36 }
 0x50c   : > { %4203 = vmatpush1.bf16.msra.mxu1 %v4202_v37  ;;  %v4238_v37 = vpack.c.bf16 %v1914_v29, %v1911_v54 }
 0x50d   : > { %4205 = vmatprep.subr.bf16.mxu1 %v4204_v22  ;;  %v4240_v22 = vpack.c.bf16 %v1921_v44, %v1918_v35 }
 0x510   : > { %4207 = vmatpush1.bf16.msra.mxu1 %v4206_v61  ;;  %v4242_v61 = vpack.c.bf16 %v1920_v13, %v1917_v45 }
 0x511   : > { %4209 = vmatprep.subr.bf16.mxu1 %v4208_v48  ;;  %v4244_v48 = vpack.c.bf16 %v1927_v32, %v1924_v47 }
 0x514   : > { %4211 = vmatpush1.bf16.msra.mxu1 %v4210_v50  ;;  %v4246_v50 = vpack.c.bf16 %v1926_v49, %v1923_v63 }
 0x515   : > { %4213 = vmatprep.subr.bf16.mxu1 %v4212_v30  ;;  %v4312_v30 = vpack.c.bf16 %v1892_v12, %v1889_v33 }
 0x518   : > { %4215 = vmatpush1.bf16.msra.mxu1 %v4214_v4  ;;  %v1687_v4 = vsel %vm1481_vm4, %v6211_v14, %v1682_v55  ;;  %v1907_v14 = vld [vmem:[%s7533_s5 + $0x6a0] sm:$0xff] }
 0x519   : > { %4217 = vmatprep.subr.bf16.mxu1 %v4216_v57  ;;  %v1901_v57 = vld [vmem:[%s7533_s5 + $0x670] sm:$0xff] }
 0x51a   : > { %v4320_v11 = vpack.c.bf16 %v1904_v59, %v1901_v57 }
 0x51c   : > { %4219 = vmatpush1.bf16.msra.mxu1 %v4218_v8  ;;  %v1910_v8 = vld [vmem:[%s7533_s5 + $0x6b8] sm:$0xff] }
 0x51d   : > { %4221 = vmatprep.subr.bf16.mxu1 %v4220_v0  ;;  %v4324_v0 = vpack.c.bf16 %v1910_v8, %v1907_v14 }
 0x51f   : > { %2092 = vmatmul.mubr.f32.vlgmr.msra.gmra.mrb[12].mxu1 %v6375_v23  ;;  %v1909_v23 = vld [vmem:[%s7533_s5 + $0x6b0] sm:$0xff] }
 0x520   : > { %2097 = vmatprep.mubr.f32.mxu1 %v6386_v9  ;;  %4223 = vmatpush1.bf16.msra.mxu1 %v4222_v6  ;;  %v4230_v9 = vpack.c.bf16 %v1902_v26, %v1899_v25  ;;  %v4232_v56 = vpack.c.bf16 %v1909_v23, %v1906_v62  ;;  %v4332_v6 = vpack.c.bf16 %v1922_v5, %v1919_v3  ;;  %v1929_v62 = vld [vmem:[%s7534_s6] sm:$0x7] }
 0x521   : > { %4225 = vmatprep.subr.bf16.mxu1 %v4224_v58  ;;  %v1925_v58 = vld [vmem:[%s7533_s5 + $0x730] sm:$0xff]  ;;  %v1942_v23 = vrot.slane %v1929_v62, %v662_v39  ;;  %v1934_v35 = vrot.slane %v1929_v62, %v5179_v42 }
 0x522   : > { %v4336_v20 = vpack.c.bf16 %v1928_v7, %v1925_v58 }
 0x523   : > { %2098 = vmatmul.mubr.f32.gmra.mrb[14].mxu1 %v6397_v31  ;;  %v1915_v31 = vld [vmem:[%s7533_s5 + $0x6e0] sm:$0xff] }
 0x524   : > { %4227 = vmatpush1.bf16.msra.mxu1 %v4226_v27  ;;  %2168 = vmatprep.mubr.f32.mxu1 %v4815_v16  ;;  %v4236_v36 = vpack.c.bf16 %v1915_v31, %v1912_v38 }
 0x525   : > { %4229 = vmatprep.subr.bf16.mxu1 %v4228_v24 }
 0x528   : > { %4231 = vmatpush1.bf16.msra.mxu1 %v4230_v9 }
 0x529   : > { %4233 = vmatprep.subr.bf16.mxu1 %v4232_v56 }
 0x52c   : > { %4235 = vmatpush1.bf16.msra.mxu1 %v4234_v53 }
 0x52d   : > { %4237 = vmatprep.subr.bf16.mxu1 %v4236_v36 }
 0x530   : > { %4239 = vmatpush1.bf16.msra.mxu1 %v4238_v37 }
 0x531   : > { %4241 = vmatprep.subr.bf16.mxu1 %v4240_v22  ;;  %v1938_v22 = vrot.slane %v1929_v62, %v5176_v41 }
 0x534   : > { %4243 = vmatpush1.bf16.msra.mxu1 %v4242_v61 }
 0x535   : > { %4245 = vmatprep.subr.bf16.mxu1 %v4244_v48 }
 0x538   : > { %4247 = vmatpush1.bf16.msra.mxu1 %v4246_v50 }
 0x539   : > { %4313 = vmatprep.subr.bf16.mxu1 %v4312_v30 }
 0x53b   : > { %3730 = vmatmul.mubr.msk.f32.vlgmr.msra.gmra.mrb[12].mxu1 %vm1063_vm12, %v1687_v4 }
 0x53c   : > { %4315 = vmatpush3.bf16.msra.mxu1 %v4312_v30  ;;  %2174 = vmatprep.mubr.f32.mxu1 %v4815_v16 }
 0x53d   : > { %4317 = vmatprep.subr.bf16.mxu1 %v4316_v51 }
 0x53f   : > { %3731 = vmatmul.mubr.msk.f32.gmra.mrb[14].mxu1 %vm1063_vm12, %v1688_v60 }
 0x540   : > { %4319 = vmatpush3.bf16.msra.mxu1 %v4316_v51  ;;  %3888 = vmatprep.mubr.msk.f32.mxu1 %vm1063_vm12, %v1687_v4 }
 0x541   : > { %4321 = vmatprep.subr.bf16.mxu1 %v4320_v11 }
 0x544   : > { %4323 = vmatpush3.bf16.msra.mxu1 %v4320_v11 }
 0x545   : > { %4325 = vmatprep.subr.bf16.mxu1 %v4324_v0 }
 0x548   : > { %4327 = vmatpush3.bf16.msra.mxu1 %v4324_v0  ;;  %v2442_v0 = vand.u32 31, %v5255_v17 }
 0x549   : > { %4329 = vmatprep.subr.bf16.mxu1 %v4328_v2 }
 0x54a   : > { %vm2445_vm7 = vcmp.lt.s32.totalorder %v2442_v0, 16 }
 0x54c   : > { %4331 = vmatpush3.bf16.msra.mxu1 %v4328_v2 }
 0x54d   : > { %4333 = vmatprep.subr.bf16.mxu1 %v4332_v6 }
 0x550   : > { %4335 = vmatpush3.bf16.msra.mxu1 %v4332_v6 }
 0x551   : > { %4337 = vmatprep.subr.bf16.mxu1 %v4336_v20 }
 0x554   : > { %4339 = vmatpush3.bf16.msra.mxu1 %v4336_v20 }
 0x557   : > { %3889 = vmatmul.mubr.msk.f32.vlgmr.msra.gmra.mrb[16].mxu1 %vm1063_vm12, %v1688_v60 }
 0x558   : > { %2610 = vmatprep.mubr.f32.mxu1 %v4815_v16 }
 0x5b2   : > { %v3783_v21 = vpop.f32.mrb[16].mxu0 }
 0x5b3   : > { %v3784_v10 = vpop.f32.mrb[17].mxu0 }
 0x5b4   : > { %v3785_v27 = vadd.f32 %v3784_v10, %v3783_v21 }
 0x5b6   : > { %v3786_v24 = vpop.f32.mrb[18].mxu0  ;;  %v2248_v1 = vadd.f32 %v3785_v27, %v1942_v23 }
 0x5b7   : > { %v3787_v25 = vpop.f32.mrb[19].mxu0 }
 0x5b8   : > { %v3788_v26 = vadd.f32 %v3787_v25, %v3786_v24 }
 0x5ba   : > { %v2253_v36 = vadd.f32 %v3788_v26, %v1942_v23  ;;  %v4826_v23 = vmov 0.0|0.0  }
 0x5bb   : > { %4346 = vmatprep.subr.bf16.mxu0 %v4826_v23 }
 0x5d2   : > { %v3821_v9 = vpop.f32.mrb[20].mxu0 }
 0x5d3   : > { %v3822_v56 = vpop.f32.mrb[21].mxu0 }
 0x5d4   : > { %v3823_v28 = vadd.f32 %v3822_v56, %v3821_v9 }
 0x5d6   : > { %v3824_v38 = vpop.f32.mrb[22].mxu0  ;;  %v2323_v31 = vadd.f32 %v3823_v28, %v2248_v1 }
 0x5d7   : > { %v3825_v53 = vpop.f32.mrb[23].mxu0 }
 0x5d8   : > { %v3826_v54 = vadd.f32 %v3825_v53, %v3824_v38 }
 0x5da   : > { %v2328_v29 = vadd.f32 %v3826_v54, %v2253_v36 }
 0x60e   : > { %v2170_v44 = vpop.f32.mrb[12].mxu1 }
 0x60f   : > { %v4612_v37 = vadd.f32 %v2170_v44, %v1934_v35  ;;  %v2172_v45 = vpop.f32.mrb[13].mxu1 }
 0x610   : > { %v4613_v39 = vadd.f32 %v2172_v45, %v1938_v22 }
 0x611   : > { %2434 = vrot.lane.b32.xlu0 %v4612_v37, %s7591_s22 }
 0x612   : > { %v2176_v34 = vpop.f32.mrb[14].mxu1 }
 0x613   : > { %v4614_v13 = vadd.f32 %v2176_v34, %v1934_v35  ;;  %v2178_v47 = vpop.f32.mrb[15].mxu1 }
 0x614   : > { %v4615_v32 = vadd.f32 %v2178_v47, %v1938_v22 }
 0x615   : > { %2436 = vrot.lane.b32.xlu1 %v4614_v13, %s7591_s22  ;;  %2414 = vrot.lane.b32.xlu0 %v4613_v39, %s7592_s23 }
 0x619   : > { %2420 = vrot.lane.b32.xlu0 %v4615_v32, %s7592_s23 }
 0x61d   : > { %2412 = vrot.lane.b32.xlu0 %v4612_v37, %s7592_s23 }
 0x62a   : > { %v3890_v61 = vpop.f32.mrb[16].mxu1 }
 0x62b   : > { %v2403_v48 = vadd.f32 %v3890_v61, %v2328_v29  ;;  %v2397_v63 = vpop.f32.mrb[17].mxu1 }
 0x62c   : > { %v2398_v49 = vadd.f32 %v2397_v63, %v2323_v31 }
 0x62d   : > { %2422 = vrot.lane.b32.xlu1 %v2403_v48, %s7592_s23 }
 0x631   : > { %2416 = vrot.lane.b32.xlu1 %v2398_v49, %s7592_s23 }
 0x635   : > { %2418 = vrot.lane.b32.xlu1 %v4614_v13, %s7592_s23 }
 0x683   : > { %v2435_v33 = vpop.permute.xlu0 %2434 }
 0x687   : > { %v2415_v12 = vpop.permute.xlu0 %2414  ;;  %v2437_v50 = vpop.permute.xlu1 %2436 }
 0x68b   : > { %v2421_v30 = vpop.permute.xlu0 %2420 }
 0x68f   : > { %v2413_v43 = vpop.permute.xlu0 %2412 }
 0x690   : > { %v2424_v46 = vsel %vm1063_vm12, %v2413_v43, %v2415_v12  ;;  %v2688_v43 = vld [vmem:[%s7536_s8 + $0x8] sm:$0xff] }
 0x691   : > { %v2448_v58 = vmul.f32 %v4612_v37, %v2424_v46 }
 0x693   : > { %v2454_v25 = vsel %vm2445_vm7, %v2448_v58, %v4612_v37  ;;  %v2694_v58 = vld [vmem:[%s7536_s8 + $0x38] sm:$0xff] }
 0x69f   : > { %v2423_v55 = vpop.permute.xlu1 %2422 }
 0x6a0   : > { %v2427_v51 = vsel %vm1063_vm12, %v2421_v30, %v2423_v55  ;;  %v2441_v4 = vsel %vm1664_vm5, %v2423_v55, %v2437_v50 }
 0x6a1   : > { %v2452_v11 = vmul.f32 %v4615_v32, %v2427_v51  ;;  %v2453_v60 = vmul.f32 %v2441_v4, %v2403_v48  ;;  %v2717_v4 = vld [vmem:[%s7536_s8 + $0xf0] sm:$0xff] }
 0x6a3   : > { %v2417_v14 = vpop.permute.xlu1 %2416  ;;  %v2458_v19 = vsel %vm6619_vm1, %v2452_v11, %v4615_v32  ;;  %v2459_v8 = vsel %vm6623_vm6, %v2453_v60, %v2403_v48  ;;  %v2690_v11 = vld [vmem:[%s7536_s8 + $0x18] sm:$0xff] }
 0x6a4   : > { %v2425_v15 = vsel %vm1063_vm12, %v2415_v12, %v2417_v14  ;;  %v2440_v2 = vsel %vm1664_vm5, %v2417_v14, %v2435_v33  ;;  %v4727_v3 = vpack.i.bf16 %v2459_v8, %v2458_v19  ;;  %vm3538_vm5 = vcmp.lt.s32.totalorder %v5255_v17, 16 }
 0x6a5   : > { %v2449_v5 = vmul.f32 %v4613_v39, %v2425_v15  ;;  %v2450_v6 = vmul.f32 %v2440_v2, %v2398_v49  ;;  %v4350_v15 = vpack.c.bf16 %v2690_v11, %v2688_v43  ;;  %v2687_v2 = vld [vmem:[%s7536_s8] sm:$0xff] }
 0x6a6   : > { %4728 = vrot.lane.b32.xlu1 %v4727_v3, %s7561_s21  ;;  %v2689_v3 = vld [vmem:[%s7536_s8 + $0x10] sm:$0xff] }
 0x6a7   : > { %v2419_v7 = vpop.permute.xlu1 %2418  ;;  %v2455_v20 = vsel %vm6619_vm1, %v2449_v5, %v4613_v39  ;;  %v2456_v21 = vsel %vm6623_vm6, %v2450_v6, %v2398_v49  ;;  %v2692_v6 = vld [vmem:[%s7536_s8 + $0x28] sm:$0xff] }
 0x6a8   : > { %v2426_v10 = vsel %vm1063_vm12, %v2419_v7, %v2421_v30  ;;  %v4732_v27 = vpack.i.bf16 %v2456_v21, %v2455_v20  ;;  %vm6656_vm12 = vmpackc.low %vm2536_vm11, %vm4822_vm15 }
 0x6a9   : > { %v2451_v24 = vmul.f32 %v4614_v13, %v2426_v10  ;;  %v4354_v10 = vpack.c.bf16 %v2694_v58, %v2692_v6 }
 0x6aa   : > { %4733 = vrot.lane.b32.xlu0 %v4732_v27, %s7561_s21  ;;  %v2691_v27 = vld [vmem:[%s7536_s8 + $0x20] sm:$0xff] }
 0x6ab   : > { %v2457_v26 = vsel %vm2445_vm7, %v2451_v24, %v4614_v13  ;;  %v2693_v24 = vld [vmem:[%s7536_s8 + $0x30] sm:$0xff] }
 0x6ac   : > { %v4742_v62 = vpack.i.bf16 %v2457_v26, %v2454_v25 }
 0x6ae   : > { %4743 = vrot.lane.b32.xlu1 %v4742_v62, %s7563_s19  ;;  %4738 = vrot.lane.b32.xlu0 %v4742_v62, %s7561_s21  ;;  %v4356_v62 = vpack.c.bf16 %v2693_v24, %v2691_v27  ;;  %s7599_s21 = smov 32  }
 0x718   : > { %v4729_v9 = vpop.permute.xlu1 %4728 }
 0x719   : > { %v4731_v56 = vunpack.i.h.bf16 %v4729_v9  ;;  %v4730_v1 = vunpack.i.l.bf16 %v4729_v9 }
 0x71b   : > { %v2482_v28 = vsel %vm2478_vm9, %v4730_v1, %v4731_v56 }
 0x71c   : > { %v2502_v38 = vmax.f32 %v2458_v19, %v2482_v28  ;;  %v4734_v31 = vpop.permute.xlu0 %4733  ;;  %v2700_v28 = vld [vmem:[%s7536_s8 + $0x68] sm:$0xff] }
 0x71d   : > { %v4736_v53 = vunpack.i.h.bf16 %v4734_v31  ;;  %v4735_v36 = vunpack.i.l.bf16 %v4734_v31 }
 0x71e   : > { %v2514_v29 = vrot.slane %v2502_v38, 1 }
 0x71f   : > { %v2480_v54 = vsel %vm2478_vm9, %v4735_v36, %v4736_v53 }
 0x720   : > { %v2499_v35 = vmax.f32 %v2455_v20, %v2480_v54  ;;  %v4744_v44 = vpop.permute.xlu1 %4743  ;;  %v4739_v37 = vpop.permute.xlu0 %4738  ;;  %v2529_v50 = vmax.f32 %v2502_v38, %v2514_v29  ;;  %v4352_v20 = vpack.c.bf16 %v2689_v3, %v2687_v2  ;;  %v2702_v38 = vld [vmem:[%s7536_s8 + $0x78] sm:$0xff]  ;;  %v2701_v54 = vld [vmem:[%s7536_s8 + $0x70] sm:$0xff]  ;;  %v2728_v3 = vld [vmem:[%s7536_s8 + $0x148] sm:$0xff] }
 0x721   : > { %v4746_v22 = vunpack.i.h.bf16 %v4744_v44  ;;  %v4745_v45 = vunpack.i.l.bf16 %v4744_v44  ;;  %v4741_v34 = vunpack.i.h.bf16 %v4739_v37  ;;  %v4740_v39 = vunpack.i.l.bf16 %v4739_v37  ;;  %v2725_v2 = vld [vmem:[%s7536_s8 + $0x130] sm:$0xff] }
 0x722   : > { %v2513_v13 = vrot.slane %v2499_v35, 1 }
 0x723   : > { %v2497_v47 = vsel %vm2495_vm10, %v4731_v56, %v4746_v22  ;;  %v2496_v32 = vsel %vm2495_vm10, %v4736_v53, %v4745_v45  ;;  %v2481_v61 = vsel %vm2478_vm9, %v4741_v34, %v4730_v1  ;;  %v2479_v48 = vsel %vm2478_vm9, %v4740_v39, %v4735_v36  ;;  %v2695_v56 = vld [vmem:[%s7536_s8 + $0x40] sm:$0xff]  ;;  %v2697_v1 = vld [vmem:[%s7536_s8 + $0x50] sm:$0xff]  ;;  %v2708_v34 = vld [vmem:[%s7536_s8 + $0xa8] sm:$0xff] }
 0x724   : > { %v2515_v63 = vsel %vm556_vm0, %v2513_v13, %v2514_v29  ;;  %v2503_v49 = vmax.f32 %v2459_v8, %v2497_v47  ;;  %v2500_v33 = vmax.f32 %v2456_v21, %v2496_v32  ;;  %v2501_v12 = vmax.f32 %v2457_v26, %v2481_v61  ;;  %v2531_v21 = vld [vmem:[%s7535_s7] sm:$0x1f]  ;;  %v2698_v26 = vld [vmem:[%s7536_s8 + $0x58] sm:$0xff]  ;;  %v2704_v29 = vld [vmem:[%s7536_s8 + $0x88] sm:$0xff] }
 0x725   : > { %v2526_v30 = vmax.f32 %v2499_v35, %v2515_v63  ;;  %v2498_v40 = vmax.f32 %v2454_v25, %v2479_v48  ;;  %v2696_v25 = vld [vmem:[%s7536_s8 + $0x48] sm:$0xff]  ;;  %v4360_v31 = vpack.c.bf16 %v2697_v1, %v2695_v56  ;;  %v4362_v53 = vpack.c.bf16 %v2702_v38, %v2700_v28  ;;  %v2699_v36 = vld [vmem:[%s7536_s8 + $0x60] sm:$0xff]  ;;  %v2706_v35 = vld [vmem:[%s7536_s8 + $0x98] sm:$0xff] }
 0x726   : > { %v2517_v52 = vrot.slane %v2503_v49, 1  ;;  %v2516_v55 = vrot.slane %v2500_v33, 1  ;;  %v2511_v51 = vrot.slane %v2501_v12, 1  ;;  %v4358_v9 = vpack.c.bf16 %v2698_v26, %v2696_v25  ;;  %v2703_v22 = vld [vmem:[%s7536_s8 + $0x80] sm:$0xff]  ;;  %v2705_v45 = vld [vmem:[%s7536_s8 + $0x90] sm:$0xff]  ;;  %v2710_v39 = vld [vmem:[%s7536_s8 + $0xb8] sm:$0xff] }
 0x727   : > { %v2510_v57 = vrot.slane %v2498_v40, 1  ;;  %v4340_v59 = vpack.c.bf16 %v2529_v50, %v2526_v30  ;;  %v4364_v44 = vpack.c.bf16 %v2701_v54, %v2699_v36  ;;  %v4366_v37 = vpack.c.bf16 %v2706_v35, %v2704_v29  ;;  %v2707_v32 = vld [vmem:[%s7536_s8 + $0xa0] sm:$0xff]  ;;  %v2709_v61 = vld [vmem:[%s7536_s8 + $0xb0] sm:$0xff]  ;;  %v2712_v48 = vld [vmem:[%s7536_s8 + $0xc8] sm:$0xff] }
 0x728   : > { %v2530_v60 = vmax.f32 %v2503_v49, %v2517_v52  ;;  %v2518_v14 = vsel %vm556_vm0, %v2516_v55, %v2517_v52  ;;  %v2528_v19 = vmax.f32 %v2501_v12, %v2511_v51  ;;  %v4368_v13 = vpack.c.bf16 %v2705_v45, %v2703_v22  ;;  %v2714_v63 = vld [vmem:[%s7536_s8 + $0xd8] sm:$0xff]  ;;  %v2711_v12 = vld [vmem:[%s7536_s8 + $0xc0] sm:$0xff]  ;;  %v2713_v50 = vld [vmem:[%s7536_s8 + $0xd0] sm:$0xff] }
 0x729   : > { %v2527_v8 = vmax.f32 %v2500_v33, %v2518_v14  ;;  %v2512_v0 = vsel %vm556_vm0, %v2510_v57, %v2511_v51  ;;  %4342 = vmatprep.subr.msk.bf16.mxu1 %vm6656_vm12, %v4340_v59  ;;  %vm2532_vm0 = vcmask 80896   ;;  %v4370_v47 = vpack.c.bf16 %v2710_v39, %v2708_v34  ;;  %v2716_v30 = vld [vmem:[%s7536_s8 + $0xe8] sm:$0xff]  ;;  %v2715_v51 = vld [vmem:[%s7536_s8 + $0xe0] sm:$0xff]  ;;  %v2722_v59 = vld [vmem:[%s7536_s8 + $0x118] sm:$0xff] }
 0x72a   : > { %v2525_v46 = vmax.f32 %v2498_v40, %v2512_v0  ;;  %v4372_v49 = vpack.c.bf16 %v2709_v61, %v2707_v32  ;;  %v4374_v33 = vpack.c.bf16 %v2714_v63, %v2712_v48  ;;  %v2718_v40 = vld [vmem:[%s7536_s8 + $0xf8] sm:$0xff]  ;;  %v4376_v52 = vpack.c.bf16 %v2713_v50, %v2711_v12  ;;  %v2720_v57 = vld [vmem:[%s7536_s8 + $0x108] sm:$0xff]  ;;  %v2721_v14 = vld [vmem:[%s7536_s8 + $0x110] sm:$0xff] }
 0x72b   : > { %v4347_v5 = vpack.c.bf16 %v2530_v60, %v2527_v8  ;;  %v4378_v55 = vpack.c.bf16 %v2718_v40, %v2716_v30  ;;  %v4380_v43 = vpack.c.bf16 %v2717_v4, %v2715_v51  ;;  %v4382_v11 = vpack.c.bf16 %v2722_v59, %v2720_v57  ;;  %v2719_v60 = vld [vmem:[%s7536_s8 + $0x100] sm:$0xff]  ;;  %v2726_v8 = vld [vmem:[%s7536_s8 + $0x138] sm:$0xff]  ;;  %v2733_v26 = vld [vmem:[%s7536_s8 + $0x170] sm:$0xff] }
 0x72c   : > { %v4343_v7 = vpack.c.bf16 %v2528_v19, %v2525_v46  ;;  %v2724_v19 = vld [vmem:[%s7536_s8 + $0x128] sm:$0xff]  ;;  %v4384_v0 = vpack.c.bf16 %v2721_v14, %v2719_v60  ;;  %v2731_v25 = vld [vmem:[%s7536_s8 + $0x160] sm:$0xff]  ;;  %v2737_v38 = vld [vmem:[%s7536_s8 + $0x190] sm:$0xff] }
 0x72d   : > { %4349 = vmatpush3.bf16.msk.msra.mxu0 %vm6656_vm12, %v4347_v5  ;;  %v4386_v46 = vpack.c.bf16 %v2726_v8, %v2724_v19  ;;  %v2730_v5 = vld [vmem:[%s7536_s8 + $0x158] sm:$0xff]  ;;  %v4396_v56 = vpack.c.bf16 %v2733_v26, %v2731_v25  ;;  %v2735_v28 = vld [vmem:[%s7536_s8 + $0x180] sm:$0xff]  ;;  %v2741_v35 = vld [vmem:[%s7536_s8 + $0x1b0] sm:$0xff] }
 0x72e   : > { %4345 = vmatpush1.bf16.msk.msra.mxu1 %vm6656_vm12, %v4343_v7  ;;  %4351 = vmatprep.subr.bf16.mxu0 %v4350_v15  ;;  %v2723_v15 = vld [vmem:[%s7536_s8 + $0x120] sm:$0xff]  ;;  %v4390_v58 = vpack.c.bf16 %v2730_v5, %v2728_v3  ;;  %v4400_v36 = vpack.c.bf16 %v2737_v38, %v2735_v28  ;;  %v2745_v39 = vld [vmem:[%s7536_s8 + $0x1d0] sm:$0xff]  ;;  %v2754_v12 = vld [vmem:[%s7536_s8 + $0x218] sm:$0xff] }
 0x72f   : > { %v4388_v6 = vpack.c.bf16 %v2725_v2, %v2723_v15  ;;  %v2727_v7 = vld [vmem:[%s7536_s8 + $0x140] sm:$0xff]  ;;  %v2749_v63 = vld [vmem:[%s7536_s8 + $0x1f0] sm:$0xff]  ;;  %v2760_v19 = vld [vmem:[%s7536_s8 + $0x248] sm:$0xff] }
 0x730   : > { %3896 = vmatmul.mubr.msk.f32.vlgmr.msra.gmra.mrb[24].mxu0 %vm2532_vm0, %v2531_v21  ;;  %v2739_v29 = vld [vmem:[%s7536_s8 + $0x1a0] sm:$0xff]  ;;  %v2753_v40 = vld [vmem:[%s7536_s8 + $0x210] sm:$0xff]  ;;  %v2762_v8 = vld [vmem:[%s7536_s8 + $0x258] sm:$0xff] }
 0x731   : > { %3736 = vmatmul.mubr.msk.f32.vlgmr.msra.gmra.mrb[18].mxu1 %vm2532_vm0, %v2531_v21  ;;  %4353 = vmatpush1.bf16.msra.mxu0 %v4352_v20  ;;  %v2729_v20 = vld [vmem:[%s7536_s8 + $0x150] sm:$0xff]  ;;  %v2732_v21 = vld [vmem:[%s7536_s8 + $0x168] sm:$0xff]  ;;  %v4404_v22 = vpack.c.bf16 %v2741_v35, %v2739_v29  ;;  %v2743_v34 = vld [vmem:[%s7536_s8 + $0x1c0] sm:$0xff] }
 0x732   : > { %4355 = vmatprep.subr.bf16.mxu0 %v4354_v10  ;;  %v2734_v10 = vld [vmem:[%s7536_s8 + $0x178] sm:$0xff]  ;;  %v4392_v27 = vpack.c.bf16 %v2729_v20, %v2727_v7  ;;  %v4408_v32 = vpack.c.bf16 %v2745_v39, %v2743_v34  ;;  %v2747_v48 = vld [vmem:[%s7536_s8 + $0x1e0] sm:$0xff]  ;;  %v2757_v14 = vld [vmem:[%s7536_s8 + $0x230] sm:$0xff] }
 0x733   : > { %v4394_v24 = vpack.c.bf16 %v2734_v10, %v2732_v21  ;;  %v2751_v30 = vld [vmem:[%s7536_s8 + $0x200] sm:$0xff]  ;;  %v2761_v2 = vld [vmem:[%s7536_s8 + $0x250] sm:$0xff]  ;;  %v2764_v3 = vld [vmem:[%s7536_s8 + $0x268] sm:$0xff] }
 0x734   : > { %v4416_v57 = vpack.c.bf16 %v2753_v40, %v2751_v30  ;;  %v2755_v60 = vld [vmem:[%s7536_s8 + $0x220] sm:$0xff]  ;;  %v2766_v5 = vld [vmem:[%s7536_s8 + $0x278] sm:$0xff]  ;;  %v2765_v20 = vld [vmem:[%s7536_s8 + $0x270] sm:$0xff] }
 0x735   : > { %4357 = vmatpush1.bf16.msra.mxu0 %v4356_v62  ;;  %v2736_v62 = vld [vmem:[%s7536_s8 + $0x188] sm:$0xff]  ;;  %v2759_v15 = vld [vmem:[%s7536_s8 + $0x240] sm:$0xff]  ;;  %v2770_v10 = vld [vmem:[%s7536_s8 + $0x298] sm:$0xff] }
 0x736   : > { %4359 = vmatprep.subr.bf16.mxu0 %v4358_v9  ;;  %v2738_v9 = vld [vmem:[%s7536_s8 + $0x198] sm:$0xff]  ;;  %v2763_v7 = vld [vmem:[%s7536_s8 + $0x260] sm:$0xff]  ;;  %v2768_v21 = vld [vmem:[%s7536_s8 + $0x288] sm:$0xff] }
 0x737   : > { %v4398_v1 = vpack.c.bf16 %v2738_v9, %v2736_v62  ;;  %v2767_v25 = vld [vmem:[%s7536_s8 + $0x280] sm:$0xff]  ;;  %v2769_v26 = vld [vmem:[%s7536_s8 + $0x290] sm:$0xff]  ;;  %v2772_v62 = vld [vmem:[%s7536_s8 + $0x2a8] sm:$0xff] }
 0x738   : > { %v2774_v9 = vld [vmem:[%s7536_s8 + $0x2b8] sm:$0xff]  ;;  %v2771_v28 = vld [vmem:[%s7536_s8 + $0x2a0] sm:$0xff]  ;;  %v2773_v38 = vld [vmem:[%s7536_s8 + $0x2b0] sm:$0xff] }
 0x739   : > { %4361 = vmatpush1.bf16.msra.mxu0 %v4360_v31  ;;  %v2740_v31 = vld [vmem:[%s7536_s8 + $0x1a8] sm:$0xff]  ;;  %v2945_v35 = vld [vmem:[%s7537_s9 + $0x10] sm:$0xff]  ;;  %v2947_v34 = vld [vmem:[%s7537_s9 + $0x20] sm:$0xff] }
 0x73a   : > { %4363 = vmatprep.subr.bf16.mxu0 %v4362_v53  ;;  %v2742_v53 = vld [vmem:[%s7536_s8 + $0x1b8] sm:$0xff]  ;;  %v2949_v39 = vld [vmem:[%s7537_s9 + $0x30] sm:$0xff]  ;;  %v2955_v30 = vld [vmem:[%s7537_s9 + $0x60] sm:$0xff] }
 0x73b   : > { %v4402_v54 = vpack.c.bf16 %v2742_v53, %v2740_v31  ;;  %v4436_v31 = vpack.c.bf16 %v2773_v38, %v2771_v28  ;;  %v2944_v53 = vld [vmem:[%s7537_s9 + $0x8] sm:$0xff]  ;;  %v2957_v40 = vld [vmem:[%s7537_s9 + $0x70] sm:$0xff] }
 0x73d   : > { %4365 = vmatpush1.bf16.msra.mxu0 %v4364_v44  ;;  %v2744_v44 = vld [vmem:[%s7536_s8 + $0x1c8] sm:$0xff] }
 0x73e   : > { %4367 = vmatprep.subr.bf16.mxu0 %v4366_v37  ;;  %v2746_v37 = vld [vmem:[%s7536_s8 + $0x1d8] sm:$0xff] }
 0x73f   : > { %v4406_v45 = vpack.c.bf16 %v2746_v37, %v2744_v44  ;;  %v2948_v44 = vld [vmem:[%s7537_s9 + $0x28] sm:$0xff]  ;;  %v2950_v37 = vld [vmem:[%s7537_s9 + $0x38] sm:$0xff] }
 0x741   : > { %4369 = vmatpush1.bf16.msra.mxu0 %v4368_v13  ;;  %v2748_v13 = vld [vmem:[%s7536_s8 + $0x1e8] sm:$0xff] }
 0x742   : > { %4371 = vmatprep.subr.bf16.mxu0 %v4370_v47  ;;  %v2750_v47 = vld [vmem:[%s7536_s8 + $0x1f8] sm:$0xff] }
 0x743   : > { %v4410_v61 = vpack.c.bf16 %v2750_v47, %v2748_v13  ;;  %v2952_v13 = vld [vmem:[%s7537_s9 + $0x48] sm:$0xff]  ;;  %v2954_v47 = vld [vmem:[%s7537_s9 + $0x58] sm:$0xff] }
 0x745   : > { %4373 = vmatpush1.bf16.msra.mxu0 %v4372_v49  ;;  %v4412_v49 = vpack.c.bf16 %v2749_v63, %v2747_v48  ;;  %v2951_v48 = vld [vmem:[%s7537_s9 + $0x40] sm:$0xff]  ;;  %v2953_v63 = vld [vmem:[%s7537_s9 + $0x50] sm:$0xff] }
 0x746   : > { %4375 = vmatprep.subr.bf16.mxu0 %v4374_v33  ;;  %v2752_v33 = vld [vmem:[%s7536_s8 + $0x208] sm:$0xff] }
 0x747   : > { %v4414_v50 = vpack.c.bf16 %v2754_v12, %v2752_v33  ;;  %v2958_v33 = vld [vmem:[%s7537_s9 + $0x78] sm:$0xff]  ;;  %v4448_v12 = vpack.c.bf16 %v2953_v63, %v2951_v48 }
 0x749   : > { %4377 = vmatpush1.bf16.msra.mxu0 %v4376_v52  ;;  %v2756_v52 = vld [vmem:[%s7536_s8 + $0x228] sm:$0xff] }
 0x74a   : > { %4379 = vmatprep.subr.bf16.mxu0 %v4378_v55  ;;  %v2758_v55 = vld [vmem:[%s7536_s8 + $0x238] sm:$0xff] }
 0x74d   : > { %4381 = vmatpush1.bf16.msra.mxu0 %v4380_v43 }
 0x74e   : > { %4383 = vmatprep.subr.bf16.mxu0 %v4382_v11  ;;  %v4418_v11 = vpack.c.bf16 %v2758_v55, %v2756_v52  ;;  %v2960_v52 = vld [vmem:[%s7537_s9 + $0x88] sm:$0xff]  ;;  %v2962_v55 = vld [vmem:[%s7537_s9 + $0x98] sm:$0xff] }
 0x751   : > { %4385 = vmatpush1.bf16.msra.mxu0 %v4384_v0  ;;  %v4420_v0 = vpack.c.bf16 %v2757_v14, %v2755_v60 }
 0x752   : > { %4387 = vmatprep.subr.bf16.mxu0 %v4386_v46  ;;  %v4422_v46 = vpack.c.bf16 %v2762_v8, %v2760_v19  ;;  %v2963_v19 = vld [vmem:[%s7537_s9 + $0xa0] sm:$0xff]  ;;  %v2965_v8 = vld [vmem:[%s7537_s9 + $0xb0] sm:$0xff] }
 0x755   : > { %4389 = vmatpush1.bf16.msra.mxu0 %v4388_v6  ;;  %v4424_v6 = vpack.c.bf16 %v2761_v2, %v2759_v15  ;;  %v4460_v15 = vpack.c.bf16 %v2965_v8, %v2963_v19 }
 0x756   : > { %4391 = vmatprep.subr.bf16.mxu0 %v4390_v58  ;;  %v4426_v58 = vpack.c.bf16 %v2766_v5, %v2764_v3  ;;  %v2967_v3 = vld [vmem:[%s7537_s9 + $0xc0] sm:$0xff]  ;;  %v2969_v5 = vld [vmem:[%s7537_s9 + $0xd0] sm:$0xff] }
 0x759   : > { %4393 = vmatpush1.bf16.msra.mxu0 %v4392_v27  ;;  %v4428_v27 = vpack.c.bf16 %v2765_v20, %v2763_v7  ;;  %v4464_v7 = vpack.c.bf16 %v2969_v5, %v2967_v3  ;;  %v3010_v3 = vld [vmem:[%s7537_s9 + $0x218] sm:$0xff] }
 0x75a   : > { %4395 = vmatprep.subr.bf16.mxu0 %v4394_v24  ;;  %v4430_v24 = vpack.c.bf16 %v2770_v10, %v2768_v21  ;;  %v2971_v21 = vld [vmem:[%s7537_s9 + $0xe0] sm:$0xff]  ;;  %v2973_v10 = vld [vmem:[%s7537_s9 + $0xf0] sm:$0xff] }
 0x75d   : > { %4397 = vmatpush1.bf16.msra.mxu0 %v4396_v56  ;;  %v4432_v56 = vpack.c.bf16 %v2769_v26, %v2767_v25  ;;  %v4468_v25 = vpack.c.bf16 %v2973_v10, %v2971_v21 }
 0x75e   : > { %4399 = vmatprep.subr.bf16.mxu0 %v4398_v1  ;;  %v4434_v1 = vpack.c.bf16 %v2774_v9, %v2772_v62  ;;  %v2975_v62 = vld [vmem:[%s7537_s9 + $0x100] sm:$0xff]  ;;  %v2977_v9 = vld [vmem:[%s7537_s9 + $0x110] sm:$0xff] }
 0x75f   : > { %v4472_v28 = vpack.c.bf16 %v2977_v9, %v2975_v62  ;;  %v3012_v62 = vld [vmem:[%s7537_s9 + $0x228] sm:$0xff]  ;;  %v3014_v9 = vld [vmem:[%s7537_s9 + $0x238] sm:$0xff] }
 0x761   : > { %4401 = vmatpush1.bf16.msra.mxu0 %v4400_v36  ;;  %v2946_v36 = vld [vmem:[%s7537_s9 + $0x18] sm:$0xff] }
 0x762   : > { %4403 = vmatprep.subr.bf16.mxu0 %v4402_v54  ;;  %v2943_v54 = vld [vmem:[%s7537_s9] sm:$0xff]  ;;  %v4438_v29 = vpack.c.bf16 %v2946_v36, %v2944_v53  ;;  %v2981_v53 = vld [vmem:[%s7537_s9 + $0x130] sm:$0xff]  ;;  %v2984_v36 = vld [vmem:[%s7537_s9 + $0x148] sm:$0xff] }
 0x764   : > { %4439 = vmatprep.subr.bf16.mxu1 %v4438_v29 }
 0x765   : > { %4405 = vmatpush1.bf16.msra.mxu0 %v4404_v22  ;;  %v4440_v22 = vpack.c.bf16 %v2945_v35, %v2943_v54  ;;  %v2986_v54 = vld [vmem:[%s7537_s9 + $0x158] sm:$0xff] }
 0x766   : > { %4407 = vmatprep.subr.bf16.mxu0 %v4406_v45  ;;  %v4442_v45 = vpack.c.bf16 %v2950_v37, %v2948_v44  ;;  %v4478_v35 = vpack.c.bf16 %v2986_v54, %v2984_v36  ;;  %v2983_v44 = vld [vmem:[%s7537_s9 + $0x140] sm:$0xff]  ;;  %v2985_v37 = vld [vmem:[%s7537_s9 + $0x150] sm:$0xff]  ;;  %v3016_v54 = vld [vmem:[%s7537_s9 + $0x248] sm:$0xff] }
 0x767   : > { %4441 = vmatpush1.bf16.msra.mxu1 %v4440_v22  ;;  %v2988_v22 = vld [vmem:[%s7537_s9 + $0x168] sm:$0xff]  ;;  %v3013_v36 = vld [vmem:[%s7537_s9 + $0x230] sm:$0xff] }
 0x768   : > { %4443 = vmatprep.subr.bf16.mxu1 %v4442_v45  ;;  %v2990_v45 = vld [vmem:[%s7537_s9 + $0x178] sm:$0xff] }
 0x769   : > { %4409 = vmatpush1.bf16.msra.mxu0 %v4408_v32  ;;  %v4444_v32 = vpack.c.bf16 %v2949_v39, %v2947_v34  ;;  %v4480_v34 = vpack.c.bf16 %v2985_v37, %v2983_v44  ;;  %v4482_v39 = vpack.c.bf16 %v2990_v45, %v2988_v22  ;;  %v3015_v45 = vld [vmem:[%s7537_s9 + $0x240] sm:$0xff] }
 0x76a   : > { %4411 = vmatprep.subr.bf16.mxu0 %v4410_v61  ;;  %v4446_v61 = vpack.c.bf16 %v2954_v47, %v2952_v13  ;;  %v2987_v13 = vld [vmem:[%s7537_s9 + $0x160] sm:$0xff]  ;;  %v2989_v47 = vld [vmem:[%s7537_s9 + $0x170] sm:$0xff] }
 0x76b   : > { %4445 = vmatpush1.bf16.msra.mxu1 %v4444_v32  ;;  %v2992_v32 = vld [vmem:[%s7537_s9 + $0x188] sm:$0xff]  ;;  %v4484_v48 = vpack.c.bf16 %v2989_v47, %v2987_v13  ;;  %v3022_v47 = vld [vmem:[%s7537_s9 + $0x278] sm:$0xff] }
 0x76c   : > { %4447 = vmatprep.subr.bf16.mxu1 %v4446_v61  ;;  %v2994_v61 = vld [vmem:[%s7537_s9 + $0x198] sm:$0xff]  ;;  %v3020_v13 = vld [vmem:[%s7537_s9 + $0x268] sm:$0xff] }
 0x76d   : > { %4413 = vmatpush1.bf16.msra.mxu0 %v4412_v49  ;;  %v2956_v49 = vld [vmem:[%s7537_s9 + $0x68] sm:$0xff]  ;;  %v4486_v63 = vpack.c.bf16 %v2994_v61, %v2992_v32  ;;  %v4514_v61 = vpack.c.bf16 %v3022_v47, %v3020_v13  ;;  %v3058_v13 = vld [vmem:[%s7537_s9 + $0x398] sm:$0xff] }
 0x76e   : > { %4415 = vmatprep.subr.bf16.mxu0 %v4414_v50  ;;  %v4450_v50 = vpack.c.bf16 %v2958_v33, %v2956_v49  ;;  %v2991_v49 = vld [vmem:[%s7537_s9 + $0x180] sm:$0xff]  ;;  %v2993_v33 = vld [vmem:[%s7537_s9 + $0x190] sm:$0xff] }
 0x76f   : > { %4449 = vmatpush1.bf16.msra.mxu1 %v4448_v12  ;;  %v2996_v12 = vld [vmem:[%s7537_s9 + $0x1a8] sm:$0xff] }
 0x770   : > { %4451 = vmatprep.subr.bf16.mxu1 %v4450_v50  ;;  %v2998_v50 = vld [vmem:[%s7537_s9 + $0x1b8] sm:$0xff] }
 0x803   : > { %v2683_v51 = vpop.f32.mrb[24].mxu0 }
 0x804   : > { %v2612_v4 = vpop.f32.mrb[18].mxu1  ;;  %v3897_v59 = vpop.f32.mrb[25].mxu0 }
 0x805   : > { %v2614_v43 = vpop.f32.mrb[19].mxu1  ;;  %v2961_v59 = vld [vmem:[%s7537_s9 + $0x90] sm:$0xff] }
 0x806   : > { %2842 = vmatprep.mubr.f32.mxu0 %v2614_v43  ;;  %v2964_v43 = vld [vmem:[%s7537_s9 + $0xa8] sm:$0xff] }
 0x807   : > { %2843 = vmatmul.mubr.f32.vlgmr.msra.gmra.mrb[26].mxu0 %v2612_v4  ;;  %v4454_v4 = vpack.c.bf16 %v2962_v55, %v2960_v52  ;;  %v2995_v52 = vld [vmem:[%s7537_s9 + $0x1a0] sm:$0xff]  ;;  %v2997_v55 = vld [vmem:[%s7537_s9 + $0x1b0] sm:$0xff] }
 0x808   : > { %4417 = vmatpush1.bf16.msra.mxu0 %v4416_v57  ;;  %2913 = vmatprep.mubr.f32.mxu0 %v4815_v16  ;;  %v2959_v57 = vld [vmem:[%s7537_s9 + $0x80] sm:$0xff] }
 0x809   : > { %4419 = vmatprep.subr.bf16.mxu0 %v4418_v11  ;;  %v2966_v11 = vld [vmem:[%s7537_s9 + $0xb8] sm:$0xff]  ;;  %v4456_v60 = vpack.c.bf16 %v2961_v59, %v2959_v57  ;;  %v4492_v57 = vpack.c.bf16 %v2997_v55, %v2995_v52  ;;  %v3028_v52 = vld [vmem:[%s7537_s9 + $0x2a8] sm:$0xff] }
 0x80a   : > { %v4458_v14 = vpack.c.bf16 %v2966_v11, %v2964_v43  ;;  %v2999_v43 = vld [vmem:[%s7537_s9 + $0x1c0] sm:$0xff]  ;;  %v3001_v11 = vld [vmem:[%s7537_s9 + $0x1d0] sm:$0xff]  ;;  %v3030_v55 = vld [vmem:[%s7537_s9 + $0x2b8] sm:$0xff] }
 0x80b   : > { %v4496_v19 = vpack.c.bf16 %v3001_v11, %v2999_v43  ;;  %v3032_v43 = vld [vmem:[%s7537_s9 + $0x2c8] sm:$0xff]  ;;  %v3034_v11 = vld [vmem:[%s7537_s9 + $0x2d8] sm:$0xff] }
 0x80c   : > { %4421 = vmatpush1.bf16.msra.mxu0 %v4420_v0  ;;  %v2968_v0 = vld [vmem:[%s7537_s9 + $0xc8] sm:$0xff] }
 0x80d   : > { %4423 = vmatprep.subr.bf16.mxu0 %v4422_v46  ;;  %v2970_v46 = vld [vmem:[%s7537_s9 + $0xd8] sm:$0xff] }
 0x80e   : > { %v4462_v2 = vpack.c.bf16 %v2970_v46, %v2968_v0  ;;  %v3003_v0 = vld [vmem:[%s7537_s9 + $0x1e0] sm:$0xff]  ;;  %v3005_v46 = vld [vmem:[%s7537_s9 + $0x1f0] sm:$0xff] }
 0x810   : > { %4425 = vmatpush1.bf16.msra.mxu0 %v4424_v6  ;;  %v2972_v6 = vld [vmem:[%s7537_s9 + $0xe8] sm:$0xff] }
 0x811   : > { %4427 = vmatprep.subr.bf16.mxu0 %v4426_v58  ;;  %v2974_v58 = vld [vmem:[%s7537_s9 + $0xf8] sm:$0xff] }
 0x812   : > { %v4466_v20 = vpack.c.bf16 %v2974_v58, %v2972_v6 }
 0x814   : > { %4429 = vmatpush1.bf16.msra.mxu0 %v4428_v27  ;;  %v2976_v27 = vld [vmem:[%s7537_s9 + $0x108] sm:$0xff] }
 0x815   : > { %4431 = vmatprep.subr.bf16.mxu0 %v4430_v24  ;;  %v2978_v24 = vld [vmem:[%s7537_s9 + $0x118] sm:$0xff] }
 0x816   : > { %v4470_v26 = vpack.c.bf16 %v2978_v24, %v2976_v27 }
 0x818   : > { %4433 = vmatpush1.bf16.msra.mxu0 %v4432_v56  ;;  %v2980_v56 = vld [vmem:[%s7537_s9 + $0x128] sm:$0xff] }
 0x819   : > { %4435 = vmatprep.subr.bf16.mxu0 %v4434_v1  ;;  %v2982_v1 = vld [vmem:[%s7537_s9 + $0x138] sm:$0xff] }
 0x81a   : > { %v4474_v38 = vpack.c.bf16 %v2982_v1, %v2980_v56 }
 0x81c   : > { %4437 = vmatpush1.bf16.msra.mxu0 %v4436_v31  ;;  %v2979_v31 = vld [vmem:[%s7537_s9 + $0x120] sm:$0xff] }
 0x81d   : > { %v4476_v29 = vpack.c.bf16 %v2981_v53, %v2979_v31  ;;  %v4506_v31 = vpack.c.bf16 %v3014_v9, %v3012_v62  ;;  %v3011_v53 = vld [vmem:[%s7537_s9 + $0x220] sm:$0xff]  ;;  %v3045_v9 = vld [vmem:[%s7537_s9 + $0x330] sm:$0xff] }
 0x81e   : > { %v4508_v44 = vpack.c.bf16 %v3013_v36, %v3011_v53  ;;  %v3043_v62 = vld [vmem:[%s7537_s9 + $0x320] sm:$0xff] }
 0x81f   : > { %3739 = vmatmul.mubr.msk.f32.vlgmr.msra.gmra.mrb[26].mxu0 %vm2478_vm9, %v2683_v51  ;;  %v4452_v51 = vpack.c.bf16 %v2957_v40, %v2955_v30  ;;  %v4488_v30 = vpack.c.bf16 %v2993_v33, %v2991_v49  ;;  %v4490_v40 = vpack.c.bf16 %v2998_v50, %v2996_v12  ;;  %v3024_v49 = vld [vmem:[%s7537_s9 + $0x288] sm:$0xff]  ;;  %v3026_v33 = vld [vmem:[%s7537_s9 + $0x298] sm:$0xff]  ;;  %v3047_v36 = vld [vmem:[%s7537_s9 + $0x340] sm:$0xff] }
 0x820   : > { %3343 = vmatprep.mubr.f32.mxu0 %v4815_v16  ;;  %v4518_v50 = vpack.c.bf16 %v3026_v33, %v3024_v49  ;;  %v3062_v49 = vld [vmem:[%s7537_s9 + $0x3b8] sm:$0xff] }
 0x821   : > { %4453 = vmatpush1.bf16.msra.mxu1 %v4452_v51  ;;  %v3000_v51 = vld [vmem:[%s7537_s9 + $0x1c8] sm:$0xff] }
 0x822   : > { %4455 = vmatprep.subr.bf16.mxu1 %v4454_v4  ;;  %v3002_v4 = vld [vmem:[%s7537_s9 + $0x1d8] sm:$0xff] }
 0x823   : > { %v4494_v59 = vpack.c.bf16 %v3002_v4, %v3000_v51  ;;  %v4522_v4 = vpack.c.bf16 %v3030_v55, %v3028_v52 }
 0x825   : > { %4457 = vmatpush1.bf16.msra.mxu1 %v4456_v60  ;;  %v3004_v60 = vld [vmem:[%s7537_s9 + $0x1e8] sm:$0xff] }
 0x826   : > { %4459 = vmatprep.subr.bf16.mxu1 %v4458_v14  ;;  %v3006_v14 = vld [vmem:[%s7537_s9 + $0x1f8] sm:$0xff] }
 0x827   : > { %v4498_v8 = vpack.c.bf16 %v3006_v14, %v3004_v60  ;;  %v4526_v14 = vpack.c.bf16 %v3034_v11, %v3032_v43 }
 0x829   : > { %4461 = vmatpush1.bf16.msra.mxu1 %v4460_v15  ;;  %v4500_v15 = vpack.c.bf16 %v3005_v46, %v3003_v0  ;;  %v3036_v0 = vld [vmem:[%s7537_s9 + $0x2e8] sm:$0xff]  ;;  %v3038_v46 = vld [vmem:[%s7537_s9 + $0x2f8] sm:$0xff] }
 0x82a   : > { %4463 = vmatprep.subr.bf16.mxu1 %v4462_v2  ;;  %v3008_v2 = vld [vmem:[%s7537_s9 + $0x208] sm:$0xff] }
 0x82b   : > { %v4502_v5 = vpack.c.bf16 %v3010_v3, %v3008_v2  ;;  %v4530_v2 = vpack.c.bf16 %v3038_v46, %v3036_v0  ;;  %v3035_v3 = vld [vmem:[%s7537_s9 + $0x2e0] sm:$0xff] }
 0x82d   : > { %4465 = vmatpush1.bf16.msra.mxu1 %v4464_v7 }
 0x82e   : > { %4467 = vmatprep.subr.bf16.mxu1 %v4466_v20 }
 0x831   : > { %4469 = vmatpush1.bf16.msra.mxu1 %v4468_v25  ;;  %v3007_v25 = vld [vmem:[%s7537_s9 + $0x200] sm:$0xff] }
 0x832   : > { %4471 = vmatprep.subr.bf16.mxu1 %v4470_v26  ;;  %v3009_v26 = vld [vmem:[%s7537_s9 + $0x210] sm:$0xff] }
 0x833   : > { %v4504_v1 = vpack.c.bf16 %v3009_v26, %v3007_v25 }
 0x835   : > { %4473 = vmatpush1.bf16.msra.mxu1 %v4472_v28 }
 0x836   : > { %4475 = vmatprep.subr.bf16.mxu1 %v4474_v38 }
 0x839   : > { %4477 = vmatpush1.bf16.msra.mxu1 %v4476_v29  ;;  %v3018_v29 = vld [vmem:[%s7537_s9 + $0x258] sm:$0xff] }
 0x83a   : > { %4479 = vmatprep.subr.bf16.mxu1 %v4478_v35  ;;  %v4510_v22 = vpack.c.bf16 %v3018_v29, %v3016_v54  ;;  %v3049_v54 = vld [vmem:[%s7537_s9 + $0x350] sm:$0xff]  ;;  %v3052_v29 = vld [vmem:[%s7537_s9 + $0x368] sm:$0xff] }
 0x83d   : > { %4481 = vmatpush1.bf16.msra.mxu1 %v4480_v34  ;;  %v3017_v34 = vld [vmem:[%s7537_s9 + $0x250] sm:$0xff] }
 0x83e   : > { %4483 = vmatprep.subr.bf16.mxu1 %v4482_v39  ;;  %v4512_v32 = vpack.c.bf16 %v3017_v34, %v3015_v45  ;;  %v3051_v45 = vld [vmem:[%s7537_s9 + $0x360] sm:$0xff]  ;;  %v3053_v34 = vld [vmem:[%s7537_s9 + $0x370] sm:$0xff] }
 0x83f   : > { %v4548_v47 = vpack.c.bf16 %v3053_v34, %v3051_v45  ;;  %v3356_v45 = vld [vmem:[%s7540_s12 + $0x30] sm:$0xff]  ;;  %v3357_v34 = vld [vmem:[%s7540_s12 + $0x38] sm:$0xff] }
 0x841   : > { %4485 = vmatpush1.bf16.msra.mxu1 %v4484_v48  ;;  %v3019_v48 = vld [vmem:[%s7537_s9 + $0x260] sm:$0xff] }
 0x842   : > { %4487 = vmatprep.subr.bf16.mxu1 %v4486_v63  ;;  %v3021_v63 = vld [vmem:[%s7537_s9 + $0x270] sm:$0xff] }
 0x843   : > { %v4516_v12 = vpack.c.bf16 %v3021_v63, %v3019_v48  ;;  %v3057_v48 = vld [vmem:[%s7537_s9 + $0x390] sm:$0xff]  ;;  %v3060_v63 = vld [vmem:[%s7537_s9 + $0x3a8] sm:$0xff] }
 0x845   : > { %4489 = vmatpush1.bf16.msra.mxu1 %v4488_v30  ;;  %v3023_v30 = vld [vmem:[%s7537_s9 + $0x280] sm:$0xff] }
 0x846   : > { %4491 = vmatprep.subr.bf16.mxu1 %v4490_v40  ;;  %v3025_v40 = vld [vmem:[%s7537_s9 + $0x290] sm:$0xff] }
 0x847   : > { %v4520_v51 = vpack.c.bf16 %v3025_v40, %v3023_v30  ;;  %v3061_v30 = vld [vmem:[%s7537_s9 + $0x3b0] sm:$0xff] }
 0x849   : > { %4493 = vmatpush1.bf16.msra.mxu1 %v4492_v57  ;;  %v3027_v57 = vld [vmem:[%s7537_s9 + $0x2a0] sm:$0xff] }
 0x84a   : > { %4495 = vmatprep.subr.bf16.mxu1 %v4494_v59  ;;  %v3029_v59 = vld [vmem:[%s7537_s9 + $0x2b0] sm:$0xff] }
 0x84b   : > { %v4524_v60 = vpack.c.bf16 %v3029_v59, %v3027_v57 }
 0x84d   : > { %4497 = vmatpush1.bf16.msra.mxu1 %v4496_v19  ;;  %v3031_v19 = vld [vmem:[%s7537_s9 + $0x2c0] sm:$0xff] }
 0x84e   : > { %4499 = vmatprep.subr.bf16.mxu1 %v4498_v8  ;;  %v3033_v8 = vld [vmem:[%s7537_s9 + $0x2d0] sm:$0xff] }
 0x851   : > { %4501 = vmatpush1.bf16.msra.mxu1 %v4500_v15  ;;  %v4528_v15 = vpack.c.bf16 %v3033_v8, %v3031_v19 }
 0x852   : > { %4503 = vmatprep.subr.bf16.mxu1 %v4502_v5  ;;  %v3037_v5 = vld [vmem:[%s7537_s9 + $0x2f0] sm:$0xff] }
 0x8f2   : > { %v2915_v6 = vpop.f32.mrb[26].mxu0 }
 0x8f3   : > { %v2920_v58 = vmax.f32 %v2915_v6, 0.0  ;;  %v2917_v7 = vpop.f32.mrb[27].mxu0  ;;  %v3040_v6 = vld [vmem:[%s7537_s9 + $0x308] sm:$0xff] }
 0x8f4   : > { %v2921_v20 = vmax.f32 %v2917_v7, 0.0  ;;  %v4532_v7 = vpack.c.bf16 %v3037_v5, %v3035_v3 }
 0x8f5   : > { %v2924_v21 = vrot.slane %v2920_v58, 1  ;;  %v2933_v27 = vrot.slane %v2920_v58, 2 }
 0x8f6   : > { %v2925_v10 = vrot.slane %v2921_v20, 1  ;;  %v2934_v24 = vrot.slane %v2921_v20, 2 }
 0x8f7   : > { %2926 = vrot.lane.b32.xlu0 %v2924_v21, %s7599_s21  ;;  %v3039_v21 = vld [vmem:[%s7537_s9 + $0x300] sm:$0xff] }
 0x8f8   : > { %2928 = vrot.lane.b32.xlu1 %v2925_v10, %s7599_s21  ;;  %v3041_v10 = vld [vmem:[%s7537_s9 + $0x310] sm:$0xff] }
 0x8f9   : > { %v4536_v25 = vpack.c.bf16 %v3041_v10, %v3039_v21 }
 0x8fb   : > { %2935 = vrot.lane.b32.xlu0 %v2933_v27, %s7600_s18  ;;  %v3044_v27 = vld [vmem:[%s7537_s9 + $0x328] sm:$0xff] }
 0x8fc   : > { %2937 = vrot.lane.b32.xlu1 %v2934_v24, %s7600_s18  ;;  %v3046_v24 = vld [vmem:[%s7537_s9 + $0x338] sm:$0xff] }
 0x8fd   : > { %v4538_v26 = vpack.c.bf16 %v3046_v24, %v3044_v27 }
 0x969   : > { %v7152_v56 = vpop.permute.xlu0 %2926 }
 0x96a   : > { %v7154_v28 = vpop.permute.xlu1 %2928  ;;  %v2941_v38 = vsel %vm1481_vm4, %v2921_v20, %v7152_v56 }
 0x96b   : > { %3141 = vmatprep.mubr.f32.mxu1 %v2941_v38  ;;  %v3050_v38 = vld [vmem:[%s7537_s9 + $0x358] sm:$0xff]  ;;  %v2930_v52 = vsel %vm1481_vm4, %v7152_v56, %v7154_v28 }
 0x96c   : > { %3142 = vmatmul.mubr.f32.vlgmr.msra.gmra.mrb[20].mxu1 %v2920_v58  ;;  %v3042_v58 = vld [vmem:[%s7537_s9 + $0x318] sm:$0xff] }
 0x96d   : > { %4505 = vmatpush1.bf16.msra.mxu1 %v4504_v1  ;;  %v7170_v35 = vpop.permute.xlu0 %2935  ;;  %v4534_v20 = vpack.c.bf16 %v3042_v58, %v3040_v6  ;;  %v3048_v1 = vld [vmem:[%s7537_s9 + $0x348] sm:$0xff] }
 0x96e   : > { %v2938_v37 = vpop.permute.xlu1 %2937  ;;  %4507 = vmatprep.subr.bf16.mxu1 %v4506_v31  ;;  %v4540_v31 = vpack.c.bf16 %v3045_v9, %v3043_v62  ;;  %v4542_v53 = vpack.c.bf16 %v3050_v38, %v3048_v1  ;;  %v2942_v55 = vsel %vm2495_vm10, %v2930_v52, %v7170_v35  ;;  %v3351_v62 = vld [vmem:[%s7540_s12 + $0x8] sm:$0xff]  ;;  %v3366_v52 = vld [vmem:[%s7540_s12 + $0x80] sm:$0xff] }
 0x96f   : > { %v2939_v39 = vsel %vm2495_vm10, %v7170_v35, %v2938_v37  ;;  %v4544_v37 = vpack.c.bf16 %v3049_v54, %v3047_v36  ;;  %v3232_v35 = vand.u32 63, %v5255_v17  ;;  %v3352_v36 = vld [vmem:[%s7540_s12 + $0x10] sm:$0xff]  ;;  %v3353_v54 = vld [vmem:[%s7540_s12 + $0x18] sm:$0xff] }
 0x970   : > { %3740 = vmatprep.mubr.msk.f32.mxu1 %vm2478_vm9, %v2939_v39  ;;  %v3056_v39 = vld [vmem:[%s7537_s9 + $0x388] sm:$0xff] }
 0x971   : > { %4509 = vmatpush1.bf16.msra.mxu1 %v4508_v44  ;;  %v3054_v44 = vld [vmem:[%s7537_s9 + $0x378] sm:$0xff]  ;;  %vm3234_vm15 = vcmp.lt.s32.totalorder %v3232_v35, 32  ;;  %v3372_v35 = vld [vmem:[%s7540_s12 + $0xb0] sm:$0xff] }
 0x972   : > { %4511 = vmatprep.subr.bf16.mxu1 %v4510_v22  ;;  %v4546_v22 = vpack.c.bf16 %v3054_v44, %v3052_v29  ;;  %v4562_v29 = vpack.c.bf16 %v3353_v54, %v3352_v36  ;;  %v3354_v44 = vld [vmem:[%s7540_s12 + $0x20] sm:$0xff] }
 0x975   : > { %4513 = vmatpush1.bf16.msra.mxu1 %v4512_v32  ;;  %v4550_v32 = vpack.c.bf16 %v3058_v13, %v3056_v39  ;;  %v4568_v39 = vpack.c.bf16 %v3357_v34, %v3356_v45  ;;  %v3358_v13 = vld [vmem:[%s7540_s12 + $0x40] sm:$0xff] }
 0x976   : > { %4515 = vmatprep.subr.bf16.mxu1 %v4514_v61  ;;  %v3055_v61 = vld [vmem:[%s7537_s9 + $0x380] sm:$0xff] }
 0x977   : > { %v4552_v33 = vpack.c.bf16 %v3057_v48, %v3055_v61  ;;  %v3360_v61 = vld [vmem:[%s7540_s12 + $0x50] sm:$0xff]  ;;  %v3361_v48 = vld [vmem:[%s7540_s12 + $0x58] sm:$0xff] }
 0x979   : > { %4517 = vmatpush1.bf16.msra.mxu1 %v4516_v12  ;;  %v4554_v12 = vpack.c.bf16 %v3062_v49, %v3060_v63  ;;  %v4574_v63 = vpack.c.bf16 %v3361_v48, %v3360_v61  ;;  %v3362_v49 = vld [vmem:[%s7540_s12 + $0x60] sm:$0xff] }
 0x97a   : > { %4519 = vmatprep.subr.bf16.mxu1 %v4518_v50  ;;  %v3059_v50 = vld [vmem:[%s7537_s9 + $0x3a0] sm:$0xff] }
 0x97b   : > { %v4556_v40 = vpack.c.bf16 %v3061_v30, %v3059_v50  ;;  %v3364_v50 = vld [vmem:[%s7540_s12 + $0x70] sm:$0xff]  ;;  %v3365_v30 = vld [vmem:[%s7540_s12 + $0x78] sm:$0xff] }
 0x97d   : > { %4521 = vmatpush1.bf16.msra.mxu1 %v4520_v51  ;;  %v3063_v51 = vld [vmem:[%s7538_s10] sm:$0x3] }
 0x97e   : > { %4523 = vmatprep.subr.bf16.mxu1 %v4522_v4  ;;  %v3068_v4 = vrot.slane %v3063_v51, %v5179_v42  ;;  %v3072_v57 = vrot.slane %v3063_v51, %v5176_v41 }
 0x981   : > { %4525 = vmatpush1.bf16.msra.mxu1 %v4524_v60 }
 0x982   : > { %4527 = vmatprep.subr.bf16.mxu1 %v4526_v14  ;;  %v3233_v14 = vand.u32 63, %v5258_v18 }
 0x984   : > { %vm3235_vm2 = vcmp.lt.s32.totalorder %v3233_v14, 32  ;;  %v3448_v14 = vld [vmem:[%s7541_s13] sm:$0xff] }
 0x985   : > { %4529 = vmatpush1.bf16.msra.mxu1 %v4528_v15 }
 0x986   : > { %4531 = vmatprep.subr.bf16.mxu1 %v4530_v2 }
 0x989   : > { %4533 = vmatpush1.bf16.msra.mxu1 %v4532_v7 }
 0x98a   : > { %4535 = vmatprep.subr.bf16.mxu1 %v4534_v20 }
 0x98d   : > { %4537 = vmatpush1.bf16.msra.mxu1 %v4536_v25 }
 0x98e   : > { %4539 = vmatprep.subr.bf16.mxu1 %v4538_v26  ;;  %v3350_v26 = vld [vmem:[%s7540_s12] sm:$0xff] }
 0x991   : > { %4541 = vmatpush1.bf16.msra.mxu1 %v4540_v31  ;;  %v3268_v31 = vld [vmem:[#allocation2] sm:$0x1] }
 0x992   : > { %4543 = vmatprep.subr.bf16.mxu1 %v4542_v53  ;;  %v4559_v53 = vpack.c.bf16 %v3351_v62, %v3350_v26  ;;  %v3456_v62 = vld [vmem:[%s7542_s14] sm:$0x1] }
 0x995   : > { %4545 = vmatpush1.bf16.msra.mxu1 %v4544_v37  ;;  %v3355_v37 = vld [vmem:[%s7540_s12 + $0x28] sm:$0xff] }
 0x996   : > { %4547 = vmatprep.subr.bf16.mxu1 %v4546_v22  ;;  %v4565_v22 = vpack.c.bf16 %v3355_v37, %v3354_v44  ;;  %v3548_v37 = vld [vmem:[%s7544_s16] sm:$0x1] }
 0x999   : > { %4549 = vmatpush1.bf16.msra.mxu1 %v4548_v47  ;;  %v3359_v47 = vld [vmem:[%s7540_s12 + $0x48] sm:$0xff] }
 0x99a   : > { %4551 = vmatprep.subr.bf16.mxu1 %v4550_v32  ;;  %v4571_v32 = vpack.c.bf16 %v3359_v47, %v3358_v13 }
 0x99d   : > { %4553 = vmatpush1.bf16.msra.mxu1 %v4552_v33  ;;  %v3363_v33 = vld [vmem:[%s7540_s12 + $0x68] sm:$0xff] }
 0x99e   : > { %4555 = vmatprep.subr.bf16.mxu1 %v4554_v12  ;;  %v4577_v12 = vpack.c.bf16 %v3363_v33, %v3362_v49 }
 0x9a1   : > { %4557 = vmatpush1.bf16.msra.mxu1 %v4556_v40  ;;  %v4580_v40 = vpack.c.bf16 %v3365_v30, %v3364_v50 }
 0x9a2   : > { %4594 = vmatprep.subr.bf16.mxu1 %v4826_v23 }
 0x9a4   : > { %3213 = vmatmul.mubr.f32.vlgmr.msra.gmra.mrb[20].mxu1 %v2942_v55  ;;  %v3367_v55 = vld [vmem:[%s7540_s12 + $0x88] sm:$0xff] }
 0x9a5   : > { %3914 = vmatprep.mubr.msk.f32.mxu1 %vm4828_vm8, %v4815_v16  ;;  %v4583_v51 = vpack.c.bf16 %v3367_v55, %v3366_v52 }
 0xa77   : > { %v3214_v59 = vpop.f32.mrb[20].mxu1 }
 0xa78   : > { %v4616_v43 = vadd.f32 %v3214_v59, %v3068_v4  ;;  %v3216_v56 = vpop.f32.mrb[21].mxu1  ;;  %v3368_v4 = vld [vmem:[%s7540_s12 + $0x90] sm:$0xff] }
 0xa79   : > { %v4617_v28 = vadd.f32 %v3216_v56, %v3072_v57  ;;  %v3369_v57 = vld [vmem:[%s7540_s12 + $0x98] sm:$0xff]  ;;  %v3371_v56 = vld [vmem:[%s7540_s12 + $0xa8] sm:$0xff] }
 0xa7a   : > { %3221 = vrot.lane.b32.xlu0 %v4616_v43, %s7601_s26  ;;  %v4586_v59 = vpack.c.bf16 %v3369_v57, %v3368_v4 }
 0xa7b   : > { %3223 = vrot.lane.b32.xlu1 %v4617_v28, %s7601_s26 }
 0xa7e   : > { %3228 = vrot.lane.b32.xlu0 %v4616_v43, %s7599_s21 }
 0xaec   : > { %v3222_v11 = vpop.permute.xlu0 %3221 }
 0xaed   : > { %v3224_v60 = vpop.permute.xlu1 %3223 }
 0xaee   : > { %v3225_v42 = vsel %vm2478_vm9, %v3222_v11, %v3224_v60  ;;  %v3373_v11 = vld [vmem:[%s7540_s12 + $0xb8] sm:$0xff] }
 0xaef   : > { %v3236_v41 = vmul.f32 %v4616_v43, %v3225_v42  ;;  %v3449_v42 = vld [vmem:[%s7541_s13 + $0x8] sm:$0xff] }
 0xaf0   : > { %v3229_v19 = vpop.permute.xlu0 %3228 }
 0xaf1   : > { %v3231_v8 = vsel %vm1481_vm4, %v3224_v60, %v3229_v19  ;;  %v3238_v0 = vsel %vm3234_vm15, %v3236_v41, %v4616_v43  ;;  %v3370_v43 = vld [vmem:[%s7540_s12 + $0xa0] sm:$0xff]  ;;  %v4592_v60 = vpack.c.bf16 %v3373_v11, %v3372_v35  ;;  %v3450_v41 = vld [vmem:[%s7541_s13 + $0x10] sm:$0xff]  ;;  %v4595_v19 = vpack.c.bf16 %v3449_v42, %v3448_v14 }
 0xaf2   : > { %v3237_v46 = vmul.f32 %v4617_v28, %v3231_v8  ;;  %3242 = vrot.lane.b32.xlu1 %v3238_v0, %s7600_s18  ;;  %v3451_v8 = vld [vmem:[%s7541_s13 + $0x18] sm:$0xff] }
 0xaf3   : > { %4596 = vmatpush3.bf16.msra.mxu1 %v4595_v19 }
 0xaf4   : > { %v3239_v15 = vsel %vm3235_vm2, %v3237_v46, %v4617_v28  ;;  %v4589_v28 = vpack.c.bf16 %v3371_v56, %v3370_v43  ;;  %4597 = vmatprep.subr.bf16.mxu1 %v4826_v23  ;;  %v3452_v46 = vld [vmem:[%s7541_s13 + $0x20] sm:$0xff] }
 0xaf5   : > { %3244 = vrot.lane.b32.xlu0 %v3239_v15, %s7600_s18  ;;  %v3249_v2 = vmax.f32 %v3239_v15, %v3238_v0  ;;  %s7602_s18 = smov 16  }
 0xb64   : > { %v3243_v3 = vpop.permute.xlu1 %3242 }
 0xb65   : > { %v3253_v5 = vmax.f32 %v3249_v2, %v3243_v3  ;;  %v3251_v10 = vsel %vm2495_vm10, %v3239_v15, %v3243_v3  ;;  %v3453_v15 = vld [vmem:[%s7541_s13 + $0x28] sm:$0xff] }
 0xb66   : > { %v4601_v2 = vpack.c.bf16 %v3453_v15, %v3452_v46 }
 0xb67   : > { %v3257_v6 = vrot.slane %v3253_v5, 1  ;;  %v3245_v18 = vpop.permute.xlu0 %3244  ;;  %v3263_v20 = vrot.slane %v3253_v5, 2 }
 0xb68   : > { %v3246_v58 = vsel %vm2495_vm10, %v3243_v3, %v3245_v18  ;;  %v3455_v18 = vld [vmem:[%s7541_s13 + $0x38] sm:$0xff] }
 0xb69   : > { %v3261_v7 = vmax.f32 %v3253_v5, %v3257_v6  ;;  %v3248_v21 = vmax.f32 %v3238_v0, %v3246_v58  ;;  %v4598_v0 = vpack.c.bf16 %v3451_v8, %v3450_v41  ;;  %v3454_v6 = vld [vmem:[%s7541_s13 + $0x30] sm:$0xff] }
 0xb6a   : > { %v4604_v58 = vpack.c.bf16 %v3455_v18, %v3454_v6 }
 0xb6b   : > { %v3252_v27 = vmax.f32 %v3248_v21, %v3251_v10  ;;  %v3267_v24 = vmax.f32 %v3261_v7, %v3263_v20  ;;  %4599 = vmatpush3.bf16.msra.mxu1 %v4598_v0  ;;  %v3544_v10 = vld [vmem:[%s7543_s15] sm:$0xff] }
 0xb6c   : > { %4600 = vmatprep.subr.bf16.mxu1 %v4826_v23 }
 0xb6d   : > { %v3256_v25 = vrot.slane %v3252_v27, 1  ;;  %3741 = vmatprep.subr.msk.mxu0 %vm1210_vm14, %v3267_v24  ;;  %v3262_v1 = vrot.slane %v3252_v27, 2  ;;  %v3546_v24 = vld [vmem:[%s7543_s15 + $0x10] sm:$0xff] }
 0xb6f   : > { %v3260_v9 = vmax.f32 %v3252_v27, %v3256_v25  ;;  %4602 = vmatpush3.bf16.msra.mxu1 %v4601_v2  ;;  %v3547_v25 = vld [vmem:[%s7543_s15 + $0x18] sm:$0xff] }
 0xb70   : > { %4603 = vmatprep.subr.bf16.mxu1 %v4826_v23  ;;  %v4610_v26 = vpack.c.bf16 %v3547_v25, %v3546_v24 }
 0xb71   : > { %v3266_v38 = vmax.f32 %v3260_v9, %v3262_v1 }
 0xb73   : > { %3742 = vmatpush1.msk.msra.mxu0 %vm1210_vm14, %v3266_v38  ;;  %4605 = vmatpush3.bf16.msra.mxu1 %v4604_v58 }
 0xb74   : > { %3743 = vmatmul.mubr.msk.f32.vlgmr.msra.gmra.mrb[28].mxu0 %vm3269_vm3, %v3268_v31  ;;  %4558 = vmatprep.subr.bf16.mxu0 %v4826_v23 }
 0xb75   : > { %4560 = vmatpush1.bf16.msra.mxu0 %v4559_v53 }
 0xb76   : > { %4561 = vmatprep.subr.bf16.mxu0 %v4826_v23 }
 0xb79   : > { %4563 = vmatpush1.bf16.msra.mxu0 %v4562_v29 }
 0xb7a   : > { %4564 = vmatprep.subr.bf16.mxu0 %v4826_v23 }
 0xb7d   : > { %4566 = vmatpush1.bf16.msra.mxu0 %v4565_v22 }
 0xb7e   : > { %4567 = vmatprep.subr.bf16.mxu0 %v4826_v23 }
 0xb81   : > { %4569 = vmatpush1.bf16.msra.mxu0 %v4568_v39 }
 0xb82   : > { %4570 = vmatprep.subr.bf16.mxu0 %v4826_v23 }
 0xb85   : > { %4572 = vmatpush1.bf16.msra.mxu0 %v4571_v32 }
 0xb86   : > { %4573 = vmatprep.subr.bf16.mxu0 %v4826_v23 }
 0xb89   : > { %4575 = vmatpush1.bf16.msra.mxu0 %v4574_v63 }
 0xb8a   : > { %4576 = vmatprep.subr.bf16.mxu0 %v4826_v23 }
 0xb8d   : > { %4578 = vmatpush1.bf16.msra.mxu0 %v4577_v12 }
 0xb8e   : > { %4579 = vmatprep.subr.bf16.mxu0 %v4826_v23 }
 0xb91   : > { %4581 = vmatpush1.bf16.msra.mxu0 %v4580_v40 }
 0xb92   : > { %4582 = vmatprep.subr.bf16.mxu0 %v4826_v23 }
 0xb95   : > { %4584 = vmatpush1.bf16.msra.mxu0 %v4583_v51 }
 0xb96   : > { %4585 = vmatprep.subr.bf16.mxu0 %v4826_v23 }
 0xb99   : > { %4587 = vmatpush1.bf16.msra.mxu0 %v4586_v59 }
 0xb9a   : > { %4588 = vmatprep.subr.bf16.mxu0 %v4826_v23 }
 0xb9d   : > { %4590 = vmatpush1.bf16.msra.mxu0 %v4589_v28 }
 0xb9e   : > { %4591 = vmatprep.subr.bf16.mxu0 %v4826_v23 }
 0xba1   : > { %4593 = vmatpush1.bf16.msra.mxu0 %v4592_v60 }
 0xba2   : > { %4606 = vmatprep.subr.bf16.mxu0 %v4826_v23 }
 0xc47   : > { %v3345_v3 = vpop.f32.mrb[28].mxu0 }
 0xc48   : > { %v3347_v5 = vpop.f32.mrb[29].mxu0 }
 0xc49   : > { %3744 = vmatprep.mubr.msk.f32.mxu0 %vm2495_vm10, %v3347_v5 }
 0xc4a   : > { %3442 = vmatmul.mubr.f32.vlgmr.msra.gmra.mrb[30].mxu0 %v3345_v3 }
 0xc4b   : > { %3925 = vmatprep.mubr.msk.f32.mxu0 %vm4828_vm8, %v4815_v16  ;;  %v3545_v16 = vld [vmem:[%s7543_s15 + $0x8] sm:$0xff] }
 0xc4c   : > { %v4607_v27 = vpack.c.bf16 %v3545_v16, %v3544_v10 }
 0xc4e   : > { %4608 = vmatpush3.bf16.msra.mxu0 %v4607_v27 }
 0xc4f   : > { %4609 = vmatprep.subr.bf16.mxu0 %v4826_v23 }
 0xc52   : > { %4611 = vmatpush3.bf16.msra.mxu0 %v4610_v26 }
 0xd1d   : > { %v3443_v7 = vpop.f32.mrb[30].mxu0 }
 0xd1e   : > { %v3447_v20 = vmax.f32 %v3443_v7, 0.0  ;;  %v3445_v21 = vpop.f32.mrb[31].mxu0 }
 0xd20   : > { %3915 = vmatmul.mubr.msk.f32.vlgmr.msra.gmra.mrb[22].mxu1 %vm2495_vm10, %v3447_v20 }
 0xdf3   : > { %v3526_v9 = vpop.f32.mrb[22].mxu1 }
 0xdf4   : > { %v3527_v1 = vadd.f32 %v3526_v9, %v3456_v62  ;;  %v3916_v38 = vpop.f32.mrb[23].mxu1 }
 0xdf6   : > { %3534 = vrot.lane.b32.xlu0 %v3527_v1, %s7602_s18  ;;  %3531 = vrot.lane.b32.xlu1 %v3527_v1, %s7592_s23  ;;  %s541_s23 = sand.u32 1, %s4805_s27   ;;  %s4757_s18 = scalar_lea.vmem %s4756_s0, 32 }
 0xdf7   : > { %s542_s19 = scalar_lea.vmem [#allocation3], %s541_s23  ;;  %s3635_s26 = scalar_lea.sflag [#allocation4], %s541_s23 }
 0xdf8   : > { %s3647_s22 = sshll.u32 %s542_s19, 4  ;;  %s7488_s22 = int_to_ptr.vmem [resolvable:$true] %s3647_s22 }
 0xdf9   : > { %s4751_s21 = scalar_lea.vmem %s7488_s22, 16  ;;  %p4758_p0 = scmp.lt.s32.totalorder %s7488_s22, %s4756_s0 }
 0xdfa   : > { %p4752_p11 = scmp.ne.s32.totalorder %s7488_s22, %s4751_s21  ;;  %p4759_p1 = scmp.lt.s32.totalorder %s4757_s18, %s4751_s21 }
 0xdfc   : > { %p4753_p12 = pnand %p4752_p11, %p4961_p5  ;;  %p4760_p2 = por %p4759_p1, %p4758_p0 }
 0xdfe   : > { %p4754_p13 = pneg %p4753_p12 }
 0xe00   : > { %p4761_p3 = pnand %p4760_p2, %p4754_p13 }
 0xe68   : > { %v3535_v23 = vpop.permute.xlu0 %3534  ;;  %v3532_v31 = vpop.permute.xlu1 %3531 }
 0xe69   : > { %v3537_v53 = vsel %vm1104_vm13, %v3532_v31, %v3535_v23 }
 0xe6a   : > { %v3539_v36 = vmul.f32 %v3537_v53, %v3527_v1 }
 0xe6c   : > { %v3540_v54 = vsel %vm3538_vm5, %v3539_v36, %v3527_v1 }
 0xe6d   : > { %v3542_v29 = vmul.f32 0.1, %v3540_v54  ;;  %vm3541_vm1 = vcmp.ge.f32.partialorder %v3540_v54, 0.0 }
 0xe6f   : > { %v3543_v44 = vsel %vm3541_vm1, %v3540_v54, %v3542_v29 }
 0xe70   : > { %3926 = vmatmul.mubr.msk.f32.vlgmr.msra.gmra.mrb[32].mxu0 %vm1481_vm4, %v3543_v44 }
 0xf43   : > { %v3618_v22 = vpop.f32.mrb[32].mxu0 }
 0xf44   : > { %v3619_v45 = vadd.f32 %v3618_v22, %v3548_v37  ;;  %v3927_v34 = vpop.f32.mrb[33].mxu0 }
 0xf46   : > { %v3622_v17 = vsel %vm1210_vm14, %v3619_v45, -inf }
 0xf47   : > { %3623 = vmax.xlane.f32.xlu1 %v3622_v17 }
 0xfd4   : > { %v3624_v39 = vpop.xlane.xlu1 %3623 }
 0xfd5   : > { %v3625_v13 = vsub.f32 %v3619_v45, %v3624_v39 }
 0xfd7   : > { %v3626_v47 = vmul.f32 1.442695, %v3625_v13 }
 0xfd9   : > { %4747 = vpow2.f32 %v3626_v47 }
 0xfe3   : > { %v4748_v32 = vpop.eup %4747 }
 0xfe4   : > { %v3628_v61 = vsel %vm1210_vm14, %v4748_v32, 0.0 }
 0xfe5   : > { %3629 = vadd.xlane.f32.xlu0 %v3628_v61 }
0x1072   : > { %v3630_v48 = vpop.xlane.xlu0 %3629 }
0x1073   : > { %4749 = vrcp.f32 %v3630_v48 }
0x107d   : > { %v4750_v63 = vpop.eup %4749 }
0x107e   : > { %v3632_v49 = vmul.f32 %v4750_v63, %v4748_v32 }
0x1080   : > { %3633 = vst [vmem:[%s542_s19] sm:$0x1] %v3632_v49 }
0x1081   : > { %4764 = shalt.err (!%p4761_p3)
}
0x1082   : > { %s4765_s3 = scalar_lea.hbm %s7486_s25, 16  ;;  %s4769_s1 = scalar_lea.hbm %s7545_s17, 32 }
0x1083   : > { %p4766_p4 = scmp.ne.s32.totalorder %s7486_s25, %s4765_s3  ;;  %p4770_p9 = scmp.lt.u32.totalorder %s7486_s25, %s7545_s17 }
0x1084   : > { %p4771_p10 = scmp.lt.u32.totalorder %s4769_s1, %s4765_s3  ;;  %p4773_p12 = scmp.lt.u32.totalorder %s4765_s3, %s7486_s25 }
0x1085   : > { %p4767_p7 = pnand %p4766_p4, %p4961_p5 }
0x1086   : > { %p4772_p11 = por %p4771_p10, %p4770_p9 }
0x1087   : > { %p4768_p8 = pneg %p4767_p7 }
0x1088   : > { %p4774_p13 = por %p4773_p12, %p4772_p11 }
0x108a   : > { %p4775_p0 = pnand %p4774_p13, %p4768_p8 }
0x108c   : > { %4778 = shalt.err (!%p4775_p0)
}
0x108d   : > { %4634 = dma.vmem_to_hbm [thread:$0]  (%p4961_p5), %s7488_s22, 16, %s7486_s25, %s3635_s26  }
0x108e PF: > { %s7603_s30 = sld [smem:[#allocation6_spill]]  ;;  %p4640_p1 = scmp.ge.s32.totalorder %s4813_s29, 2 }
0x1090   : > { %p4637_p2 = pnand %p4640_p1, %p4965_p6 }
0x1094   : > { %s3659_s11 = sand.u32 1, %s7603_s30  }
0x1095   : > { %s3660_s0 = scalar_lea.sflag [#allocation4], %s3659_s11 }
0x1096   : > { %4796 = dma.done.wait (!%p4637_p2), %s3660_s0, 16  }
0x1097   : > { %4798 = vsyncadd (!%p4637_p2), %s3660_s0, 4294967280  ;;  %s7605_s29 = sld [smem:[#allocation8_spill]]  ;;  %s7606_s18 = sld [smem:[#allocation7_spill]] }
0x1098   : > { %s7607_s28 = sld [smem:[#allocation9_spill]]  ;;  %s7608_s26 = smov %s4805_s27 }
0x109d   : > { %p29_p3 = scmp.ge.s32.totalorder %s7605_s29, 4   ;;  %s7609_s27 = smov %s7606_s18 }
0x109f   :  { %31 = sbr.rel (!%p29_p3) target bundleno = 8 (0x8), region = 123 }
0x10a6   :  { %3664 = vsyncpa [#allocation4], 1 }
0x10a7   :  { %3666 = vsyncpa [#allocation4 + $0x1], 1 }

</bundles_post_ra>
